<compile_context>
chip_gen: v7x
topology: tpu7x:2x2x1
jax: 0.10.0
libtpu: 0.0.40
codegen_flags: <defaults>
</compile_context>

<pallas_src>
import jax
import jax.numpy as jnp
from jax.experimental import pallas as pl
from jax.experimental.pallas import tpu as pltpu

B = 8          # batch (M = B*H*W = 512 total, 256 per grid step)
C = 128        # channels (fills the 128-lane vreg; AlphaZero uses 256)
H = W = 8      # chess board spatial size
BATCH_BLOCK = 4
BN_EPS = 1e-5

# Tap order (dy, dx) matches the (kh, kw, cin) row flattening in fold_conv_bn.
_TAPS = tuple((dy, dx) for dy in (-1, 0, 1) for dx in (-1, 0, 1))


# ============================ Pallas kernel =================================

def _shifted_tap(x, dy, dx):
    """Return y with y[b,h,w,c] = x[b,h+dy,w+dx,c], zero outside the board."""
    Bn, Hh, Ww, Cc = x.shape
    y = x
    if dx != 0:
        # Sublane rotate on the otherwise-idle XLU slot, then mask the wrap.
        y = pltpu.roll(y, shift=(-dx) % Ww, axis=2)
        w_idx = jax.lax.broadcasted_iota(jnp.int32, y.shape, 2)
        y = jnp.where((w_idx + dx >= 0) & (w_idx + dx < Ww), y, 0.0)
    if dy != 0:
        # H is an outer dim: shifting is vreg re-addressing plus one zero row.
        zrow = jnp.zeros((Bn, 1, Ww, Cc), y.dtype)
        if dy > 0:
            y = jnp.concatenate([y[:, dy:, :, :], zrow], axis=1)
        else:
            y = jnp.concatenate([zrow, y[:, :dy, :, :]], axis=1)
    return y


def _conv3x3(x_nhwc, w_ref):
    """3x3 'same' conv as 9 per-tap MXU matmuls accumulated in f32.

    x_nhwc: (BB, H, W, C) f32 activations (in vregs / VMEM)
    w_ref : (9*C, C) bf16 weight ref, row index = (kh*3 + kw)*C + cin
    returns (BB*H*W, C) f32
    """
    Bn, Hh, Ww, Cc = x_nhwc.shape
    M = Bn * Hh * Ww
    acc = None
    for t, (dy, dx) in enumerate(_TAPS):
        xt = _shifted_tap(x_nhwc, dy, dx).reshape(M, Cc).astype(jnp.bfloat16)
        wt = w_ref[t * Cc:(t + 1) * Cc, :]           # aligned static (C, C) slice
        d = jnp.dot(xt, wt, preferred_element_type=jnp.float32)
        acc = d if acc is None else acc + d
    return acc


def _residual_block_kernel(x_ref, w1_ref, b1_ref, w2_ref, b2_ref, o_ref):
    """Fused residual block for one batch block.

    x_ref : (BB, H, W, C) f32   NHWC activation tile
    w*_ref: (9*C, C)      bf16  im2col conv weight with BN scale folded in
    b*_ref: (1, C)        f32   folded BN shift
    o_ref : (BB*H*W, C)   f32   output, rows ordered (b, h, w)  (lane dense)
    """
    Bn, Hh, Ww, Cc = x_ref.shape
    M = Bn * Hh * Ww
    x = x_ref[...]                                    # (BB, H, W, C) f32

    # conv1 + bn1 + relu  (bias-add / ReLU in f32)
    h = jnp.maximum(_conv3x3(x, w1_ref) + b1_ref[...], 0.0)     # (M, C)

    # conv2 + bn2 + residual add + relu; h never leaves VMEM
    y = _conv3x3(h.reshape(Bn, Hh, Ww, Cc), w2_ref)
    y = y + b2_ref[...] + x.reshape(M, Cc)
    o_ref[...] = jnp.maximum(y, 0.0).astype(o_ref.dtype)


# ============================== wrapper =====================================

def residual_block_forward(x_nchw, w1_mat, b1, w2_mat, b2, *, batch_block=BATCH_BLOCK):
    """x_nchw: (B, C, H, W) float32 (PyTorch layout). Returns the same shape."""
    Bn, Cc, Hh, Ww = x_nchw.shape
    bb = batch_block if (Bn % batch_block == 0) else Bn
    m_blk = bb * Hh * Ww
    m_total = Bn * Hh * Ww

    x = jnp.transpose(x_nchw, (0, 2, 3, 1))           # -> NHWC (free XLA op)

    flops = 2 * (2 * m_total * (9 * Cc) * Cc)         # 2 convs, 2*M*K*N each
    bytes_accessed = (m_total * Cc * 4 * 2             # x in + out
                      + 2 * (9 * Cc * Cc) * 2          # bf16 weights
                      + 2 * Cc * 4)                    # biases

    out2d = pl.pallas_call(
        _residual_block_kernel,
        grid=(Bn // bb,),
        in_specs=[
            pl.BlockSpec((bb, Hh, Ww, Cc), lambda i: (i, 0, 0, 0)),
            pl.BlockSpec((9 * Cc, Cc), lambda i: (0, 0)),   # resident weights
            pl.BlockSpec((1, Cc), lambda i: (0, 0)),
            pl.BlockSpec((9 * Cc, Cc), lambda i: (0, 0)),
            pl.BlockSpec((1, Cc), lambda i: (0, 0)),
        ],
        out_specs=pl.BlockSpec((m_blk, Cc), lambda i: (i, 0)),
        out_shape=jax.ShapeDtypeStruct((m_total, Cc), jnp.float32),
        compiler_params=pltpu.CompilerParams(
            dimension_semantics=("parallel",)),
        cost_estimate=pl.CostEstimate(flops=flops, transcendentals=0,
                                      bytes_accessed=bytes_accessed),
    )(x, w1_mat, b1.reshape(1, Cc), w2_mat, b2.reshape(1, Cc))

    out = out2d.reshape(Bn, Hh, Ww, Cc)               # free XLA reshape
    return jnp.transpose(out, (0, 3, 1, 2))           # back to NCHW


# ===================== parameter prep (fold BN into conv) ===================

def fold_conv_bn(w_oihw, gamma, beta, mean, var, eps=BN_EPS):
    """Fold eval-mode BatchNorm into a conv weight given in torch OIHW layout.

    Returns:
      w_mat: (9*Cin, Cout) bf16 im2col weight, row index = (kh*3 + kw)*Cin + cin
      bias : (Cout,) f32 folded BN shift
    """
    scale = gamma / jnp.sqrt(var + eps)                      # (Cout,)
    w = w_oihw * scale[:, None, None, None]
    cout, cin = w_oihw.shape[0], w_oihw.shape[1]
    w_mat = jnp.transpose(w, (2, 3, 1, 0)).reshape(9 * cin, cout)  # (kh,kw,ci,co)
    bias = beta - mean * scale
    return w_mat.astype(jnp.bfloat16), bias.astype(jnp.float32)


# ====================== pure-JAX reference (for checking) ===================

def residual_block_ref(x, w1_oihw, w2_oihw, gamma, beta, mean, var, eps=BN_EPS):
    scale = gamma / jnp.sqrt(var + eps)
    shift = beta - mean * scale

    def conv_bn(a, w):
        y = jax.lax.conv_general_dilated(
            a, w, window_strides=(1, 1), padding="SAME",
            dimension_numbers=("NCHW", "OIHW", "NCHW"))
        return y * scale[None, :, None, None] + shift[None, :, None, None]

    h = jnp.maximum(conv_bn(x, w1_oihw), 0.0)
    return jnp.maximum(conv_bn(h, w2_oihw) + x, 0.0)


# ================================ main ======================================

if __name__ == "__main__":
    key = jax.random.PRNGKey(0)
    kx, k1, k2 = jax.random.split(key, 3)

    x = jax.random.normal(kx, (B, C, H, W), jnp.float32)     # NCHW like PyTorch
    w_std = (2.0 / (C * 9)) ** 0.5
    w1_oihw = jax.random.normal(k1, (C, C, 3, 3), jnp.float32) * w_std
    w2_oihw = jax.random.normal(k2, (C, C, 3, 3), jnp.float32) * w_std

    # Default-initialized eval-mode BatchNorm running stats.
    gamma = jnp.ones((C,), jnp.float32)
    beta = jnp.zeros((C,), jnp.float32)
    mean = jnp.zeros((C,), jnp.float32)
    var = jnp.ones((C,), jnp.float32)

    w1_mat, b1 = fold_conv_bn(w1_oihw, gamma, beta, mean, var)
    w2_mat, b2 = fold_conv_bn(w2_oihw, gamma, beta, mean, var)

    out = jax.jit(residual_block_forward)(x, w1_mat, b1, w2_mat, b2)
    jax.block_until_ready(out)

    assert out.shape == (B, C, H, W)
    assert bool(jnp.all(jnp.isfinite(out)))

    # Numerical check against an XLA conv reference (tolerance covers bf16
    # weight storage + bf16 MXU passes on both sides).
    ref = residual_block_ref(x, w1_oihw, w2_oihw, gamma, beta, mean, var)
    assert bool(jnp.allclose(out, ref, atol=5e-2, rtol=5e-2)), \
        f"max abs err = {float(jnp.max(jnp.abs(out - ref)))}"

    print("KERNEL_OK")
</pallas_src>

<mosaic_0001>
module attributes {stable_mosaic.version = 11 : i64} {
  func.func @_residual_block_kernel(%arg0: i32, %arg1: memref<4x8x8x128xf32, #tpu.memory_space<vmem>>, %arg2: memref<1152x128xbf16, #tpu.memory_space<vmem>>, %arg3: memref<1x128xf32, #tpu.memory_space<vmem>>, %arg4: memref<1152x128xbf16, #tpu.memory_space<vmem>>, %arg5: memref<1x128xf32, #tpu.memory_space<vmem>>, %arg6: memref<256x128xf32, #tpu.memory_space<vmem>>) attributes {dimension_semantics = [#tpu.dimension_semantics<parallel>], iteration_bounds = array<i64: 2>, scalar_prefetch = 0 : i64, scratch_operands = 0 : i64, tpu.core_type = #tpu.core_type<tc>, window_params = [{transform_indices = @transform_0, window_bounds = array<i64: 4, 8, 8, 128>}, {pipeline_mode = #tpu.pipeline_mode<synchronous>, transform_indices = @transform_1, window_bounds = array<i64: 1152, 128>}, {pipeline_mode = #tpu.pipeline_mode<synchronous>, transform_indices = @transform_2, window_bounds = array<i64: 1, 128>}, {pipeline_mode = #tpu.pipeline_mode<synchronous>, transform_indices = @transform_3, window_bounds = array<i64: 1152, 128>}, {pipeline_mode = #tpu.pipeline_mode<synchronous>, transform_indices = @transform_4, window_bounds = array<i64: 1, 128>}, {transform_indices = @transform_5, window_bounds = array<i64: 256, 128>}]} {
    %c0 = arith.constant 0 : index
    %c0_0 = arith.constant 0 : index
    %c0_1 = arith.constant 0 : index
    %c0_2 = arith.constant 0 : index
    %0 = vector.load %arg1[%c0, %c0_0, %c0_1, %c0_2] : memref<4x8x8x128xf32, #tpu.memory_space<vmem>>, vector<4x8x8x128xf32>
    %c1_i32 = arith.constant 1 : i32
    %1 = tpu.dynamic_rotate %0 by %c1_i32 dim 2 : vector<4x8x8x128xf32>, i32 -> vector<4x8x8x128xf32>
    %2 = tpu.iota {dimensions = array<i32: 2>} : vector<4x8x8x128xi32>
    %c-1_i32 = arith.constant -1 : i32
    %3 = vector.broadcast %c-1_i32 : i32 to vector<4x8x8x128xi32>
    %4 = arith.addi %2, %3 : vector<4x8x8x128xi32>
    %c0_i32 = arith.constant 0 : i32
    %5 = vector.broadcast %c0_i32 : i32 to vector<4x8x8x128xi32>
    %6 = arith.cmpi sge, %4, %5 : vector<4x8x8x128xi32>
    %c-1_i32_3 = arith.constant -1 : i32
    %7 = vector.broadcast %c-1_i32_3 : i32 to vector<4x8x8x128xi32>
    %8 = arith.addi %2, %7 : vector<4x8x8x128xi32>
    %c8_i32 = arith.constant 8 : i32
    %9 = vector.broadcast %c8_i32 : i32 to vector<4x8x8x128xi32>
    %10 = arith.cmpi slt, %8, %9 : vector<4x8x8x128xi32>
    %11 = arith.andi %6, %10 : vector<4x8x8x128xi1>
    %cst = arith.constant 0.000000e+00 : f32
    %12 = vector.broadcast %cst : f32 to vector<4x8x8x128xf32>
    %13 = arith.select %11, %1, %12 : vector<4x8x8x128xi1>, vector<4x8x8x128xf32>
    %cst_4 = arith.constant 0.000000e+00 : f32
    %14 = vector.broadcast %cst_4 : f32 to vector<4x1x8x128xf32>
    %15 = vector.extract_strided_slice %13 {offsets = [0, 0, 0, 0], sizes = [4, 7, 8, 128], strides = [1, 1, 1, 1]} : vector<4x8x8x128xf32> to vector<4x7x8x128xf32>
    %16 = tpu.concatenate %14, %15 in 1 : vector<4x1x8x128xf32>, vector<4x7x8x128xf32> -> vector<4x8x8x128xf32>
    %17 = vector.shape_cast %16 : vector<4x8x8x128xf32> to vector<256x128xf32>
    %18 = arith.truncf %17 : vector<256x128xf32> to vector<256x128xbf16>
    %c0_5 = arith.constant 0 : index
    %c0_6 = arith.constant 0 : index
    %19 = vector.load %arg2[%c0_5, %c0_6] : memref<1152x128xbf16, #tpu.memory_space<vmem>>, vector<128x128xbf16>
    %cst_7 = arith.constant dense<0.000000e+00> : vector<256x128xf32>
    %20 = tpu.matmul %18, %19, %cst_7 {dimension_numbers = #tpu.dot_dimension_numbers<[1], [0], [0], [1], [0, 0, 1, 1], [], []>} : vector<256x128xbf16>, vector<128x128xbf16>, vector<256x128xf32> -> vector<256x128xf32>
    %cst_8 = arith.constant 0.000000e+00 : f32
    %21 = vector.broadcast %cst_8 : f32 to vector<4x1x8x128xf32>
    %22 = vector.extract_strided_slice %0 {offsets = [0, 0, 0, 0], sizes = [4, 7, 8, 128], strides = [1, 1, 1, 1]} : vector<4x8x8x128xf32> to vector<4x7x8x128xf32>
    %23 = tpu.concatenate %21, %22 in 1 : vector<4x1x8x128xf32>, vector<4x7x8x128xf32> -> vector<4x8x8x128xf32>
    %24 = vector.shape_cast %23 : vector<4x8x8x128xf32> to vector<256x128xf32>
    %25 = arith.truncf %24 : vector<256x128xf32> to vector<256x128xbf16>
    %c128 = arith.constant 128 : index
    %c0_9 = arith.constant 0 : index
    %26 = vector.load %arg2[%c128, %c0_9] : memref<1152x128xbf16, #tpu.memory_space<vmem>>, vector<128x128xbf16>
    %cst_10 = arith.constant dense<0.000000e+00> : vector<256x128xf32>
    %27 = tpu.matmul %25, %26, %cst_10 {dimension_numbers = #tpu.dot_dimension_numbers<[1], [0], [0], [1], [0, 0, 1, 1], [], []>} : vector<256x128xbf16>, vector<128x128xbf16>, vector<256x128xf32> -> vector<256x128xf32>
    %28 = arith.addf %20, %27 : vector<256x128xf32>
    %c7_i32 = arith.constant 7 : i32
    %29 = tpu.dynamic_rotate %0 by %c7_i32 dim 2 : vector<4x8x8x128xf32>, i32 -> vector<4x8x8x128xf32>
    %30 = tpu.iota {dimensions = array<i32: 2>} : vector<4x8x8x128xi32>
    %c1_i32_11 = arith.constant 1 : i32
    %31 = vector.broadcast %c1_i32_11 : i32 to vector<4x8x8x128xi32>
    %32 = arith.addi %30, %31 : vector<4x8x8x128xi32>
    %c0_i32_12 = arith.constant 0 : i32
    %33 = vector.broadcast %c0_i32_12 : i32 to vector<4x8x8x128xi32>
    %34 = arith.cmpi sge, %32, %33 : vector<4x8x8x128xi32>
    %c1_i32_13 = arith.constant 1 : i32
    %35 = vector.broadcast %c1_i32_13 : i32 to vector<4x8x8x128xi32>
    %36 = arith.addi %30, %35 : vector<4x8x8x128xi32>
    %c8_i32_14 = arith.constant 8 : i32
    %37 = vector.broadcast %c8_i32_14 : i32 to vector<4x8x8x128xi32>
    %38 = arith.cmpi slt, %36, %37 : vector<4x8x8x128xi32>
    %39 = arith.andi %34, %38 : vector<4x8x8x128xi1>
    %cst_15 = arith.constant 0.000000e+00 : f32
    %40 = vector.broadcast %cst_15 : f32 to vector<4x8x8x128xf32>
    %41 = arith.select %39, %29, %40 : vector<4x8x8x128xi1>, vector<4x8x8x128xf32>
    %cst_16 = arith.constant 0.000000e+00 : f32
    %42 = vector.broadcast %cst_16 : f32 to vector<4x1x8x128xf32>
    %43 = vector.extract_strided_slice %41 {offsets = [0, 0, 0, 0], sizes = [4, 7, 8, 128], strides = [1, 1, 1, 1]} : vector<4x8x8x128xf32> to vector<4x7x8x128xf32>
    %44 = tpu.concatenate %42, %43 in 1 : vector<4x1x8x128xf32>, vector<4x7x8x128xf32> -> vector<4x8x8x128xf32>
    %45 = vector.shape_cast %44 : vector<4x8x8x128xf32> to vector<256x128xf32>
    %46 = arith.truncf %45 : vector<256x128xf32> to vector<256x128xbf16>
    %c256 = arith.constant 256 : index
    %c0_17 = arith.constant 0 : index
    %47 = vector.load %arg2[%c256, %c0_17] : memref<1152x128xbf16, #tpu.memory_space<vmem>>, vector<128x128xbf16>
    %cst_18 = arith.constant dense<0.000000e+00> : vector<256x128xf32>
    %48 = tpu.matmul %46, %47, %cst_18 {dimension_numbers = #tpu.dot_dimension_numbers<[1], [0], [0], [1], [0, 0, 1, 1], [], []>} : vector<256x128xbf16>, vector<128x128xbf16>, vector<256x128xf32> -> vector<256x128xf32>
    %49 = arith.addf %28, %48 : vector<256x128xf32>
    %c1_i32_19 = arith.constant 1 : i32
    %50 = tpu.dynamic_rotate %0 by %c1_i32_19 dim 2 : vector<4x8x8x128xf32>, i32 -> vector<4x8x8x128xf32>
    %51 = tpu.iota {dimensions = array<i32: 2>} : vector<4x8x8x128xi32>
    %c-1_i32_20 = arith.constant -1 : i32
    %52 = vector.broadcast %c-1_i32_20 : i32 to vector<4x8x8x128xi32>
    %53 = arith.addi %51, %52 : vector<4x8x8x128xi32>
    %c0_i32_21 = arith.constant 0 : i32
    %54 = vector.broadcast %c0_i32_21 : i32 to vector<4x8x8x128xi32>
    %55 = arith.cmpi sge, %53, %54 : vector<4x8x8x128xi32>
    %c-1_i32_22 = arith.constant -1 : i32
    %56 = vector.broadcast %c-1_i32_22 : i32 to vector<4x8x8x128xi32>
    %57 = arith.addi %51, %56 : vector<4x8x8x128xi32>
    %c8_i32_23 = arith.constant 8 : i32
    %58 = vector.broadcast %c8_i32_23 : i32 to vector<4x8x8x128xi32>
    %59 = arith.cmpi slt, %57, %58 : vector<4x8x8x128xi32>
    %60 = arith.andi %55, %59 : vector<4x8x8x128xi1>
    %cst_24 = arith.constant 0.000000e+00 : f32
    %61 = vector.broadcast %cst_24 : f32 to vector<4x8x8x128xf32>
    %62 = arith.select %60, %50, %61 : vector<4x8x8x128xi1>, vector<4x8x8x128xf32>
    %63 = vector.shape_cast %62 : vector<4x8x8x128xf32> to vector<256x128xf32>
    %64 = arith.truncf %63 : vector<256x128xf32> to vector<256x128xbf16>
    %c384 = arith.constant 384 : index
    %c0_25 = arith.constant 0 : index
    %65 = vector.load %arg2[%c384, %c0_25] : memref<1152x128xbf16, #tpu.memory_space<vmem>>, vector<128x128xbf16>
    %cst_26 = arith.constant dense<0.000000e+00> : vector<256x128xf32>
    %66 = tpu.matmul %64, %65, %cst_26 {dimension_numbers = #tpu.dot_dimension_numbers<[1], [0], [0], [1], [0, 0, 1, 1], [], []>} : vector<256x128xbf16>, vector<128x128xbf16>, vector<256x128xf32> -> vector<256x128xf32>
    %67 = arith.addf %49, %66 : vector<256x128xf32>
    %68 = vector.shape_cast %0 : vector<4x8x8x128xf32> to vector<256x128xf32>
    %69 = arith.truncf %68 : vector<256x128xf32> to vector<256x128xbf16>
    %c512 = arith.constant 512 : index
    %c0_27 = arith.constant 0 : index
    %70 = vector.load %arg2[%c512, %c0_27] : memref<1152x128xbf16, #tpu.memory_space<vmem>>, vector<128x128xbf16>
    %cst_28 = arith.constant dense<0.000000e+00> : vector<256x128xf32>
    %71 = tpu.matmul %69, %70, %cst_28 {dimension_numbers = #tpu.dot_dimension_numbers<[1], [0], [0], [1], [0, 0, 1, 1], [], []>} : vector<256x128xbf16>, vector<128x128xbf16>, vector<256x128xf32> -> vector<256x128xf32>
    %72 = arith.addf %67, %71 : vector<256x128xf32>
    %c7_i32_29 = arith.constant 7 : i32
    %73 = tpu.dynamic_rotate %0 by %c7_i32_29 dim 2 : vector<4x8x8x128xf32>, i32 -> vector<4x8x8x128xf32>
    %74 = tpu.iota {dimensions = array<i32: 2>} : vector<4x8x8x128xi32>
    %c1_i32_30 = arith.constant 1 : i32
    %75 = vector.broadcast %c1_i32_30 : i32 to vector<4x8x8x128xi32>
    %76 = arith.addi %74, %75 : vector<4x8x8x128xi32>
    %c0_i32_31 = arith.constant 0 : i32
    %77 = vector.broadcast %c0_i32_31 : i32 to vector<4x8x8x128xi32>
    %78 = arith.cmpi sge, %76, %77 : vector<4x8x8x128xi32>
    %c1_i32_32 = arith.constant 1 : i32
    %79 = vector.broadcast %c1_i32_32 : i32 to vector<4x8x8x128xi32>
    %80 = arith.addi %74, %79 : vector<4x8x8x128xi32>
    %c8_i32_33 = arith.constant 8 : i32
    %81 = vector.broadcast %c8_i32_33 : i32 to vector<4x8x8x128xi32>
    %82 = arith.cmpi slt, %80, %81 : vector<4x8x8x128xi32>
    %83 = arith.andi %78, %82 : vector<4x8x8x128xi1>
    %cst_34 = arith.constant 0.000000e+00 : f32
    %84 = vector.broadcast %cst_34 : f32 to vector<4x8x8x128xf32>
    %85 = arith.select %83, %73, %84 : vector<4x8x8x128xi1>, vector<4x8x8x128xf32>
    %86 = vector.shape_cast %85 : vector<4x8x8x128xf32> to vector<256x128xf32>
    %87 = arith.truncf %86 : vector<256x128xf32> to vector<256x128xbf16>
    %c640 = arith.constant 640 : index
    %c0_35 = arith.constant 0 : index
    %88 = vector.load %arg2[%c640, %c0_35] : memref<1152x128xbf16, #tpu.memory_space<vmem>>, vector<128x128xbf16>
    %cst_36 = arith.constant dense<0.000000e+00> : vector<256x128xf32>
    %89 = tpu.matmul %87, %88, %cst_36 {dimension_numbers = #tpu.dot_dimension_numbers<[1], [0], [0], [1], [0, 0, 1, 1], [], []>} : vector<256x128xbf16>, vector<128x128xbf16>, vector<256x128xf32> -> vector<256x128xf32>
    %90 = arith.addf %72, %89 : vector<256x128xf32>
    %c1_i32_37 = arith.constant 1 : i32
    %91 = tpu.dynamic_rotate %0 by %c1_i32_37 dim 2 : vector<4x8x8x128xf32>, i32 -> vector<4x8x8x128xf32>
    %92 = tpu.iota {dimensions = array<i32: 2>} : vector<4x8x8x128xi32>
    %c-1_i32_38 = arith.constant -1 : i32
    %93 = vector.broadcast %c-1_i32_38 : i32 to vector<4x8x8x128xi32>
    %94 = arith.addi %92, %93 : vector<4x8x8x128xi32>
    %c0_i32_39 = arith.constant 0 : i32
    %95 = vector.broadcast %c0_i32_39 : i32 to vector<4x8x8x128xi32>
    %96 = arith.cmpi sge, %94, %95 : vector<4x8x8x128xi32>
    %c-1_i32_40 = arith.constant -1 : i32
    %97 = vector.broadcast %c-1_i32_40 : i32 to vector<4x8x8x128xi32>
    %98 = arith.addi %92, %97 : vector<4x8x8x128xi32>
    %c8_i32_41 = arith.constant 8 : i32
    %99 = vector.broadcast %c8_i32_41 : i32 to vector<4x8x8x128xi32>
    %100 = arith.cmpi slt, %98, %99 : vector<4x8x8x128xi32>
    %101 = arith.andi %96, %100 : vector<4x8x8x128xi1>
    %cst_42 = arith.constant 0.000000e+00 : f32
    %102 = vector.broadcast %cst_42 : f32 to vector<4x8x8x128xf32>
    %103 = arith.select %101, %91, %102 : vector<4x8x8x128xi1>, vector<4x8x8x128xf32>
    %cst_43 = arith.constant 0.000000e+00 : f32
    %104 = vector.broadcast %cst_43 : f32 to vector<4x1x8x128xf32>
    %105 = vector.extract_strided_slice %103 {offsets = [0, 1, 0, 0], sizes = [4, 7, 8, 128], strides = [1, 1, 1, 1]} : vector<4x8x8x128xf32> to vector<4x7x8x128xf32>
    %106 = tpu.concatenate %105, %104 in 1 : vector<4x7x8x128xf32>, vector<4x1x8x128xf32> -> vector<4x8x8x128xf32>
    %107 = vector.shape_cast %106 : vector<4x8x8x128xf32> to vector<256x128xf32>
    %108 = arith.truncf %107 : vector<256x128xf32> to vector<256x128xbf16>
    %c768 = arith.constant 768 : index
    %c0_44 = arith.constant 0 : index
    %109 = vector.load %arg2[%c768, %c0_44] : memref<1152x128xbf16, #tpu.memory_space<vmem>>, vector<128x128xbf16>
    %cst_45 = arith.constant dense<0.000000e+00> : vector<256x128xf32>
    %110 = tpu.matmul %108, %109, %cst_45 {dimension_numbers = #tpu.dot_dimension_numbers<[1], [0], [0], [1], [0, 0, 1, 1], [], []>} : vector<256x128xbf16>, vector<128x128xbf16>, vector<256x128xf32> -> vector<256x128xf32>
    %111 = arith.addf %90, %110 : vector<256x128xf32>
    %cst_46 = arith.constant 0.000000e+00 : f32
    %112 = vector.broadcast %cst_46 : f32 to vector<4x1x8x128xf32>
    %113 = vector.extract_strided_slice %0 {offsets = [0, 1, 0, 0], sizes = [4, 7, 8, 128], strides = [1, 1, 1, 1]} : vector<4x8x8x128xf32> to vector<4x7x8x128xf32>
    %114 = tpu.concatenate %113, %112 in 1 : vector<4x7x8x128xf32>, vector<4x1x8x128xf32> -> vector<4x8x8x128xf32>
    %115 = vector.shape_cast %114 : vector<4x8x8x128xf32> to vector<256x128xf32>
    %116 = arith.truncf %115 : vector<256x128xf32> to vector<256x128xbf16>
    %c896 = arith.constant 896 : index
    %c0_47 = arith.constant 0 : index
    %117 = vector.load %arg2[%c896, %c0_47] : memref<1152x128xbf16, #tpu.memory_space<vmem>>, vector<128x128xbf16>
    %cst_48 = arith.constant dense<0.000000e+00> : vector<256x128xf32>
    %118 = tpu.matmul %116, %117, %cst_48 {dimension_numbers = #tpu.dot_dimension_numbers<[1], [0], [0], [1], [0, 0, 1, 1], [], []>} : vector<256x128xbf16>, vector<128x128xbf16>, vector<256x128xf32> -> vector<256x128xf32>
    %119 = arith.addf %111, %118 : vector<256x128xf32>
    %c7_i32_49 = arith.constant 7 : i32
    %120 = tpu.dynamic_rotate %0 by %c7_i32_49 dim 2 : vector<4x8x8x128xf32>, i32 -> vector<4x8x8x128xf32>
    %121 = tpu.iota {dimensions = array<i32: 2>} : vector<4x8x8x128xi32>
    %c1_i32_50 = arith.constant 1 : i32
    %122 = vector.broadcast %c1_i32_50 : i32 to vector<4x8x8x128xi32>
    %123 = arith.addi %121, %122 : vector<4x8x8x128xi32>
    %c0_i32_51 = arith.constant 0 : i32
    %124 = vector.broadcast %c0_i32_51 : i32 to vector<4x8x8x128xi32>
    %125 = arith.cmpi sge, %123, %124 : vector<4x8x8x128xi32>
    %c1_i32_52 = arith.constant 1 : i32
    %126 = vector.broadcast %c1_i32_52 : i32 to vector<4x8x8x128xi32>
    %127 = arith.addi %121, %126 : vector<4x8x8x128xi32>
    %c8_i32_53 = arith.constant 8 : i32
    %128 = vector.broadcast %c8_i32_53 : i32 to vector<4x8x8x128xi32>
    %129 = arith.cmpi slt, %127, %128 : vector<4x8x8x128xi32>
    %130 = arith.andi %125, %129 : vector<4x8x8x128xi1>
    %cst_54 = arith.constant 0.000000e+00 : f32
    %131 = vector.broadcast %cst_54 : f32 to vector<4x8x8x128xf32>
    %132 = arith.select %130, %120, %131 : vector<4x8x8x128xi1>, vector<4x8x8x128xf32>
    %cst_55 = arith.constant 0.000000e+00 : f32
    %133 = vector.broadcast %cst_55 : f32 to vector<4x1x8x128xf32>
    %134 = vector.extract_strided_slice %132 {offsets = [0, 1, 0, 0], sizes = [4, 7, 8, 128], strides = [1, 1, 1, 1]} : vector<4x8x8x128xf32> to vector<4x7x8x128xf32>
    %135 = tpu.concatenate %134, %133 in 1 : vector<4x7x8x128xf32>, vector<4x1x8x128xf32> -> vector<4x8x8x128xf32>
    %136 = vector.shape_cast %135 : vector<4x8x8x128xf32> to vector<256x128xf32>
    %137 = arith.truncf %136 : vector<256x128xf32> to vector<256x128xbf16>
    %c1024 = arith.constant 1024 : index
    %c0_56 = arith.constant 0 : index
    %138 = vector.load %arg2[%c1024, %c0_56] : memref<1152x128xbf16, #tpu.memory_space<vmem>>, vector<128x128xbf16>
    %cst_57 = arith.constant dense<0.000000e+00> : vector<256x128xf32>
    %139 = tpu.matmul %137, %138, %cst_57 {dimension_numbers = #tpu.dot_dimension_numbers<[1], [0], [0], [1], [0, 0, 1, 1], [], []>} : vector<256x128xbf16>, vector<128x128xbf16>, vector<256x128xf32> -> vector<256x128xf32>
    %140 = arith.addf %119, %139 : vector<256x128xf32>
    %c0_58 = arith.constant 0 : index
    %c0_59 = arith.constant 0 : index
    %141 = vector.load %arg3[%c0_58, %c0_59] : memref<1x128xf32, #tpu.memory_space<vmem>>, vector<1x128xf32>
    %142 = vector.broadcast %141 : vector<1x128xf32> to vector<256x128xf32>
    %143 = arith.addf %140, %142 : vector<256x128xf32>
    %cst_60 = arith.constant 0.000000e+00 : f32
    %144 = vector.broadcast %cst_60 : f32 to vector<256x128xf32>
    %145 = arith.maximumf %143, %144 : vector<256x128xf32>
    %146 = vector.shape_cast %145 : vector<256x128xf32> to vector<4x8x8x128xf32>
    %c1_i32_61 = arith.constant 1 : i32
    %147 = tpu.dynamic_rotate %146 by %c1_i32_61 dim 2 : vector<4x8x8x128xf32>, i32 -> vector<4x8x8x128xf32>
    %148 = tpu.iota {dimensions = array<i32: 2>} : vector<4x8x8x128xi32>
    %c-1_i32_62 = arith.constant -1 : i32
    %149 = vector.broadcast %c-1_i32_62 : i32 to vector<4x8x8x128xi32>
    %150 = arith.addi %148, %149 : vector<4x8x8x128xi32>
    %c0_i32_63 = arith.constant 0 : i32
    %151 = vector.broadcast %c0_i32_63 : i32 to vector<4x8x8x128xi32>
    %152 = arith.cmpi sge, %150, %151 : vector<4x8x8x128xi32>
    %c-1_i32_64 = arith.constant -1 : i32
    %153 = vector.broadcast %c-1_i32_64 : i32 to vector<4x8x8x128xi32>
    %154 = arith.addi %148, %153 : vector<4x8x8x128xi32>
    %c8_i32_65 = arith.constant 8 : i32
    %155 = vector.broadcast %c8_i32_65 : i32 to vector<4x8x8x128xi32>
    %156 = arith.cmpi slt, %154, %155 : vector<4x8x8x128xi32>
    %157 = arith.andi %152, %156 : vector<4x8x8x128xi1>
    %cst_66 = arith.constant 0.000000e+00 : f32
    %158 = vector.broadcast %cst_66 : f32 to vector<4x8x8x128xf32>
    %159 = arith.select %157, %147, %158 : vector<4x8x8x128xi1>, vector<4x8x8x128xf32>
    %cst_67 = arith.constant 0.000000e+00 : f32
    %160 = vector.broadcast %cst_67 : f32 to vector<4x1x8x128xf32>
    %161 = vector.extract_strided_slice %159 {offsets = [0, 0, 0, 0], sizes = [4, 7, 8, 128], strides = [1, 1, 1, 1]} : vector<4x8x8x128xf32> to vector<4x7x8x128xf32>
    %162 = tpu.concatenate %160, %161 in 1 : vector<4x1x8x128xf32>, vector<4x7x8x128xf32> -> vector<4x8x8x128xf32>
    %163 = vector.shape_cast %162 : vector<4x8x8x128xf32> to vector<256x128xf32>
    %164 = arith.truncf %163 : vector<256x128xf32> to vector<256x128xbf16>
    %c0_68 = arith.constant 0 : index
    %c0_69 = arith.constant 0 : index
    %165 = vector.load %arg4[%c0_68, %c0_69] : memref<1152x128xbf16, #tpu.memory_space<vmem>>, vector<128x128xbf16>
    %cst_70 = arith.constant dense<0.000000e+00> : vector<256x128xf32>
    %166 = tpu.matmul %164, %165, %cst_70 {dimension_numbers = #tpu.dot_dimension_numbers<[1], [0], [0], [1], [0, 0, 1, 1], [], []>} : vector<256x128xbf16>, vector<128x128xbf16>, vector<256x128xf32> -> vector<256x128xf32>
    %cst_71 = arith.constant 0.000000e+00 : f32
    %167 = vector.broadcast %cst_71 : f32 to vector<4x1x8x128xf32>
    %168 = vector.extract_strided_slice %146 {offsets = [0, 0, 0, 0], sizes = [4, 7, 8, 128], strides = [1, 1, 1, 1]} : vector<4x8x8x128xf32> to vector<4x7x8x128xf32>
    %169 = tpu.concatenate %167, %168 in 1 : vector<4x1x8x128xf32>, vector<4x7x8x128xf32> -> vector<4x8x8x128xf32>
    %170 = vector.shape_cast %169 : vector<4x8x8x128xf32> to vector<256x128xf32>
    %171 = arith.truncf %170 : vector<256x128xf32> to vector<256x128xbf16>
    %c128_72 = arith.constant 128 : index
    %c0_73 = arith.constant 0 : index
    %172 = vector.load %arg4[%c128_72, %c0_73] : memref<1152x128xbf16, #tpu.memory_space<vmem>>, vector<128x128xbf16>
    %cst_74 = arith.constant dense<0.000000e+00> : vector<256x128xf32>
    %173 = tpu.matmul %171, %172, %cst_74 {dimension_numbers = #tpu.dot_dimension_numbers<[1], [0], [0], [1], [0, 0, 1, 1], [], []>} : vector<256x128xbf16>, vector<128x128xbf16>, vector<256x128xf32> -> vector<256x128xf32>
    %174 = arith.addf %166, %173 : vector<256x128xf32>
    %c7_i32_75 = arith.constant 7 : i32
    %175 = tpu.dynamic_rotate %146 by %c7_i32_75 dim 2 : vector<4x8x8x128xf32>, i32 -> vector<4x8x8x128xf32>
    %176 = tpu.iota {dimensions = array<i32: 2>} : vector<4x8x8x128xi32>
    %c1_i32_76 = arith.constant 1 : i32
    %177 = vector.broadcast %c1_i32_76 : i32 to vector<4x8x8x128xi32>
    %178 = arith.addi %176, %177 : vector<4x8x8x128xi32>
    %c0_i32_77 = arith.constant 0 : i32
    %179 = vector.broadcast %c0_i32_77 : i32 to vector<4x8x8x128xi32>
    %180 = arith.cmpi sge, %178, %179 : vector<4x8x8x128xi32>
    %c1_i32_78 = arith.constant 1 : i32
    %181 = vector.broadcast %c1_i32_78 : i32 to vector<4x8x8x128xi32>
    %182 = arith.addi %176, %181 : vector<4x8x8x128xi32>
    %c8_i32_79 = arith.constant 8 : i32
    %183 = vector.broadcast %c8_i32_79 : i32 to vector<4x8x8x128xi32>
    %184 = arith.cmpi slt, %182, %183 : vector<4x8x8x128xi32>
    %185 = arith.andi %180, %184 : vector<4x8x8x128xi1>
    %cst_80 = arith.constant 0.000000e+00 : f32
    %186 = vector.broadcast %cst_80 : f32 to vector<4x8x8x128xf32>
    %187 = arith.select %185, %175, %186 : vector<4x8x8x128xi1>, vector<4x8x8x128xf32>
    %cst_81 = arith.constant 0.000000e+00 : f32
    %188 = vector.broadcast %cst_81 : f32 to vector<4x1x8x128xf32>
    %189 = vector.extract_strided_slice %187 {offsets = [0, 0, 0, 0], sizes = [4, 7, 8, 128], strides = [1, 1, 1, 1]} : vector<4x8x8x128xf32> to vector<4x7x8x128xf32>
    %190 = tpu.concatenate %188, %189 in 1 : vector<4x1x8x128xf32>, vector<4x7x8x128xf32> -> vector<4x8x8x128xf32>
    %191 = vector.shape_cast %190 : vector<4x8x8x128xf32> to vector<256x128xf32>
    %192 = arith.truncf %191 : vector<256x128xf32> to vector<256x128xbf16>
    %c256_82 = arith.constant 256 : index
    %c0_83 = arith.constant 0 : index
    %193 = vector.load %arg4[%c256_82, %c0_83] : memref<1152x128xbf16, #tpu.memory_space<vmem>>, vector<128x128xbf16>
    %cst_84 = arith.constant dense<0.000000e+00> : vector<256x128xf32>
    %194 = tpu.matmul %192, %193, %cst_84 {dimension_numbers = #tpu.dot_dimension_numbers<[1], [0], [0], [1], [0, 0, 1, 1], [], []>} : vector<256x128xbf16>, vector<128x128xbf16>, vector<256x128xf32> -> vector<256x128xf32>
    %195 = arith.addf %174, %194 : vector<256x128xf32>
    %c1_i32_85 = arith.constant 1 : i32
    %196 = tpu.dynamic_rotate %146 by %c1_i32_85 dim 2 : vector<4x8x8x128xf32>, i32 -> vector<4x8x8x128xf32>
    %197 = tpu.iota {dimensions = array<i32: 2>} : vector<4x8x8x128xi32>
    %c-1_i32_86 = arith.constant -1 : i32
    %198 = vector.broadcast %c-1_i32_86 : i32 to vector<4x8x8x128xi32>
    %199 = arith.addi %197, %198 : vector<4x8x8x128xi32>
    %c0_i32_87 = arith.constant 0 : i32
    %200 = vector.broadcast %c0_i32_87 : i32 to vector<4x8x8x128xi32>
    %201 = arith.cmpi sge, %199, %200 : vector<4x8x8x128xi32>
    %c-1_i32_88 = arith.constant -1 : i32
    %202 = vector.broadcast %c-1_i32_88 : i32 to vector<4x8x8x128xi32>
    %203 = arith.addi %197, %202 : vector<4x8x8x128xi32>
    %c8_i32_89 = arith.constant 8 : i32
    %204 = vector.broadcast %c8_i32_89 : i32 to vector<4x8x8x128xi32>
    %205 = arith.cmpi slt, %203, %204 : vector<4x8x8x128xi32>
    %206 = arith.andi %201, %205 : vector<4x8x8x128xi1>
    %cst_90 = arith.constant 0.000000e+00 : f32
    %207 = vector.broadcast %cst_90 : f32 to vector<4x8x8x128xf32>
    %208 = arith.select %206, %196, %207 : vector<4x8x8x128xi1>, vector<4x8x8x128xf32>
    %209 = vector.shape_cast %208 : vector<4x8x8x128xf32> to vector<256x128xf32>
    %210 = arith.truncf %209 : vector<256x128xf32> to vector<256x128xbf16>
    %c384_91 = arith.constant 384 : index
    %c0_92 = arith.constant 0 : index
    %211 = vector.load %arg4[%c384_91, %c0_92] : memref<1152x128xbf16, #tpu.memory_space<vmem>>, vector<128x128xbf16>
    %cst_93 = arith.constant dense<0.000000e+00> : vector<256x128xf32>
    %212 = tpu.matmul %210, %211, %cst_93 {dimension_numbers = #tpu.dot_dimension_numbers<[1], [0], [0], [1], [0, 0, 1, 1], [], []>} : vector<256x128xbf16>, vector<128x128xbf16>, vector<256x128xf32> -> vector<256x128xf32>
    %213 = arith.addf %195, %212 : vector<256x128xf32>
    %214 = vector.shape_cast %146 : vector<4x8x8x128xf32> to vector<256x128xf32>
    %215 = arith.truncf %214 : vector<256x128xf32> to vector<256x128xbf16>
    %c512_94 = arith.constant 512 : index
    %c0_95 = arith.constant 0 : index
    %216 = vector.load %arg4[%c512_94, %c0_95] : memref<1152x128xbf16, #tpu.memory_space<vmem>>, vector<128x128xbf16>
    %cst_96 = arith.constant dense<0.000000e+00> : vector<256x128xf32>
    %217 = tpu.matmul %215, %216, %cst_96 {dimension_numbers = #tpu.dot_dimension_numbers<[1], [0], [0], [1], [0, 0, 1, 1], [], []>} : vector<256x128xbf16>, vector<128x128xbf16>, vector<256x128xf32> -> vector<256x128xf32>
    %218 = arith.addf %213, %217 : vector<256x128xf32>
    %c7_i32_97 = arith.constant 7 : i32
    %219 = tpu.dynamic_rotate %146 by %c7_i32_97 dim 2 : vector<4x8x8x128xf32>, i32 -> vector<4x8x8x128xf32>
    %220 = tpu.iota {dimensions = array<i32: 2>} : vector<4x8x8x128xi32>
    %c1_i32_98 = arith.constant 1 : i32
    %221 = vector.broadcast %c1_i32_98 : i32 to vector<4x8x8x128xi32>
    %222 = arith.addi %220, %221 : vector<4x8x8x128xi32>
    %c0_i32_99 = arith.constant 0 : i32
    %223 = vector.broadcast %c0_i32_99 : i32 to vector<4x8x8x128xi32>
    %224 = arith.cmpi sge, %222, %223 : vector<4x8x8x128xi32>
    %c1_i32_100 = arith.constant 1 : i32
    %225 = vector.broadcast %c1_i32_100 : i32 to vector<4x8x8x128xi32>
    %226 = arith.addi %220, %225 : vector<4x8x8x128xi32>
    %c8_i32_101 = arith.constant 8 : i32
    %227 = vector.broadcast %c8_i32_101 : i32 to vector<4x8x8x128xi32>
    %228 = arith.cmpi slt, %226, %227 : vector<4x8x8x128xi32>
    %229 = arith.andi %224, %228 : vector<4x8x8x128xi1>
    %cst_102 = arith.constant 0.000000e+00 : f32
    %230 = vector.broadcast %cst_102 : f32 to vector<4x8x8x128xf32>
    %231 = arith.select %229, %219, %230 : vector<4x8x8x128xi1>, vector<4x8x8x128xf32>
    %232 = vector.shape_cast %231 : vector<4x8x8x128xf32> to vector<256x128xf32>
    %233 = arith.truncf %232 : vector<256x128xf32> to vector<256x128xbf16>
    %c640_103 = arith.constant 640 : index
    %c0_104 = arith.constant 0 : index
    %234 = vector.load %arg4[%c640_103, %c0_104] : memref<1152x128xbf16, #tpu.memory_space<vmem>>, vector<128x128xbf16>
    %cst_105 = arith.constant dense<0.000000e+00> : vector<256x128xf32>
    %235 = tpu.matmul %233, %234, %cst_105 {dimension_numbers = #tpu.dot_dimension_numbers<[1], [0], [0], [1], [0, 0, 1, 1], [], []>} : vector<256x128xbf16>, vector<128x128xbf16>, vector<256x128xf32> -> vector<256x128xf32>
    %236 = arith.addf %218, %235 : vector<256x128xf32>
    %c1_i32_106 = arith.constant 1 : i32
    %237 = tpu.dynamic_rotate %146 by %c1_i32_106 dim 2 : vector<4x8x8x128xf32>, i32 -> vector<4x8x8x128xf32>
    %238 = tpu.iota {dimensions = array<i32: 2>} : vector<4x8x8x128xi32>
    %c-1_i32_107 = arith.constant -1 : i32
    %239 = vector.broadcast %c-1_i32_107 : i32 to vector<4x8x8x128xi32>
    %240 = arith.addi %238, %239 : vector<4x8x8x128xi32>
    %c0_i32_108 = arith.constant 0 : i32
    %241 = vector.broadcast %c0_i32_108 : i32 to vector<4x8x8x128xi32>
    %242 = arith.cmpi sge, %240, %241 : vector<4x8x8x128xi32>
    %c-1_i32_109 = arith.constant -1 : i32
    %243 = vector.broadcast %c-1_i32_109 : i32 to vector<4x8x8x128xi32>
    %244 = arith.addi %238, %243 : vector<4x8x8x128xi32>
    %c8_i32_110 = arith.constant 8 : i32
    %245 = vector.broadcast %c8_i32_110 : i32 to vector<4x8x8x128xi32>
    %246 = arith.cmpi slt, %244, %245 : vector<4x8x8x128xi32>
    %247 = arith.andi %242, %246 : vector<4x8x8x128xi1>
    %cst_111 = arith.constant 0.000000e+00 : f32
    %248 = vector.broadcast %cst_111 : f32 to vector<4x8x8x128xf32>
    %249 = arith.select %247, %237, %248 : vector<4x8x8x128xi1>, vector<4x8x8x128xf32>
    %cst_112 = arith.constant 0.000000e+00 : f32
    %250 = vector.broadcast %cst_112 : f32 to vector<4x1x8x128xf32>
    %251 = vector.extract_strided_slice %249 {offsets = [0, 1, 0, 0], sizes = [4, 7, 8, 128], strides = [1, 1, 1, 1]} : vector<4x8x8x128xf32> to vector<4x7x8x128xf32>
    %252 = tpu.concatenate %251, %250 in 1 : vector<4x7x8x128xf32>, vector<4x1x8x128xf32> -> vector<4x8x8x128xf32>
    %253 = vector.shape_cast %252 : vector<4x8x8x128xf32> to vector<256x128xf32>
    %254 = arith.truncf %253 : vector<256x128xf32> to vector<256x128xbf16>
    %c768_113 = arith.constant 768 : index
    %c0_114 = arith.constant 0 : index
    %255 = vector.load %arg4[%c768_113, %c0_114] : memref<1152x128xbf16, #tpu.memory_space<vmem>>, vector<128x128xbf16>
    %cst_115 = arith.constant dense<0.000000e+00> : vector<256x128xf32>
    %256 = tpu.matmul %254, %255, %cst_115 {dimension_numbers = #tpu.dot_dimension_numbers<[1], [0], [0], [1], [0, 0, 1, 1], [], []>} : vector<256x128xbf16>, vector<128x128xbf16>, vector<256x128xf32> -> vector<256x128xf32>
    %257 = arith.addf %236, %256 : vector<256x128xf32>
    %cst_116 = arith.constant 0.000000e+00 : f32
    %258 = vector.broadcast %cst_116 : f32 to vector<4x1x8x128xf32>
    %259 = vector.extract_strided_slice %146 {offsets = [0, 1, 0, 0], sizes = [4, 7, 8, 128], strides = [1, 1, 1, 1]} : vector<4x8x8x128xf32> to vector<4x7x8x128xf32>
    %260 = tpu.concatenate %259, %258 in 1 : vector<4x7x8x128xf32>, vector<4x1x8x128xf32> -> vector<4x8x8x128xf32>
    %261 = vector.shape_cast %260 : vector<4x8x8x128xf32> to vector<256x128xf32>
    %262 = arith.truncf %261 : vector<256x128xf32> to vector<256x128xbf16>
    %c896_117 = arith.constant 896 : index
    %c0_118 = arith.constant 0 : index
    %263 = vector.load %arg4[%c896_117, %c0_118] : memref<1152x128xbf16, #tpu.memory_space<vmem>>, vector<128x128xbf16>
    %cst_119 = arith.constant dense<0.000000e+00> : vector<256x128xf32>
    %264 = tpu.matmul %262, %263, %cst_119 {dimension_numbers = #tpu.dot_dimension_numbers<[1], [0], [0], [1], [0, 0, 1, 1], [], []>} : vector<256x128xbf16>, vector<128x128xbf16>, vector<256x128xf32> -> vector<256x128xf32>
    %265 = arith.addf %257, %264 : vector<256x128xf32>
    %c7_i32_120 = arith.constant 7 : i32
    %266 = tpu.dynamic_rotate %146 by %c7_i32_120 dim 2 : vector<4x8x8x128xf32>, i32 -> vector<4x8x8x128xf32>
    %267 = tpu.iota {dimensions = array<i32: 2>} : vector<4x8x8x128xi32>
    %c1_i32_121 = arith.constant 1 : i32
    %268 = vector.broadcast %c1_i32_121 : i32 to vector<4x8x8x128xi32>
    %269 = arith.addi %267, %268 : vector<4x8x8x128xi32>
    %c0_i32_122 = arith.constant 0 : i32
    %270 = vector.broadcast %c0_i32_122 : i32 to vector<4x8x8x128xi32>
    %271 = arith.cmpi sge, %269, %270 : vector<4x8x8x128xi32>
    %c1_i32_123 = arith.constant 1 : i32
    %272 = vector.broadcast %c1_i32_123 : i32 to vector<4x8x8x128xi32>
    %273 = arith.addi %267, %272 : vector<4x8x8x128xi32>
    %c8_i32_124 = arith.constant 8 : i32
    %274 = vector.broadcast %c8_i32_124 : i32 to vector<4x8x8x128xi32>
    %275 = arith.cmpi slt, %273, %274 : vector<4x8x8x128xi32>
    %276 = arith.andi %271, %275 : vector<4x8x8x128xi1>
    %cst_125 = arith.constant 0.000000e+00 : f32
    %277 = vector.broadcast %cst_125 : f32 to vector<4x8x8x128xf32>
    %278 = arith.select %276, %266, %277 : vector<4x8x8x128xi1>, vector<4x8x8x128xf32>
    %cst_126 = arith.constant 0.000000e+00 : f32
    %279 = vector.broadcast %cst_126 : f32 to vector<4x1x8x128xf32>
    %280 = vector.extract_strided_slice %278 {offsets = [0, 1, 0, 0], sizes = [4, 7, 8, 128], strides = [1, 1, 1, 1]} : vector<4x8x8x128xf32> to vector<4x7x8x128xf32>
    %281 = tpu.concatenate %280, %279 in 1 : vector<4x7x8x128xf32>, vector<4x1x8x128xf32> -> vector<4x8x8x128xf32>
    %282 = vector.shape_cast %281 : vector<4x8x8x128xf32> to vector<256x128xf32>
    %283 = arith.truncf %282 : vector<256x128xf32> to vector<256x128xbf16>
    %c1024_127 = arith.constant 1024 : index
    %c0_128 = arith.constant 0 : index
    %284 = vector.load %arg4[%c1024_127, %c0_128] : memref<1152x128xbf16, #tpu.memory_space<vmem>>, vector<128x128xbf16>
    %cst_129 = arith.constant dense<0.000000e+00> : vector<256x128xf32>
    %285 = tpu.matmul %283, %284, %cst_129 {dimension_numbers = #tpu.dot_dimension_numbers<[1], [0], [0], [1], [0, 0, 1, 1], [], []>} : vector<256x128xbf16>, vector<128x128xbf16>, vector<256x128xf32> -> vector<256x128xf32>
    %286 = arith.addf %265, %285 : vector<256x128xf32>
    %c0_130 = arith.constant 0 : index
    %c0_131 = arith.constant 0 : index
    %287 = vector.load %arg5[%c0_130, %c0_131] : memref<1x128xf32, #tpu.memory_space<vmem>>, vector<1x128xf32>
    %288 = vector.broadcast %287 : vector<1x128xf32> to vector<256x128xf32>
    %289 = arith.addf %286, %288 : vector<256x128xf32>
    %290 = vector.shape_cast %0 : vector<4x8x8x128xf32> to vector<256x128xf32>
    %291 = arith.addf %289, %290 : vector<256x128xf32>
    %cst_132 = arith.constant 0.000000e+00 : f32
    %292 = vector.broadcast %cst_132 : f32 to vector<256x128xf32>
    %293 = arith.maximumf %291, %292 : vector<256x128xf32>
    %c0_133 = arith.constant 0 : index
    %c0_134 = arith.constant 0 : index
    %294 = vector.load %arg6[%c0_133, %c0_134] : memref<256x128xf32, #tpu.memory_space<vmem>>, vector<256x128xf32>
    tpu.vector_store %arg6[%c0_133, %c0_134], %293 {strides = array<i32>} : memref<256x128xf32, #tpu.memory_space<vmem>>, vector<256x128xf32>,
    return
  }
  func.func @transform_0(%arg0: i32) -> (i32, i32, i32, i32) {
    %c0_i32 = arith.constant 0 : i32
    %c0_i32_0 = arith.constant 0 : i32
    %c0_i32_1 = arith.constant 0 : i32
    %c0_i32_2 = arith.constant 0 : i32
    return %arg0, %c0_i32, %c0_i32_0, %c0_i32_1 : i32, i32, i32, i32
  }
  func.func @transform_1(%arg0: i32) -> (i32, i32) {
    %c0_i32 = arith.constant 0 : i32
    %c0_i32_0 = arith.constant 0 : i32
    %c0_i32_1 = arith.constant 0 : i32
    return %c0_i32, %c0_i32_0 : i32, i32
  }
  func.func @transform_2(%arg0: i32) -> (i32, i32) {
    %c0_i32 = arith.constant 0 : i32
    %c0_i32_0 = arith.constant 0 : i32
    %c0_i32_1 = arith.constant 0 : i32
    return %c0_i32, %c0_i32_0 : i32, i32
  }
  func.func @transform_3(%arg0: i32) -> (i32, i32) {
    %c0_i32 = arith.constant 0 : i32
    %c0_i32_0 = arith.constant 0 : i32
    %c0_i32_1 = arith.constant 0 : i32
    return %c0_i32, %c0_i32_0 : i32, i32
  }
  func.func @transform_4(%arg0: i32) -> (i32, i32) {
    %c0_i32 = arith.constant 0 : i32
    %c0_i32_0 = arith.constant 0 : i32
    %c0_i32_1 = arith.constant 0 : i32
    return %c0_i32, %c0_i32_0 : i32, i32
  }
  func.func @transform_5(%arg0: i32) -> (i32, i32) {
    %c0_i32 = arith.constant 0 : i32
    %c0_i32_0 = arith.constant 0 : i32
    return %arg0, %c0_i32 : i32, i32
  }
}

</mosaic_0001>

<bundles_post_ra>
// kernel: residual_block_forward.1
= control target key start
LH: loop header
LB: loop body
LE: loop exit
PB: predicated region body
PF: predicated region fallthrough
CT: control target
= control target key end

     0   :  { %10 = vsyncpa [#allocation3], 0  ;;  %s10658_s0 = inlined_call_operand.hbm [shape: f32[8,8,8,128], index: 0, kind: input, shape index: {}]   ;;  %s10659_s1 = inlined_call_operand.hbm [shape: bf16[1152,128], index: 1, kind: input, shape index: {}]   ;;  %s10660_s2 = inlined_call_operand.vmem [shape: f32[1,128], index: 2, kind: input, shape index: {}]   ;;  %s10661_s3 = inlined_call_operand.hbm [shape: bf16[1152,128], index: 3, kind: input, shape index: {}]   ;;  %s10662_s4 = inlined_call_operand.vmem [shape: f32[1,128], index: 4, kind: input, shape index: {}]   ;;  %s10663_s5 = inlined_call_operand.hbm [shape: f32[512,128], index: 5, kind: output, shape index: {}]  }
   0x1   :  { %12 = vsyncpa [#allocation3 + $0x1], 0 }
   0x2   :  { %13 = vsyncpa [#allocation6], 0 }
   0x3   :  { %14 = vsyncpa [#allocation4], 0 }
   0x4   :  { %16 = vsyncpa [#allocation4 + $0x1], 0  ;;  %s8615_s18 = smov 0   ;;  %s8617_s19 = smov 0  }
   0x5   :  { %s8619_s20 = smov 0   ;;  %s8621_s21 = smov 0  }
   0x6 LB: > { %s8636_s22 = sadd.s32 4294967295, %s8571_s21   ;;  %s5600_s23 = sadd.s32 4294967294, %s8571_s21   ;;  %s8571_s21 = sphi %s8621_s21, %s11084_s21   ;;  %s8567_s20 = sphi %s8619_s20, %s11083_s20   ;;  %s8563_s19 = sphi %s8617_s19, %s11082_s19   ;;  %s8559_s18 = sphi %s8615_s18, %s11081_s18  }
   0x7   : > { %p42_p0 = scmp.ne.s32.totalorder %s8563_s19, %s8559_s18  ;;  %p10664_p1 = scmp.eq.s32.totalorder %s8636_s22, 0 }
   0x8   : > { %p156_p3 = scmp.eq.s32.totalorder %s5600_s23, 1  ;;  %p5601_p5 = scmp.ge.s32.totalorder %s8571_s21, 1 }
   0x9   : > { %p8645_p4 = por %p10664_p1, %p42_p0  ;;  %p163_p7 = scmp.lt.s32.totalorder %s8571_s21, 3 }
   0xa   : > { %p8650_p6 = por %p156_p3, %p42_p0  ;;  %s8573_s27 = smov [#allocation5]  }
   0xb   : > { %s10803_s24 = scalar_select %p8645_p4, 1, 0 }
   0xc   : > { %s10804_s25 = scalar_select %p8650_p6, 1, 0 }
   0xd   : > { %p8655_p8 = pnand %p5601_p5, %p163_p7  ;;  %s175_s28 = sshll.u32 %s8573_s27, 4  ;;  %s8659_s28 = int_to_ptr.vmem [resolvable:$true] %s175_s28 }
   0xe   : > { %s8574_s30 = smov [#allocation7]   ;;  %s8415_s9 = scalar_lea.hbm %s10659_s1, 9216 }
   0xf   : > { %p8164_p9 = pneg %p8655_p8  ;;  %s191_s6 = sshll.u32 %s8574_s30, 4  ;;  %s8670_s6 = int_to_ptr.vmem [resolvable:$true] %s191_s6 }
  0x10   : > { %p8416_p12 = scmp.ne.s32.totalorder %s10659_s1, %s8415_s9  ;;  %p8422_p5 = scmp.lt.u32.totalorder %s8415_s9, %s10659_s1 }
  0x11   : > { %p8666_p11 = pnand %p8164_p9, %p10664_p1 }
  0x13   : > { %p8417_p13 = pneg %p8666_p11 }
  0x15   : > { %p8418_p0 = pnand %p8417_p13, %p8416_p12 }
  0x17   : > { %p8419_p3 = pneg %p8418_p0 }
  0x19   : > { %p8424_p7 = pnand %p8422_p5, %p8419_p3 }
  0x1b   : > { %8427 = shalt.err (!%p8424_p7)
}
  0x1c   : > { %s8428_s14 = scalar_lea.vmem %s8659_s28, 9216  ;;  %p8436_p2 = scmp.lt.s32.totalorder %s8659_s28, %s8659_s28 }
  0x1d   : > { %p8429_p9 = scmp.ne.s32.totalorder %s8659_s28, %s8428_s14  ;;  %p8437_p12 = scmp.lt.s32.totalorder %s8428_s14, %s8428_s14 }
  0x1f   : > { %p8431_p10 = pnand %p8429_p9, %p8417_p13  ;;  %p8438_p0 = por %p8437_p12, %p8436_p2 }
  0x21   : > { %p8432_p1 = pneg %p8431_p10 }
  0x23   : > { %p8439_p6 = pnand %p8438_p0, %p8432_p1 }
  0x25   : > { %8442 = shalt.err (!%p8439_p6)
}
  0x26   : > { %s8575_s15 = smov 64   ;;  %s8576_s16 = smov 4  }
  0x27   : > { %8167 = dma.hbm_to_vmem [thread:$0]  (!%p8666_p11), %s10659_s1, 9216, %s8659_s28, [#allocation6], %s8575_s15, %s8575_s15, %s8576_s16  }
  0x28   : > { %s8443_s7 = scalar_lea.hbm %s10661_s3, 9216 }
  0x29   : > { %p8444_p2 = scmp.ne.s32.totalorder %s10661_s3, %s8443_s7  ;;  %p8450_p10 = scmp.lt.u32.totalorder %s8443_s7, %s10661_s3 }
  0x2b   : > { %p8446_p1 = pnand %p8444_p2, %p8417_p13 }
  0x2d   : > { %p8447_p6 = pneg %p8446_p1 }
  0x2f   : > { %p8452_p3 = pnand %p8450_p10, %p8447_p6 }
  0x31   : > { %8455 = shalt.err (!%p8452_p3)
}
  0x32   : > { %s8456_s28 = scalar_lea.vmem %s8670_s6, 9216  ;;  %p8464_p12 = scmp.lt.s32.totalorder %s8670_s6, %s8670_s6 }
  0x33   : > { %p8457_p5 = scmp.ne.s32.totalorder %s8670_s6, %s8456_s28  ;;  %p8465_p0 = scmp.lt.s32.totalorder %s8456_s28, %s8456_s28 }
  0x35   : > { %p8459_p7 = pnand %p8457_p5, %p8417_p13  ;;  %p8466_p2 = por %p8465_p0, %p8464_p12 }
  0x37   : > { %p8460_p9 = pneg %p8459_p7 }
  0x39   : > { %p8467_p1 = pnand %p8466_p2, %p8460_p9 }
  0x3b   : > { %8470 = shalt.err (!%p8467_p1)
}
  0x3c   : > { %8170 = dma.hbm_to_vmem [thread:$0]  (!%p8666_p11), %s10661_s3, 9216, %s8670_s6, [#allocation6], %s8575_s15, %s8575_s15, %s8576_s16  }
  0x3d   : > { %s8725_s14 = sadd.s32 1, %s8571_s21   ;;  %s29_s29 = sadd.s32 1, %s8567_s20 }
  0x3e   : > { %s26_s17 = ssub.s32 %s8571_s21, %s8725_s14  ;;  %p36_p13 = scmp.ne.s32.totalorder %s8567_s20, %s8563_s19 }
  0x3f   : > { %p27_p6 = scmp.eq.s32.totalorder %s26_s17, 0  ;;  %p37_p10 = scmp.eq.s32.totalorder %s8571_s21, 0 }
  0x40   : > { %p10807_p3 = scmp.eq.s32.totalorder %s8636_s22, 1  ;;  %p8181_p7 = scmp.lt.s32.totalorder %s8571_s21, 2 }
  0x41   : > { %s8741_s27 = scalar_select %p27_p6, %s8567_s20, %s29_s29  }
  0x42   : > { %p8735_p5 = por %p10807_p3, %p36_p13  ;;  %p38_p9 = por %p37_p10, %p36_p13 }
  0x43   : > { %s208_s30 = sand.u32 1, %s8567_s20   ;;  %s6342_s6 = sshll.u32 %s8571_s21, 12 }
  0x44   : > { %s10808_s23 = scalar_select %p8735_p5, 1, 0 }
  0x45   : > { %s5605_s7 = sshll.u32 %s208_s30, 8  ;;  %s8748_s8 = scalar_lea.hbm %s10658_s0, %s6342_s6 }
  0x46   : > { %s212_s9 = scalar_lea.vmem [#allocation2], %s5605_s7  ;;  %p8752_p11 = pnand %p8181_p7, %p38_p9 }
  0x47   : > { %s220_s10 = sshll.u32 %s212_s9, 4  ;;  %s8756_s28 = scalar_lea.sflag [#allocation3], %s208_s30  ;;  %s8750_s10 = int_to_ptr.vmem [resolvable:$true] %s220_s10 }
  0x48   : > { %s8471_s12 = scalar_lea.hbm %s8748_s8, 4096  ;;  %p8473_p0 = pneg %p8752_p11 }
  0x49   : > { %p8472_p12 = scmp.ne.s32.totalorder %s8748_s8, %s8471_s12  ;;  %s8476_s17 = scalar_lea.hbm %s10658_s0, 8192 }
  0x4a   : > { %p8477_p13 = scmp.lt.u32.totalorder %s8748_s8, %s10658_s0  ;;  %p8478_p6 = scmp.lt.u32.totalorder %s8476_s17, %s8471_s12 }
  0x4b   : > { %p8474_p2 = pnand %p8473_p0, %p8472_p12  ;;  %p8480_p3 = scmp.lt.u32.totalorder %s8471_s12, %s8748_s8 }
  0x4c   : > { %p8479_p10 = por %p8478_p6, %p8477_p13 }
  0x4d   : > { %p8475_p1 = pneg %p8474_p2 }
  0x4e   : > { %p8481_p7 = por %p8480_p3, %p8479_p10 }
  0x50   : > { %p8482_p9 = pnand %p8481_p7, %p8475_p1 }
  0x52   : > { %8485 = shalt.err (!%p8482_p9)
}
  0x53   : > { %s8486_s30 = scalar_lea.vmem %s8750_s10, 4096  ;;  %s8577_s15 = smov [#allocation2]  }
  0x54   : > { %p8487_p12 = scmp.ne.s32.totalorder %s8750_s10, %s8486_s30  ;;  %s8491_s16 = sshll.u32 %s8577_s15, 4  ;;  %s8492_s16 = int_to_ptr.vmem [resolvable:$false] %s8491_s16 }
  0x55   : > { %s8493_s9 = scalar_lea.vmem %s8492_s16, 8192  ;;  %p8494_p4 = scmp.lt.s32.totalorder %s8750_s10, %s8492_s16 }
  0x56   : > { %p8489_p2 = pnand %p8487_p12, %p8473_p0  ;;  %p8495_p13 = scmp.lt.s32.totalorder %s8493_s9, %s8486_s30 }
  0x58   : > { %p8490_p5 = pneg %p8489_p2  ;;  %p8496_p6 = por %p8495_p13, %p8494_p4 }
  0x5a   : > { %p8497_p10 = pnand %p8496_p6, %p8490_p5 }
  0x5c   : > { %8500 = shalt.err (!%p8497_p10)
}
  0x5d   : > { %s8578_s12 = smov 128   ;;  %s8579_s13 = smov 8  }
  0x5e   : > { %8174 = dma.hbm_to_vmem [thread:$0]  (!%p8752_p11), %s8748_s8, 4096, %s8750_s10, %s8756_s28, %s8578_s12, %s8578_s12, %s8579_s13  }
  0x5f   : > { %232 = sbr.rel (%p8655_p8) target bundleno = 1679 (0x68f), region = 40 }
  0x66   : > { %s8787_s29 = sand.u32 1, %s8563_s19   ;;  %p10810_p4 = scmp.ne.s32.totalorder %s10803_s24, 0 }
  0x67   : > { %s5610_s17 = sshll.u32 %s8787_s29, 8  ;;  %s235_s7 = scalar_lea.sflag [#allocation3], %s8787_s29 }
  0x68   : > { %s8793_s6 = scalar_lea.vmem [#allocation2], %s5610_s17 }
  0x69   : > { %8546 = dma.done.wait (%p10810_p4), %s235_s7, 4096  }
  0x6a   : > { %8548 = vsyncadd (%p10810_p4), %s235_s7, 4294963200  ;;  %p10811_p5 = scmp.eq.s32.totalorder %s8636_s22, 0 }
  0x6c   : > { %8550 = dma.done.wait (%p10811_p5), [#allocation6], 18432   ;;  %p10812_p8 = pmov %p10811_p5 }
  0x6d   : > { %v8227_v0 = vld [vmem:[#allocation5 + $0x40] sm:$0xff]   ;;  %v8228_v1 = vld [vmem:[#allocation5 + $0x48] sm:$0xff]   ;;  %v8229_v2 = vld [vmem:[#allocation5 + $0x50] sm:$0xff]   ;;  %v10689_v5 = vmov 0.0   ;;  %v340_v47 = vlaneseq  ;;  %vm8581_vm1 = vmmov 1   ;;  %s10517_s11 = scalar_lea.vmem [#allocation8], %s5610_s17 }
  0x6e   : > { %8552 = vsyncadd (%p10812_p8), [#allocation6], 4294948864  ;;  %6776 = vmatprep.subr.bf16.mxu0 %v8227_v0  ;;  %v8230_v3 = vld [vmem:[#allocation5 + $0x58] sm:$0xff]   ;;  %v8804_v4 = vld [vmem:[%s8793_s6] sm:$0xff]  ;;  %s6343_s28 = sshll.u32 %s8636_s22, 12  ;;  %s5508_s30 = sshll.u32 %s10517_s11, 4  ;;  %s10611_s30 = int_to_ptr.vmem [resolvable:$true] %s5508_s30 }
  0x6f   : > { %6777 = vmatpush3.bf16.msra.mxu0 %v8227_v0  ;;  %v410_v6 = vpack.c.bf16 %v8804_v4, %v10689_v5  ;;  %v8809_v7 = vld [vmem:[%s8793_s6 + $0x10] sm:$0xff]  ;;  %v8812_v8 = vld [vmem:[%s8793_s6 + $0x18] sm:$0xff]  ;;  %v8231_v11 = vld [vmem:[#allocation5 + $0x60] sm:$0xff]   ;;  %v8912_v52 = vshrl.u32 %v340_v47, 7  ;;  %s10609_s9 = scalar_lea.hbm %s10663_s5, %s6343_s28  ;;  %s5495_s22 = scalar_lea.sflag [#allocation4], %s8787_s29 }
  0x70   : > { %6778 = vmatprep.subr.bf16.mxu0 %v8228_v1  ;;  %v310_v9 = vrot.slane %v8809_v7, 7  ;;  %v311_v10 = vrot.slane %v8812_v8, 7  ;;  %v8232_v13 = vld [vmem:[#allocation5 + $0x68] sm:$0xff]   ;;  %v8233_v14 = vld [vmem:[#allocation5 + $0x70] sm:$0xff]   ;;  %v8234_v15 = vld [vmem:[#allocation5 + $0x78] sm:$0xff]   ;;  %v10685_v23 = vrot.slane %v8809_v7, 1 }
  0x71   : > { %6792 = vmatprep.mubr.bf16.mxu0 %v410_v6  ;;  %v8823_v16 = vld [vmem:[%s8793_s6 + $0x8] sm:$0xff]  ;;  %v8235_v17 = vld [vmem:[#allocation5] sm:$0xff]   ;;  %v8843_v24 = vld [vmem:[%s8793_s6 + $0x30] sm:$0xff]  ;;  %v10680_v27 = vrot.slane %v8812_v8, 1  ;;  %v8934_v59 = vadd.s32 4294967295, %v8912_v52  ;;  %s8501_s12 = scalar_lea.vmem %s10611_s30, 4096 }
  0x72   : > { %v8820_v12 = vpack.c.bf16 %v311_v10, %v310_v9  ;;  %v8826_v18 = vld [vmem:[%s8793_s6 + $0x20] sm:$0xff]  ;;  %v8830_v19 = vpack.c.bf16 %v8809_v7, %v8823_v16  ;;  %v8236_v21 = vld [vmem:[#allocation5 + $0x8] sm:$0xff]   ;;  %v8237_v26 = vld [vmem:[#allocation5 + $0x10] sm:$0xff]   ;;  %v10668_v6 = vrot.slane %v8823_v16, 7  ;;  %p8502_p11 = scmp.ne.s32.totalorder %s10611_s30, %s8501_s12  ;;  %p11078_p0 = scmp.ne.s32.totalorder %s10808_s23, 0 }
  0x73   : > { %6779 = vmatpush3.bf16.msra.mxu0 %v8228_v1  ;;  %v8834_v20 = vpack.c.bf16 %v8826_v18, %v8812_v8  ;;  %v8838_v22 = vld [vmem:[%s8793_s6 + $0x28] sm:$0xff]  ;;  %v8846_v25 = vld [vmem:[%s8793_s6 + $0x40] sm:$0xff]  ;;  %v8853_v28 = vpack.c.bf16 %v10680_v27, %v10685_v23  ;;  %v8238_v30 = vld [vmem:[#allocation5 + $0x18] sm:$0xff]   ;;  %vm343_vm0 = vcmp.ge.s32.totalorder %v8934_v59, 0  ;;  %s8582_s13 = smov [#allocation8]  }
  0x74   : > { %6780 = vmatprep.subr.bf16.mxu0 %v8229_v2  ;;  %v8857_v29 = vpack.c.bf16 %v8843_v24, %v8838_v22  ;;  %v414_v31 = vpack.c.bf16 %v8846_v25, %v10689_v5  ;;  %v8862_v32 = vld [vmem:[%s8793_s6 + $0x48] sm:$0xff]  ;;  %v8865_v33 = vld [vmem:[%s8793_s6 + $0x50] sm:$0xff]  ;;  %v8869_v34 = vld [vmem:[%s8793_s6 + $0x58] sm:$0xff]  ;;  %p8503_p1 = pnand %p8502_p11, %p11078_p0  ;;  %s8505_s17 = sshll.u32 %s8582_s13, 4  ;;  %s8506_s17 = int_to_ptr.vmem [resolvable:$false] %s8505_s17 }
  0x75   : > { %v8872_v35 = vld [vmem:[%s8793_s6 + $0x60] sm:$0xff]  ;;  %v8876_v37 = vpack.c.bf16 %v8865_v33, %v8862_v32  ;;  %v8240_v38 = vld [vmem:[#allocation5 + $0x28] sm:$0xff]   ;;  %v8887_v41 = vld [vmem:[%s8793_s6 + $0x70] sm:$0xff]  ;;  %v10672_v47 = vrot.slane %v8865_v33, 7  ;;  %s8507_s7 = scalar_lea.vmem %s8506_s17, 8192  ;;  %p8508_p7 = scmp.lt.s32.totalorder %s10611_s30, %s8506_s17 }
  0x76   : > { %v8239_v36 = vld [vmem:[#allocation5 + $0x20] sm:$0xff]   ;;  %v8880_v39 = vpack.c.bf16 %v8872_v35, %v8869_v34  ;;  %v8883_v40 = vld [vmem:[%s8793_s6 + $0x68] sm:$0xff]  ;;  %v8241_v43 = vld [vmem:[#allocation5 + $0x30] sm:$0xff]   ;;  %p8504_p3 = pneg %p8503_p1  ;;  %p8509_p9 = scmp.lt.s32.totalorder %s8507_s7, %s8501_s12 }
  0x77   : > { %6781 = vmatpush3.bf16.msra.mxu0 %v8229_v2  ;;  %10813 = vst [vmem:[#allocation12_spill] sm:$0xff] %v8876_v37  ;;  %v8890_v42 = vld [vmem:[%s8793_s6 + $0x80] sm:$0xff]  ;;  %v8895_v44 = vpack.c.bf16 %v8887_v41, %v8883_v40  ;;  %v8242_v45 = vld [vmem:[#allocation5 + $0x38] sm:$0xff]   ;;  %v8900_v48 = vld [vmem:[%s8793_s6 + $0x88] sm:$0xff] }
  0x78   : > { %6782 = vmatprep.subr.bf16.mxu0 %v8230_v3  ;;  %10814 = vst [vmem:[#allocation13_spill] sm:$0xff] %v8880_v39  ;;  %v418_v46 = vpack.c.bf16 %v8890_v42, %v10689_v5  ;;  %v8903_v49 = vld [vmem:[%s8793_s6 + $0x90] sm:$0xff]  ;;  %v8907_v50 = vld [vmem:[%s8793_s6 + $0x98] sm:$0xff]  ;;  %v8910_v51 = vld [vmem:[%s8793_s6 + $0xa0] sm:$0xff]  ;;  %p8510_p12 = por %p8509_p9, %p8508_p7 }
  0x79   : > { %10815 = vst [vmem:[#allocation14_spill] sm:$0xff] %v8895_v44  ;;  %v8243_v53 = vld [vmem:[#allocation5 + $0x80] sm:$0xff]   ;;  %v8916_v54 = vpack.c.bf16 %v8903_v49, %v8900_v48  ;;  %v8920_v55 = vpack.c.bf16 %v8910_v51, %v8907_v50  ;;  %v8924_v56 = vld [vmem:[%s8793_s6 + $0xa8] sm:$0xff]  ;;  %v8927_v57 = vld [vmem:[%s8793_s6 + $0xb0] sm:$0xff] }
  0x7a   : > { %v8931_v58 = vld [vmem:[%s8793_s6 + $0xc0] sm:$0xff]  ;;  %v8938_v60 = vpack.c.bf16 %v8927_v57, %v8924_v56  ;;  %v8943_v62 = vld [vmem:[%s8793_s6 + $0xc8] sm:$0xff]  ;;  %v8946_v63 = vld [vmem:[%s8793_s6 + $0xd0] sm:$0xff]  ;;  %p8511_p2 = pnand %p8510_p12, %p8504_p3 }
  0x7b   : > { %6783 = vmatpush3.bf16.msra.mxu0 %v8230_v3  ;;  %10816 = vst [vmem:[#allocation15_spill] sm:$0xff] %v8916_v54  ;;  %10817 = vst [vmem:[#allocation16_spill] sm:$0xff] %v8920_v55  ;;  %v422_v61 = vpack.c.bf16 %v8931_v58, %v10689_v5  ;;  %v8950_v0 = vld [vmem:[%s8793_s6 + $0xd8] sm:$0xff]  ;;  %v8953_v1 = vld [vmem:[%s8793_s6 + $0xe0] sm:$0xff]  ;;  %v8958_v2 = vpack.c.bf16 %v8946_v63, %v8943_v62 }
  0x7c   : > { %6784 = vmatprep.subr.bf16.mxu0 %v8231_v11  ;;  %10818 = vst [vmem:[#allocation17_spill] sm:$0xff] %v8938_v60  ;;  %v8962_v3 = vpack.c.bf16 %v8953_v1, %v8950_v0  ;;  %vm8972_vm2 = vmpackc.low %vm343_vm0, %vm8581_vm1  ;;  %v10695_v23 = vrot.slane %v8950_v0, 7  ;;  %v8288_v59 = vld [vmem:[#allocation5 + $0x1e8] sm:$0xff]  }
  0x7d   : > { %10819 = vst [vmem:[#allocation18_spill] sm:$0xff] %v8958_v2  ;;  %vm8992_vm3 = vmpackc.low %vm343_vm0, %vm343_vm0 }
  0x7e   : > { %10820 = vst [vmem:[#allocation19_spill] sm:$0xff] %v8962_v3  ;;  %vm9570_vm7 = vmpackc.low %vm8581_vm1, %vm343_vm0 }
  0x7f   : > { %6785 = vmatpush3.bf16.msra.mxu0 %v8231_v11  ;;  %v8967_v11 = vld [vmem:[%s8793_s6 + $0xe8] sm:$0xff] }
  0x80   : > { %6786 = vmatprep.subr.bf16.mxu0 %v8232_v13 }
  0x83   : > { %6787 = vmatpush3.bf16.msra.mxu0 %v8232_v13  ;;  %v10821_v13 = vmov 0 }
  0x84   : > { %6788 = vmatprep.subr.bf16.mxu0 %v8233_v14  ;;  %v10822_v13 = vsel %vm8972_vm2, 4294967295, %v10821_v13 }
  0x85   : > { %10823 = vst [vmem:[#allocation20_spill] sm:$0xff] %v10822_v13 }
  0x87   : > { %6789 = vmatpush3.bf16.msra.mxu0 %v8233_v14  ;;  %v8978_v14 = vld [vmem:[%s8793_s6 + $0xf0] sm:$0xff] }
  0x88   : > { %6790 = vmatprep.subr.bf16.mxu0 %v8234_v15  ;;  %v10698_v13 = vrot.slane %v8978_v14, 7 }
  0x8b   : > { %6791 = vmatpush3.bf16.msra.mxu0 %v8234_v15  ;;  %v10669_v15 = vrot.slane %v8804_v4, 7 }
  0x8c   : > { %6824 = vmatprep.subr.bf16.mxu0 %v8235_v17 }
  0x8e   : > { %6793 = vmatmul.mubr.bf16.vlgmr.msra.gmra.mrb[0].mxu0 %v8830_v19 }
  0x8f   : > { %6825 = vmatpush3.bf16.msra.mxu0 %v8235_v17  ;;  %6796 = vmatprep.mubr.bf16.mxu0 %v8834_v20  ;;  %v8983_v17 = vpack.c.bf16 %v8978_v14, %v8967_v11 }
  0x90   : > { %6826 = vmatprep.subr.bf16.mxu0 %v8236_v21 }
  0x91   : > { %10824 = vst [vmem:[#allocation21_spill] sm:$0xff] %v8983_v17 }
  0x93   : > { %6827 = vmatpush3.bf16.msra.mxu0 %v8236_v21  ;;  %v5631_v21 = vpack.c.bf16 %v10669_v15, %v10689_v5  ;;  %v8247_v15 = vld [vmem:[#allocation5 + $0xa0] sm:$0xff]  }
  0x94   : > { %6828 = vmatprep.subr.bf16.mxu0 %v8237_v26 }
  0x96   : > { %6797 = vmatmul.mubr.bf16.gmra.mrb[4].mxu0 %v8857_v29 }
  0x97   : > { %6800 = vmatprep.mubr.bf16.mxu0 %v414_v31  ;;  %6829 = vmatpush3.bf16.msra.mxu0 %v8237_v26  ;;  %v10676_v31 = vrot.slane %v8838_v22, 7 }
  0x98   : > { %6830 = vmatprep.subr.bf16.mxu0 %v8238_v30 }
  0x9b   : > { %6831 = vmatpush3.bf16.msra.mxu0 %v8238_v30  ;;  %v10667_v30 = vrot.slane %v8826_v18, 7 }
  0x9c   : > { %6832 = vmatprep.subr.bf16.mxu0 %v8239_v36 }
  0x9e   : > { %6801 = vmatmul.mubr.bf16.gmra.mrb[8].mxu0 %v8876_v37  ;;  %v8268_v37 = vld [vmem:[#allocation5 + $0x148] sm:$0xff]  }
  0x9f   : > { %6804 = vmatprep.mubr.bf16.mxu0 %v8880_v39  ;;  %6833 = vmatpush3.bf16.msra.mxu0 %v8239_v36  ;;  %v9004_v36 = vpack.c.bf16 %v310_v9, %v10668_v6  ;;  %v10675_v9 = vrot.slane %v8862_v32, 7  ;;  %v10673_v6 = vrot.slane %v8872_v35, 7 }
  0xa0   : > { %6834 = vmatprep.subr.bf16.mxu0 %v8240_v38 }
  0xa3   : > { %6835 = vmatpush3.bf16.msra.mxu0 %v8240_v38  ;;  %v8244_v38 = vld [vmem:[#allocation5 + $0x88] sm:$0xff]  }
  0xa4   : > { %6836 = vmatprep.subr.bf16.mxu0 %v8241_v43 }
  0xa6   : > { %6805 = vmatmul.mubr.bf16.gmra.mrb[12].mxu0 %v8895_v44  ;;  %v8375_v44 = vld [vmem:[%s8793_s6 + $0x20] sm:$0xff] }
  0xa7   : > { %6808 = vmatprep.mubr.bf16.mxu0 %v418_v46  ;;  %6837 = vmatpush3.bf16.msra.mxu0 %v8241_v43  ;;  %v9010_v43 = vpack.c.bf16 %v10667_v30, %v311_v10  ;;  %v10670_v46 = vrot.slane %v8846_v25, 7  ;;  %v8245_v10 = vld [vmem:[#allocation5 + $0x90] sm:$0xff]   ;;  %v8246_v30 = vld [vmem:[#allocation5 + $0x98] sm:$0xff]  }
  0xa8   : > { %6838 = vmatprep.subr.bf16.mxu0 %v8242_v45 }
  0xab   : > { %6839 = vmatpush3.bf16.msra.mxu0 %v8242_v45  ;;  %v10671_v45 = vrot.slane %v8843_v24, 7 }
  0xac   : > { %6872 = vmatprep.subr.bf16.mxu0 %v8243_v53 }
  0xae   : > { %6809 = vmatmul.mubr.bf16.gmra.mrb[16].mxu0 %v8916_v54 }
  0xaf   : > { %6812 = vmatprep.mubr.bf16.mxu0 %v8920_v55  ;;  %v9385_v55 = vld [vmem:[%s8793_s6 + $0xb8] sm:$0xff] }
  0xb6   : > { %6813 = vmatmul.mubr.bf16.gmra.mrb[20].mxu0 %v8938_v60  ;;  %v8252_v60 = vld [vmem:[#allocation5 + $0xc8] sm:$0xff]  }
  0xb7   : > { %6816 = vmatprep.mubr.bf16.mxu0 %v422_v61  ;;  %v10674_v61 = vrot.slane %v8869_v34, 7 }
  0xbe   : > { %6817 = vmatmul.mubr.bf16.gmra.mrb[24].mxu0 %v8958_v2  ;;  %v10836_v2 = vrot.slane %v8812_v8, 1  ;;  %v10709_v8 = vrot.slane %v8846_v25, 1 }
  0xbf   : > { %6820 = vmatprep.mubr.bf16.mxu0 %v8962_v3 }
  0xc6   : > { %6821 = vmatmul.mubr.bf16.gmra.mrb[28].mxu0 %v8983_v17  ;;  %v10704_v17 = vrot.slane %v8823_v16, 1 }
  0xc7   : > { %6840 = vmatprep.mubr.msk.bf16.mxu0 %vm8972_vm2, %v5631_v21  ;;  %v9027_v21 = vpack.c.bf16 %v10671_v45, %v10676_v31  ;;  %v9048_v45 = vpack.c.bf16 %v10673_v6, %v10674_v61  ;;  %v8249_v6 = vld [vmem:[#allocation5 + $0xb0] sm:$0xff]   ;;  %v8250_v61 = vld [vmem:[#allocation5 + $0xb8] sm:$0xff]   ;;  %v10681_v31 = vrot.slane %v8903_v49, 7 }
  0xce   : > { %6841 = vmatmul.mubr.msk.bf16.vlgmr.msra.gmra.mrb[0].mxu0 %vm8992_vm3, %v9004_v36 }
  0xcf   : > { %6873 = vmatpush3.bf16.msra.mxu0 %v8243_v53  ;;  %6844 = vmatprep.mubr.msk.bf16.mxu0 %vm8992_vm3, %v9010_v43  ;;  %v5643_v53 = vpack.c.bf16 %v10670_v46, %v10689_v5  ;;  %v8248_v46 = vld [vmem:[#allocation5 + $0xa8] sm:$0xff]  }
  0xd0   : > { %6874 = vmatprep.subr.bf16.mxu0 %v8244_v38 }
  0xd3   : > { %6875 = vmatpush3.bf16.msra.mxu0 %v8244_v38  ;;  %v9042_v38 = vpack.c.bf16 %v10672_v47, %v10675_v9  ;;  %v10679_v47 = vrot.slane %v8890_v42, 7 }
  0xd4   : > { %6876 = vmatprep.subr.bf16.mxu0 %v8245_v10 }
  0xd5   : > { %v5655_v9 = vpack.c.bf16 %v10679_v47, %v10689_v5  ;;  %v8251_v47 = vld [vmem:[#allocation5 + $0xc0] sm:$0xff]  }
  0xd6   : > { %6845 = vmatmul.mubr.msk.bf16.gmra.mrb[4].mxu0 %vm8992_vm3, %v9027_v21 }
  0xd7   : > { %6848 = vmatprep.mubr.msk.bf16.mxu0 %vm8972_vm2, %v5643_v53  ;;  %6877 = vmatpush3.bf16.msra.mxu0 %v8245_v10  ;;  %v10678_v10 = vrot.slane %v8883_v40, 7  ;;  %v10677_v53 = vrot.slane %v8887_v41, 7 }
  0xd8   : > { %6878 = vmatprep.subr.bf16.mxu0 %v8246_v30 }
  0xdb   : > { %6879 = vmatpush3.bf16.msra.mxu0 %v8246_v30  ;;  %v9063_v30 = vpack.c.bf16 %v10677_v53, %v10678_v10  ;;  %v10683_v53 = vrot.slane %v8907_v50, 7  ;;  %v10682_v10 = vrot.slane %v8910_v51, 7 }
  0xdc   : > { %6880 = vmatprep.subr.bf16.mxu0 %v8247_v15 }
  0xdd   : > { %v9087_v27 = vpack.c.bf16 %v10682_v10, %v10683_v53  ;;  %v10696_v53 = vrot.slane %v8943_v62, 7 }
  0xde   : > { %6849 = vmatmul.mubr.msk.bf16.gmra.mrb[8].mxu0 %vm8992_vm3, %v9042_v38 }
  0xdf   : > { %6852 = vmatprep.mubr.msk.bf16.mxu0 %vm8992_vm3, %v9048_v45  ;;  %6881 = vmatpush3.bf16.msra.mxu0 %v8247_v15  ;;  %v10684_v15 = vrot.slane %v8900_v48, 7 }
  0xe0   : > { %6882 = vmatprep.subr.bf16.mxu0 %v8248_v46 }
  0xe3   : > { %6883 = vmatpush3.bf16.msra.mxu0 %v8248_v46  ;;  %v9081_v46 = vpack.c.bf16 %v10681_v31, %v10684_v15  ;;  %v10687_v31 = vrot.slane %v8931_v58, 7  ;;  %v10693_v15 = vrot.slane %v8946_v63, 7 }
  0xe4   : > { %6884 = vmatprep.subr.bf16.mxu0 %v8249_v6 }
  0xe5   : > { %v5667_v10 = vpack.c.bf16 %v10687_v31, %v10689_v5  ;;  %v9120_v31 = vpack.c.bf16 %v10693_v15, %v10696_v53  ;;  %v9129_v5 = vadd.s32 1, %v8912_v52  ;;  %v10699_v15 = vrot.slane %v8804_v4, 1 }
  0xe6   : > { %6853 = vmatmul.mubr.msk.bf16.gmra.mrb[12].mxu0 %vm8992_vm3, %v9063_v30  ;;  %v10829_v53 = vmov 0 }
  0xe7   : > { %6856 = vmatprep.mubr.msk.bf16.mxu0 %vm8972_vm2, %v5655_v9  ;;  %6885 = vmatpush3.bf16.msra.mxu0 %v8249_v6  ;;  %v10688_v6 = vrot.slane %v8924_v56, 7  ;;  %v10686_v9 = vrot.slane %v8927_v57, 7  ;;  %10827 = vst [vmem:[#allocation22_spill] sm:$0xff] %v9129_v5  ;;  %vm894_vm4 = vcmp.lt.s32.totalorder %v9129_v5, 8  ;;  %v10716_v5 = vrot.slane %v8862_v32, 1 }
  0xe8   : > { %6886 = vmatprep.subr.bf16.mxu0 %v8250_v61  ;;  %vm9153_vm5 = vmpackc.low %vm894_vm4, %vm8581_vm1 }
  0xe9   : > { %v10830_v53 = vsel %vm9153_vm5, 4294967295, %v10829_v53  ;;  %vm9173_vm6 = vmpackc.low %vm894_vm4, %vm894_vm4 }
  0xea   : > { %10831 = vst [vmem:[#allocation23_spill] sm:$0xff] %v10830_v53  ;;  %v10740_v53 = vrot.slane %v8978_v14, 1  ;;  %vm9653_vm8 = vmpackc.low %vm8581_vm1, %vm894_vm4 }
  0xeb   : > { %6887 = vmatpush3.bf16.msra.mxu0 %v8250_v61  ;;  %v9102_v61 = vpack.c.bf16 %v10686_v9, %v10688_v6  ;;  %v10694_v9 = vrot.slane %v8953_v1, 7 }
  0xec   : > { %6920 = vmatprep.subr.bf16.mxu0 %v8251_v47 }
  0xed   : > { %v9126_v6 = vpack.c.bf16 %v10694_v9, %v10695_v23  ;;  %v10828_v9 = vmov 0.0  }
  0xee   : > { %6857 = vmatmul.mubr.msk.bf16.gmra.mrb[16].mxu0 %vm8992_vm3, %v9081_v46  ;;  %v5687_v23 = vpack.c.bf16 %v10699_v15, %v10828_v9  ;;  %v10832_v15 = vrot.slane %v8809_v7, 1  ;;  %v10710_v7 = vrot.slane %v8838_v22, 1 }
  0xef   : > { %6860 = vmatprep.mubr.msk.bf16.mxu0 %vm8992_vm3, %v9087_v27 }
  0xf6   : > { %6861 = vmatmul.mubr.msk.bf16.gmra.mrb[20].mxu0 %vm8992_vm3, %v9102_v61 }
  0xf7   : > { %6864 = vmatprep.mubr.msk.bf16.mxu0 %vm8972_vm2, %v5667_v10  ;;  %v10700_v10 = vrot.slane %v8967_v11, 7 }
  0xf9   : > { %v9145_v52 = vpack.c.bf16 %v10698_v13, %v10700_v10  ;;  %v10705_v13 = vrot.slane %v8826_v18, 1  ;;  %v9168_v10 = vpack.c.bf16 %v10832_v15, %v10704_v17  ;;  %v10708_v15 = vrot.slane %v8843_v24, 1  ;;  %v8253_v17 = vld [vmem:[#allocation5 + $0xd0] sm:$0xff]  }
  0xfb   : > { %10833 = vst [vmem:[#allocation24_spill] sm:$0xff] %v9168_v10 }
  0xfe   : > { %6865 = vmatmul.mubr.msk.bf16.gmra.mrb[24].mxu0 %vm8992_vm3, %v9120_v31 }
  0xff   : > { %6868 = vmatprep.mubr.msk.bf16.mxu0 %vm8992_vm3, %v9126_v6 }
 0x106   : > { %6869 = vmatmul.mubr.msk.bf16.gmra.mrb[28].mxu0 %vm8992_vm3, %v9145_v52 }
 0x107   : > { %6888 = vmatprep.mubr.msk.bf16.mxu0 %vm9153_vm5, %v5687_v23  ;;  %v9181_v23 = vpack.c.bf16 %v10705_v13, %v10836_v2  ;;  %v9196_v2 = vpack.c.bf16 %v10708_v15, %v10710_v7  ;;  %v5699_v13 = vpack.c.bf16 %v10709_v8, %v10828_v9  ;;  %v10714_v15 = vrot.slane %v8872_v35, 1  ;;  %v8255_v8 = vld [vmem:[#allocation5 + $0xe0] sm:$0xff]  }
 0x109   : > { %10837 = vst [vmem:[#allocation25_spill] sm:$0xff] %v9181_v23  ;;  %10838 = vst [vmem:[#allocation26_spill] sm:$0xff] %v9196_v2 }
 0x10e   : > { %6889 = vmatmul.mubr.msk.bf16.vlgmr.msra.gmra.mrb[0].mxu0 %vm9173_vm6, %v9168_v10  ;;  %v10718_v10 = vrot.slane %v8887_v41, 1 }
 0x10f   : > { %6921 = vmatpush3.bf16.msra.mxu0 %v8251_v47  ;;  %6892 = vmatprep.mubr.msk.bf16.mxu0 %vm9173_vm6, %v9181_v23  ;;  %v8254_v47 = vld [vmem:[#allocation5 + $0xd8] sm:$0xff]   ;;  %v10713_v23 = vrot.slane %v8865_v33, 1 }
 0x110   : > { %6922 = vmatprep.subr.bf16.mxu0 %v8252_v60 }
 0x111   : > { %v9214_v7 = vpack.c.bf16 %v10713_v23, %v10716_v5  ;;  %v10720_v23 = vrot.slane %v8890_v42, 1  ;;  %v8258_v5 = vld [vmem:[#allocation5 + $0xf8] sm:$0xff]  }
 0x113   : > { %6923 = vmatpush3.bf16.msra.mxu0 %v8252_v60  ;;  %v10715_v60 = vrot.slane %v8869_v34, 1  ;;  %10839 = vst [vmem:[#allocation27_spill] sm:$0xff] %v9214_v7 }
 0x114   : > { %6924 = vmatprep.subr.bf16.mxu0 %v8253_v17 }
 0x116   : > { %6893 = vmatmul.mubr.msk.bf16.gmra.mrb[4].mxu0 %vm9173_vm6, %v9196_v2  ;;  %v9220_v2 = vpack.c.bf16 %v10714_v15, %v10715_v60  ;;  %v8257_v15 = vld [vmem:[#allocation5 + $0xf0] sm:$0xff]   ;;  %v5711_v60 = vpack.c.bf16 %v10720_v23, %v10828_v9 }
 0x117   : > { %6896 = vmatprep.mubr.msk.bf16.mxu0 %vm9153_vm5, %v5699_v13  ;;  %6925 = vmatpush3.bf16.msra.mxu0 %v8253_v17  ;;  %v8256_v13 = vld [vmem:[#allocation5 + $0xe8] sm:$0xff]   ;;  %v10719_v17 = vrot.slane %v8883_v40, 1 }
 0x118   : > { %6926 = vmatprep.subr.bf16.mxu0 %v8254_v47  ;;  %10840 = vst [vmem:[#allocation28_spill] sm:$0xff] %v9220_v2 }
 0x11b   : > { %6927 = vmatpush3.bf16.msra.mxu0 %v8254_v47  ;;  %v9235_v47 = vpack.c.bf16 %v10718_v10, %v10719_v17  ;;  %v10724_v10 = vrot.slane %v8907_v50, 1  ;;  %v10723_v17 = vrot.slane %v8910_v51, 1 }
 0x11c   : > { %6928 = vmatprep.subr.bf16.mxu0 %v8255_v8 }
 0x11d   : > { %10841 = vst [vmem:[#allocation29_spill] sm:$0xff] %v9235_v47 }
 0x11e   : > { %6897 = vmatmul.mubr.msk.bf16.gmra.mrb[8].mxu0 %vm9173_vm6, %v9214_v7  ;;  %v9357_v7 = vld [vmem:[%s8793_s6 + $0x78] sm:$0xff] }
 0x11f   : > { %6900 = vmatprep.mubr.msk.bf16.mxu0 %vm9173_vm6, %v9220_v2  ;;  %6929 = vmatpush3.bf16.msra.mxu0 %v8255_v8  ;;  %v10725_v8 = vrot.slane %v8900_v48, 1  ;;  %v10722_v2 = vrot.slane %v8903_v49, 1 }
 0x120   : > { %6930 = vmatprep.subr.bf16.mxu0 %v8256_v13 }
 0x121   : > { %v9253_v23 = vpack.c.bf16 %v10722_v2, %v10725_v8  ;;  %v10728_v2 = vrot.slane %v8931_v58, 1  ;;  %v10732_v8 = vrot.slane %v8946_v63, 1 }
 0x123   : > { %6931 = vmatpush3.bf16.msra.mxu0 %v8256_v13  ;;  %v8259_v13 = vld [vmem:[#allocation5 + $0x100] sm:$0xff]   ;;  %10842 = vst [vmem:[#allocation30_spill] sm:$0xff] %v9253_v23 }
 0x124   : > { %6932 = vmatprep.subr.bf16.mxu0 %v8257_v15 }
 0x126   : > { %6901 = vmatmul.mubr.msk.bf16.gmra.mrb[12].mxu0 %vm9173_vm6, %v9235_v47  ;;  %v9259_v47 = vpack.c.bf16 %v10723_v17, %v10724_v10  ;;  %v5723_v17 = vpack.c.bf16 %v10728_v2, %v10828_v9  ;;  %v10735_v10 = vrot.slane %v8943_v62, 1 }
 0x127   : > { %6904 = vmatprep.mubr.msk.bf16.mxu0 %vm9153_vm5, %v5711_v60  ;;  %6933 = vmatpush3.bf16.msra.mxu0 %v8257_v15  ;;  %v10729_v15 = vrot.slane %v8924_v56, 1  ;;  %v10727_v60 = vrot.slane %v8927_v57, 1 }
 0x128   : > { %6934 = vmatprep.subr.bf16.mxu0 %v8258_v5  ;;  %10843 = vst [vmem:[#allocation31_spill] sm:$0xff] %v9259_v47  ;;  %v9292_v2 = vpack.c.bf16 %v10732_v8, %v10735_v10 }
 0x12a   : > { %10845 = vst [vmem:[#allocation33_spill] sm:$0xff] %v9292_v2 }
 0x12b   : > { %6935 = vmatpush3.bf16.msra.mxu0 %v8258_v5  ;;  %v9274_v5 = vpack.c.bf16 %v10727_v60, %v10729_v15  ;;  %v10733_v60 = vrot.slane %v8953_v1, 1 }
 0x12c   : > { %6968 = vmatprep.subr.bf16.mxu0 %v8259_v13 }
 0x12d   : > { %10844 = vst [vmem:[#allocation32_spill] sm:$0xff] %v9274_v5 }
 0x12e   : > { %6905 = vmatmul.mubr.msk.bf16.gmra.mrb[16].mxu0 %vm9173_vm6, %v9253_v23  ;;  %v9328_v23 = vld [vmem:[%s8793_s6 + $0x38] sm:$0xff] }
 0x12f   : > { %6908 = vmatprep.mubr.msk.bf16.mxu0 %vm9173_vm6, %v9259_v47  ;;  %v10734_v47 = vrot.slane %v8950_v0, 1 }
 0x131   : > { %v9298_v15 = vpack.c.bf16 %v10733_v60, %v10734_v47  ;;  %v10848_v60 = vrot.slane %v8804_v4, 7  ;;  %v10849_v47 = vrot.slane %v8823_v16, 7 }
 0x133   : > { %10846 = vst [vmem:[#allocation34_spill] sm:$0xff] %v9298_v15  ;;  %v5743_v10 = vpack.c.bf16 %v10849_v47, %v10848_v60  ;;  %v10743_v47 = vrot.slane %v9328_v23, 7  ;;  %v10852_v60 = vrot.slane %v8843_v24, 7 }
 0x136   : > { %6909 = vmatmul.mubr.msk.bf16.gmra.mrb[20].mxu0 %vm9173_vm6, %v9274_v5 }
 0x137   : > { %6912 = vmatprep.mubr.msk.bf16.mxu0 %vm9153_vm5, %v5723_v17  ;;  %v10741_v17 = vrot.slane %v8967_v11, 1 }
 0x139   : > { %v9312_v8 = vpack.c.bf16 %v10740_v53, %v10741_v17  ;;  %v8260_v53 = vld [vmem:[#allocation5 + $0x108] sm:$0xff]   ;;  %v10854_v17 = vrot.slane %v8862_v32, 7 }
 0x13b   : > { %10847 = vst [vmem:[#allocation35_spill] sm:$0xff] %v9312_v8 }
 0x13e   : > { %6913 = vmatmul.mubr.msk.bf16.gmra.mrb[24].mxu0 %vm9173_vm6, %v9292_v2  ;;  %v10851_v2 = vrot.slane %v8838_v22, 7 }
 0x13f   : > { %6916 = vmatprep.mubr.msk.bf16.mxu0 %vm9173_vm6, %v9298_v15  ;;  %v10850_v15 = vrot.slane %v8826_v18, 7 }
 0x141   : > { %v5749_v5 = vpack.c.bf16 %v10851_v2, %v10850_v15  ;;  %v5752_v2 = vpack.c.bf16 %v10743_v47, %v10852_v60  ;;  %v10853_v15 = vrot.slane %v8846_v25, 7  ;;  %v10857_v47 = vrot.slane %v8872_v35, 7 }
 0x146   : > { %6917 = vmatmul.mubr.msk.bf16.gmra.mrb[28].mxu0 %vm9173_vm6, %v9312_v8  ;;  %v8262_v8 = vld [vmem:[#allocation5 + $0x118] sm:$0xff]  }
 0x147   : > { %6936 = vmatprep.mubr.msk.bf16.mxu0 %vm8992_vm3, %v5743_v10  ;;  %v8261_v10 = vld [vmem:[#allocation5 + $0x110] sm:$0xff]  }
 0x14e   : > { %6937 = vmatmul.mubr.msk.bf16.vlgmr.msra.gmra.mrb[0].mxu0 %vm8992_vm3, %v8820_v12  ;;  %v5755_v12 = vpack.c.bf16 %v10854_v17, %v10853_v15  ;;  %v10858_v17 = vrot.slane %v8883_v40, 7 }
 0x14f   : > { %6969 = vmatpush3.bf16.msra.mxu0 %v8259_v13  ;;  %6940 = vmatprep.mubr.msk.bf16.mxu0 %vm8992_vm3, %v5749_v5  ;;  %v8263_v13 = vld [vmem:[#allocation5 + $0x120] sm:$0xff]   ;;  %v10855_v5 = vrot.slane %v8865_v33, 7 }
 0x150   : > { %6970 = vmatprep.subr.bf16.mxu0 %v8260_v53  ;;  %v5761_v15 = vpack.c.bf16 %v10858_v17, %v10857_v47 }
 0x153   : > { %6971 = vmatpush3.bf16.msra.mxu0 %v8260_v53  ;;  %v10856_v53 = vrot.slane %v8869_v34, 7 }
 0x154   : > { %6972 = vmatprep.subr.bf16.mxu0 %v8261_v10 }
 0x155   : > { %v5758_v60 = vpack.c.bf16 %v10856_v53, %v10855_v5  ;;  %v10859_v5 = vrot.slane %v8887_v41, 7  ;;  %v10861_v53 = vrot.slane %v8900_v48, 7 }
 0x156   : > { %6941 = vmatmul.mubr.msk.bf16.gmra.mrb[4].mxu0 %vm8992_vm3, %v5752_v2  ;;  %v8264_v2 = vld [vmem:[#allocation5 + $0x128] sm:$0xff]  }
 0x157   : > { %6944 = vmatprep.mubr.msk.bf16.mxu0 %vm8992_vm3, %v5755_v12  ;;  %6973 = vmatpush3.bf16.msra.mxu0 %v8261_v10  ;;  %v10745_v10 = vrot.slane %v9357_v7, 7  ;;  %v8265_v12 = vld [vmem:[#allocation5 + $0x130] sm:$0xff]  }
 0x158   : > { %6974 = vmatprep.subr.bf16.mxu0 %v8262_v8 }
 0x159   : > { %v5764_v47 = vpack.c.bf16 %v10745_v10, %v10859_v5  ;;  %v10863_v5 = vrot.slane %v8907_v50, 7 }
 0x15b   : > { %6975 = vmatpush3.bf16.msra.mxu0 %v8262_v8  ;;  %v10860_v8 = vrot.slane %v8890_v42, 7 }
 0x15c   : > { %6976 = vmatprep.subr.bf16.mxu0 %v8263_v13 }
 0x15d   : > { %v5767_v17 = vpack.c.bf16 %v10861_v53, %v10860_v8  ;;  %v10864_v8 = vrot.slane %v8910_v51, 7 }
 0x15e   : > { %6945 = vmatmul.mubr.msk.bf16.gmra.mrb[8].mxu0 %vm8992_vm3, %v5758_v60  ;;  %v8266_v60 = vld [vmem:[#allocation5 + $0x138] sm:$0xff]  }
 0x15f   : > { %6948 = vmatprep.mubr.msk.bf16.mxu0 %vm8992_vm3, %v5761_v15  ;;  %6977 = vmatpush3.bf16.msra.mxu0 %v8263_v13  ;;  %v8267_v13 = vld [vmem:[#allocation5 + $0x140] sm:$0xff]   ;;  %v10862_v15 = vrot.slane %v8903_v49, 7 }
 0x160   : > { %6978 = vmatprep.subr.bf16.mxu0 %v8264_v2 }
 0x161   : > { %v5770_v10 = vpack.c.bf16 %v10863_v5, %v10862_v15  ;;  %v10867_v15 = vrot.slane %v8931_v58, 7 }
 0x163   : > { %6979 = vmatpush3.bf16.msra.mxu0 %v8264_v2  ;;  %v10865_v2 = vrot.slane %v8924_v56, 7 }
 0x164   : > { %6980 = vmatprep.subr.bf16.mxu0 %v8265_v12 }
 0x165   : > { %v5773_v53 = vpack.c.bf16 %v10865_v2, %v10864_v8  ;;  %v10870_v8 = vrot.slane %v8950_v0, 7 }
 0x166   : > { %6949 = vmatmul.mubr.msk.bf16.gmra.mrb[12].mxu0 %vm8992_vm3, %v5764_v47  ;;  %v10866_v47 = vrot.slane %v8927_v57, 7 }
 0x167   : > { %6952 = vmatprep.mubr.msk.bf16.mxu0 %vm8992_vm3, %v5767_v17  ;;  %6981 = vmatpush3.bf16.msra.mxu0 %v8265_v12  ;;  %v10747_v12 = vrot.slane %v9385_v55, 7 }
 0x168   : > { %6982 = vmatprep.subr.bf16.mxu0 %v8266_v60 }
 0x169   : > { %v5776_v17 = vpack.c.bf16 %v10747_v12, %v10866_v47  ;;  %v10872_v47 = vrot.slane %v8967_v11, 7 }
 0x16b   : > { %6983 = vmatpush3.bf16.msra.mxu0 %v8266_v60  ;;  %v10868_v60 = vrot.slane %v8943_v62, 7 }
 0x16c   : > { %7016 = vmatprep.subr.bf16.mxu0 %v8267_v13 }
 0x16d   : > { %v5779_v5 = vpack.c.bf16 %v10868_v60, %v10867_v15  ;;  %v9413_v15 = vld [vmem:[%s8793_s6 + $0xf8] sm:$0xff]  ;;  %v10873_v60 = vrot.slane %v8978_v14, 7 }
 0x16e   : > { %6953 = vmatmul.mubr.msk.bf16.gmra.mrb[16].mxu0 %vm8992_vm3, %v5770_v10  ;;  %v10869_v10 = vrot.slane %v8946_v63, 7 }
 0x16f   : > { %6956 = vmatprep.mubr.msk.bf16.mxu0 %vm8992_vm3, %v5773_v53  ;;  %v10871_v53 = vrot.slane %v8953_v1, 7 }
 0x170   : > { %v5782_v2 = vpack.c.bf16 %v10870_v8, %v10869_v10  ;;  %v8371_v10 = vld [vmem:[%s8793_s6] sm:$0xff]  ;;  %v8372_v8 = vld [vmem:[%s8793_s6 + $0x8] sm:$0xff] }
 0x171   : > { %v5785_v12 = vpack.c.bf16 %v10872_v47, %v10871_v53  ;;  %v1474_v54 = vpack.c.bf16 %v8372_v8, %v8371_v10  ;;  %v8374_v53 = vld [vmem:[%s8793_s6 + $0x18] sm:$0xff]  ;;  %v8377_v10 = vld [vmem:[%s8793_s6 + $0x30] sm:$0xff]  ;;  %v8379_v8 = vld [vmem:[%s8793_s6 + $0x48] sm:$0xff] }
 0x176   : > { %6957 = vmatmul.mubr.msk.bf16.gmra.mrb[20].mxu0 %vm8992_vm3, %v5776_v17  ;;  %v10752_v17 = vrot.slane %v9413_v15, 7 }
 0x177   : > { %6960 = vmatprep.mubr.msk.bf16.mxu0 %vm8992_vm3, %v5779_v5 }
 0x178   : > { %v5788_v5 = vpack.c.bf16 %v10752_v17, %v10873_v60  ;;  %v8269_v60 = vld [vmem:[#allocation5 + $0x150] sm:$0xff]  }
 0x17e   : > { %6961 = vmatmul.mubr.msk.bf16.gmra.mrb[24].mxu0 %vm8992_vm3, %v5782_v2  ;;  %v8373_v2 = vld [vmem:[%s8793_s6 + $0x10] sm:$0xff] }
 0x17f   : > { %6964 = vmatprep.mubr.msk.bf16.mxu0 %vm8992_vm3, %v5785_v12  ;;  %v1475_v47 = vpack.c.bf16 %v8374_v53, %v8373_v2  ;;  %v8376_v12 = vld [vmem:[%s8793_s6 + $0x28] sm:$0xff]  ;;  %v8270_v2 = vld [vmem:[#allocation5 + $0x158] sm:$0xff]  }
 0x180   : > { %v1476_v39 = vpack.c.bf16 %v8376_v12, %v8375_v44  ;;  %v8271_v44 = vld [vmem:[#allocation5 + $0x160] sm:$0xff]  }
 0x186   : > { %6965 = vmatmul.mubr.msk.bf16.gmra.mrb[28].mxu0 %vm8992_vm3, %v5788_v5  ;;  %v8378_v5 = vld [vmem:[%s8793_s6 + $0x40] sm:$0xff] }
 0x187   : > { %6984 = vmatprep.mubr.bf16.mxu0 %v1474_v54  ;;  %v1477_v54 = vpack.c.bf16 %v9328_v23, %v8377_v10  ;;  %v1478_v17 = vpack.c.bf16 %v8379_v8, %v8378_v5  ;;  %v8272_v10 = vld [vmem:[#allocation5 + $0x168] sm:$0xff]   ;;  %v8275_v5 = vld [vmem:[#allocation5 + $0x180] sm:$0xff]   ;;  %v1483_v8 = vpack.c.bf16 %v8907_v50, %v8903_v49 }
 0x18e   : > { %6985 = vmatmul.mubr.bf16.vlgmr.msra.gmra.mrb[0].mxu0 %v1475_v47  ;;  %v8382_v47 = vld [vmem:[%s8793_s6 + $0x60] sm:$0xff] }
 0x18f   : > { %7017 = vmatpush3.bf16.msra.mxu0 %v8267_v13  ;;  %6988 = vmatprep.mubr.bf16.mxu0 %v1476_v39  ;;  %v8380_v39 = vld [vmem:[%s8793_s6 + $0x50] sm:$0xff]  ;;  %v8381_v13 = vld [vmem:[%s8793_s6 + $0x58] sm:$0xff]  ;;  %v1480_v12 = vpack.c.bf16 %v8883_v40, %v8382_v47  ;;  %v1489_v47 = vpack.c.bf16 %v9413_v15, %v8978_v14 }
 0x190   : > { %7018 = vmatprep.subr.bf16.mxu0 %v8268_v37  ;;  %v1479_v53 = vpack.c.bf16 %v8381_v13, %v8380_v39  ;;  %v1486_v39 = vpack.c.bf16 %v8943_v62, %v8931_v58  ;;  %v1487_v13 = vpack.c.bf16 %v8950_v0, %v8946_v63 }
 0x193   : > { %7019 = vmatpush3.bf16.msra.mxu0 %v8268_v37  ;;  %v8273_v37 = vld [vmem:[#allocation5 + $0x170] sm:$0xff]  }
 0x194   : > { %7020 = vmatprep.subr.bf16.mxu0 %v8269_v60 }
 0x196   : > { %6989 = vmatmul.mubr.bf16.gmra.mrb[4].mxu0 %v1477_v54  ;;  %v8274_v54 = vld [vmem:[#allocation5 + $0x178] sm:$0xff]  }
 0x197   : > { %6992 = vmatprep.mubr.bf16.mxu0 %v1478_v17  ;;  %7021 = vmatpush3.bf16.msra.mxu0 %v8269_v60  ;;  %v1481_v17 = vpack.c.bf16 %v9357_v7, %v8887_v41  ;;  %v1482_v60 = vpack.c.bf16 %v8900_v48, %v8890_v42 }
 0x198   : > { %7022 = vmatprep.subr.bf16.mxu0 %v8270_v2 }
 0x19b   : > { %7023 = vmatpush3.bf16.msra.mxu0 %v8270_v2  ;;  %v1484_v2 = vpack.c.bf16 %v8924_v56, %v8910_v51 }
 0x19c   : > { %7024 = vmatprep.subr.bf16.mxu0 %v8271_v44 }
 0x19e   : > { %6993 = vmatmul.mubr.bf16.gmra.mrb[8].mxu0 %v1479_v53  ;;  %v1488_v53 = vpack.c.bf16 %v8967_v11, %v8953_v1 }
 0x19f   : > { %6996 = vmatprep.mubr.bf16.mxu0 %v1480_v12  ;;  %7025 = vmatpush3.bf16.msra.mxu0 %v8271_v44  ;;  %v1485_v44 = vpack.c.bf16 %v9385_v55, %v8927_v57  ;;  %v10874_v12 = vrot.slane %v8804_v4, 1  ;;  %v8277_v4 = vld [vmem:[#allocation5 + $0x190] sm:$0xff]  }
 0x1a0   : > { %7026 = vmatprep.subr.bf16.mxu0 %v8272_v10 }
 0x1a3   : > { %7027 = vmatpush3.bf16.msra.mxu0 %v8272_v10  ;;  %v10875_v10 = vrot.slane %v8823_v16, 1  ;;  %v10878_v16 = vrot.slane %v8843_v24, 1  ;;  %v8279_v24 = vld [vmem:[#allocation5 + $0x1a0] sm:$0xff]  }
 0x1a4   : > { %7028 = vmatprep.subr.bf16.mxu0 %v8273_v37 }
 0x1a6   : > { %6997 = vmatmul.mubr.bf16.gmra.mrb[12].mxu0 %v1481_v17  ;;  %v10876_v17 = vrot.slane %v8826_v18, 1 }
 0x1a7   : > { %7000 = vmatprep.mubr.bf16.mxu0 %v1482_v60  ;;  %7029 = vmatpush3.bf16.msra.mxu0 %v8273_v37  ;;  %v5807_v37 = vpack.c.bf16 %v10875_v10, %v10874_v12  ;;  %v10877_v60 = vrot.slane %v8838_v22, 1  ;;  %v10879_v22 = vrot.slane %v8846_v25, 1  ;;  %v10883_v25 = vrot.slane %v8872_v35, 1  ;;  %v8280_v12 = vld [vmem:[#allocation5 + $0x1a8] sm:$0xff]  }
 0x1a8   : > { %7030 = vmatprep.subr.bf16.mxu0 %v8274_v54  ;;  %v875_v10 = vrot.slane %v9357_v7, 1 }
 0x1ab   : > { %7031 = vmatpush3.bf16.msra.mxu0 %v8274_v54  ;;  %v5813_v54 = vpack.c.bf16 %v10877_v60, %v10876_v17  ;;  %v8282_v60 = vld [vmem:[#allocation5 + $0x1b8] sm:$0xff]  }
 0x1ac   : > { %7064 = vmatprep.subr.bf16.mxu0 %v8275_v5 }
 0x1ae   : > { %7001 = vmatmul.mubr.bf16.gmra.mrb[16].mxu0 %v1483_v8  ;;  %v8276_v8 = vld [vmem:[#allocation5 + $0x188] sm:$0xff]  }
 0x1af   : > { %7004 = vmatprep.mubr.bf16.mxu0 %v1484_v2  ;;  %v867_v2 = vrot.slane %v9328_v23, 1 }
 0x1b1   : > { %v5816_v18 = vpack.c.bf16 %v867_v2, %v10878_v16 }
 0x1b6   : > { %7005 = vmatmul.mubr.bf16.gmra.mrb[20].mxu0 %v1485_v44  ;;  %v10880_v44 = vrot.slane %v8862_v32, 1  ;;  %v10884_v32 = vrot.slane %v8883_v40, 1  ;;  %v10886_v40 = vrot.slane %v8890_v42, 1 }
 0x1b7   : > { %7008 = vmatprep.mubr.bf16.mxu0 %v1486_v39 }
 0x1b8   : > { %v5819_v39 = vpack.c.bf16 %v10880_v44, %v10879_v22  ;;  %v10895_v44 = vrot.slane %v8946_v63, 1 }
 0x1be   : > { %7009 = vmatmul.mubr.bf16.gmra.mrb[24].mxu0 %v1487_v13  ;;  %v10882_v13 = vrot.slane %v8869_v34, 1  ;;  %v10885_v34 = vrot.slane %v8887_v41, 1  ;;  %v8283_v41 = vld [vmem:[#allocation5 + $0x1c0] sm:$0xff]  }
 0x1bf   : > { %7012 = vmatprep.mubr.bf16.mxu0 %v1488_v53 }
 0x1c0   : > { %v5828_v35 = vpack.c.bf16 %v875_v10, %v10885_v34  ;;  %v8294_v34 = vld [vmem:[#allocation5 + $0x218] sm:$0xff]  }
 0x1c6   : > { %7013 = vmatmul.mubr.bf16.gmra.mrb[28].mxu0 %v1489_v47  ;;  %v5825_v47 = vpack.c.bf16 %v10884_v32, %v10883_v25  ;;  %v8290_v25 = vld [vmem:[#allocation5 + $0x1f8] sm:$0xff]  }
 0x1c7   : > { %7032 = vmatprep.mubr.msk.bf16.mxu0 %vm9173_vm6, %v5807_v37  ;;  %v10887_v37 = vrot.slane %v8900_v48, 1  ;;  %v10890_v48 = vrot.slane %v8910_v51, 1  ;;  %v10893_v51 = vrot.slane %v8931_v58, 1  ;;  %v891_v58 = vrot.slane %v9413_v15, 1 }
 0x1c9   : > { %v5831_v17 = vpack.c.bf16 %v10887_v37, %v10886_v40  ;;  %v8296_v40 = vld [vmem:[#allocation5 + $0x228] sm:$0xff]  }
 0x1ca   : > { %v10908_v37 = vld [vmem:[#allocation13_spill] sm:$0xff] }
 0x1ce   : > { %7033 = vmatmul.mubr.msk.bf16.vlgmr.msra.gmra.mrb[0].mxu0 %vm9173_vm6, %v8853_v28  ;;  %v8278_v28 = vld [vmem:[#allocation5 + $0x198] sm:$0xff]  }
 0x1cf   : > { %7065 = vmatpush3.bf16.msra.mxu0 %v8275_v5  ;;  %7036 = vmatprep.mubr.msk.bf16.mxu0 %vm9173_vm6, %v5813_v54  ;;  %v10881_v5 = vrot.slane %v8865_v33, 1  ;;  %v8281_v33 = vld [vmem:[#allocation5 + $0x1b0] sm:$0xff]   ;;  %v10888_v54 = vrot.slane %v8903_v49, 1  ;;  %v10892_v49 = vrot.slane %v8927_v57, 1  ;;  %v10897_v57 = vrot.slane %v8953_v1, 1 }
 0x1d0   : > { %7066 = vmatprep.subr.bf16.mxu0 %v8276_v8  ;;  %v8285_v1 = vld [vmem:[#allocation5 + $0x1d0] sm:$0xff]  }
 0x1d1   : > { %v5822_v53 = vpack.c.bf16 %v10882_v13, %v10881_v5  ;;  %v8289_v13 = vld [vmem:[#allocation5 + $0x1f0] sm:$0xff]  }
 0x1d3   : > { %7067 = vmatpush3.bf16.msra.mxu0 %v8276_v8  ;;  %v10889_v8 = vrot.slane %v8907_v50, 1 }
 0x1d4   : > { %7068 = vmatprep.subr.bf16.mxu0 %v8277_v4 }
 0x1d5   : > { %v5834_v42 = vpack.c.bf16 %v10889_v8, %v10888_v54  ;;  %v8298_v54 = vld [vmem:[#allocation5 + $0x238] sm:$0xff]  }
 0x1d6   : > { %7037 = vmatmul.mubr.msk.bf16.gmra.mrb[4].mxu0 %vm9173_vm6, %v5816_v18  ;;  %v883_v18 = vrot.slane %v9385_v55, 1  ;;  %v10910_v8 = vld [vmem:[#allocation15_spill] sm:$0xff] }
 0x1d7   : > { %7040 = vmatprep.mubr.msk.bf16.mxu0 %vm9173_vm6, %v5819_v39  ;;  %7069 = vmatpush3.bf16.msra.mxu0 %v8277_v4  ;;  %v10891_v4 = vrot.slane %v8924_v56, 1  ;;  %v10894_v56 = vrot.slane %v8943_v62, 1  ;;  %v10896_v39 = vrot.slane %v8950_v0, 1  ;;  %v10899_v62 = vrot.slane %v8978_v14, 1  ;;  %v8284_v0 = vld [vmem:[#allocation5 + $0x1c8] sm:$0xff]  }
 0x1d8   : > { %7070 = vmatprep.subr.bf16.mxu0 %v8278_v28  ;;  %v5840_v50 = vpack.c.bf16 %v883_v18, %v10892_v49  ;;  %v10914_v49 = vld [vmem:[#allocation19_spill] sm:$0xff] }
 0x1d9   : > { %v5837_v16 = vpack.c.bf16 %v10891_v4, %v10890_v48  ;;  %v5843_v22 = vpack.c.bf16 %v10894_v56, %v10893_v51  ;;  %v5852_v63 = vpack.c.bf16 %v891_v58, %v10899_v62  ;;  %v10912_v48 = vld [vmem:[#allocation17_spill] sm:$0xff]  ;;  %v2283_v4 = vpack.c.bf16 %v10828_v9, %v9385_v55  ;;  %v10916_v56 = vld [vmem:[#allocation24_spill] sm:$0xff]  ;;  %v10926_v62 = vld [vmem:[#allocation30_spill] sm:$0xff] }
 0x1da   : > { %v2284_v51 = vpack.c.bf16 %v10828_v9, %v9413_v15 }
 0x1db   : > { %7071 = vmatpush3.bf16.msra.mxu0 %v8278_v28  ;;  %v5846_v28 = vpack.c.bf16 %v10896_v39, %v10895_v44  ;;  %v10918_v44 = vld [vmem:[#allocation26_spill] sm:$0xff]  ;;  %v5936_v39 = vpack.c.bf16 %v10828_v9, %v867_v2  ;;  %v5948_v2 = vpack.c.bf16 %v10828_v9, %v875_v10  ;;  %v10929_v10 = vld [vmem:[#allocation33_spill] sm:$0xff] }
 0x1dc   : > { %7072 = vmatprep.subr.bf16.mxu0 %v8279_v24 }
 0x1de   : > { %7041 = vmatmul.mubr.msk.bf16.gmra.mrb[8].mxu0 %vm9173_vm6, %v5822_v53  ;;  %v10904_v53 = vrot.slane %v9357_v7, 7 }
 0x1df   : > { %7044 = vmatprep.mubr.msk.bf16.mxu0 %vm9173_vm6, %v5825_v47  ;;  %7073 = vmatpush3.bf16.msra.mxu0 %v8279_v24  ;;  %v10898_v24 = vrot.slane %v8967_v11, 1  ;;  %v10900_v11 = vrot.slane %v9328_v23, 7  ;;  %v8300_v47 = vld [vmem:[#allocation7 + $0x48] sm:$0xff]  }
 0x1e0   : > { %7074 = vmatprep.subr.bf16.mxu0 %v8280_v12 }
 0x1e1   : > { %v5849_v5 = vpack.c.bf16 %v10898_v24, %v10897_v57  ;;  %v5872_v14 = vpack.c.bf16 %v10828_v9, %v10900_v11  ;;  %v10920_v57 = vmov 0  ;;  %v10923_v24 = vld [vmem:[#allocation27_spill] sm:$0xff] }
 0x1e2   : > { %v10921_v57 = vsel %vm9653_vm8, 4294967295, %v10920_v57  ;;  %v10931_v11 = vld [vmem:[#allocation35_spill] sm:$0xff] }
 0x1e3   : > { %7075 = vmatpush3.bf16.msra.mxu0 %v8280_v12  ;;  %v8293_v12 = vld [vmem:[#allocation5 + $0x210] sm:$0xff]  }
 0x1e4   : > { %7076 = vmatprep.subr.bf16.mxu0 %v8281_v33 }
 0x1e6   : > { %7045 = vmatmul.mubr.msk.bf16.gmra.mrb[12].mxu0 %vm9173_vm6, %v5828_v35  ;;  %v10907_v35 = vld [vmem:[#allocation12_spill] sm:$0xff] }
 0x1e7   : > { %7048 = vmatprep.mubr.msk.bf16.mxu0 %vm9173_vm6, %v5831_v17  ;;  %7077 = vmatpush3.bf16.msra.mxu0 %v8281_v33  ;;  %v2281_v33 = vpack.c.bf16 %v10828_v9, %v9328_v23  ;;  %v10909_v17 = vld [vmem:[#allocation14_spill] sm:$0xff]  ;;  %10922 = vst [vmem:[#allocation12_spill] sm:$0xff] %v10921_v57  ;;  %v10925_v23 = vld [vmem:[#allocation29_spill] sm:$0xff] }
 0x1e8   : > { %7078 = vmatprep.subr.bf16.mxu0 %v8282_v60 }
 0x1eb   : > { %7079 = vmatpush3.bf16.msra.mxu0 %v8282_v60  ;;  %v8297_v60 = vld [vmem:[#allocation5 + $0x230] sm:$0xff]  }
 0x1ec   : > { %7112 = vmatprep.subr.bf16.mxu0 %v8283_v41 }
 0x1ee   : > { %7049 = vmatmul.mubr.msk.bf16.gmra.mrb[16].mxu0 %vm9173_vm6, %v5834_v42  ;;  %v10911_v42 = vld [vmem:[#allocation16_spill] sm:$0xff] }
 0x1ef   : > { %7052 = vmatprep.mubr.msk.bf16.mxu0 %vm9173_vm6, %v5837_v16  ;;  %v10913_v16 = vld [vmem:[#allocation18_spill] sm:$0xff] }
 0x1f6   : > { %7053 = vmatmul.mubr.msk.bf16.gmra.mrb[20].mxu0 %vm9173_vm6, %v5840_v50  ;;  %v10915_v50 = vld [vmem:[#allocation21_spill] sm:$0xff] }
 0x1f7   : > { %7056 = vmatprep.mubr.msk.bf16.mxu0 %vm9173_vm6, %v5843_v22  ;;  %v10917_v22 = vld [vmem:[#allocation25_spill] sm:$0xff] }
 0x1fe   : > { %7057 = vmatmul.mubr.msk.bf16.gmra.mrb[24].mxu0 %vm9173_vm6, %v5846_v28 }
 0x1ff   : > { %7060 = vmatprep.mubr.msk.bf16.mxu0 %vm9173_vm6, %v5849_v5  ;;  %v10924_v5 = vld [vmem:[#allocation28_spill] sm:$0xff] }
 0x206   : > { %7061 = vmatmul.mubr.msk.bf16.gmra.mrb[28].mxu0 %vm9173_vm6, %v5852_v63  ;;  %v10927_v63 = vld [vmem:[#allocation31_spill] sm:$0xff] }
 0x207   : > { %7080 = vmatprep.mubr.msk.bf16.mxu0 %vm8992_vm3, %v9004_v36  ;;  %v10901_v36 = vmov 0 }
 0x208   : > { %v10902_v36 = vsel %vm9570_vm7, 4294967295, %v10901_v36 }
 0x209   : > { %10903 = vst [vmem:[#allocation36_spill] sm:$0xff] %v10902_v36 }
 0x20e   : > { %7081 = vmatmul.mubr.msk.bf16.vlgmr.msra.gmra.mrb[0].mxu0 %vm8992_vm3, %v9010_v43  ;;  %v8286_v43 = vld [vmem:[#allocation5 + $0x1d8] sm:$0xff]  }
 0x20f   : > { %7113 = vmatpush3.bf16.msra.mxu0 %v8283_v41  ;;  %7084 = vmatprep.mubr.msk.bf16.mxu0 %vm8992_vm3, %v9027_v21  ;;  %v8287_v21 = vld [vmem:[#allocation5 + $0x1e0] sm:$0xff]   ;;  %v2282_v41 = vpack.c.bf16 %v10828_v9, %v9357_v7  ;;  %v5960_v7 = vpack.c.bf16 %v10828_v9, %v883_v18  ;;  %v8305_v18 = vld [vmem:[#allocation7 + $0x70] sm:$0xff]  }
 0x210   : > { %7114 = vmatprep.subr.bf16.mxu0 %v8284_v0 }
 0x213   : > { %7115 = vmatpush3.bf16.msra.mxu0 %v8284_v0  ;;  %v10928_v0 = vld [vmem:[#allocation32_spill] sm:$0xff] }
 0x214   : > { %7116 = vmatprep.subr.bf16.mxu0 %v8285_v1 }
 0x216   : > { %7085 = vmatmul.mubr.msk.bf16.gmra.mrb[4].mxu0 %vm9570_vm7, %v5872_v14  ;;  %v8306_v14 = vld [vmem:[#allocation7 + $0x78] sm:$0xff]  }
 0x217   : > { %7088 = vmatprep.mubr.msk.bf16.mxu0 %vm8992_vm3, %v9042_v38  ;;  %7117 = vmatpush3.bf16.msra.mxu0 %v8285_v1  ;;  %v5884_v38 = vpack.c.bf16 %v10828_v9, %v10904_v53  ;;  %v10930_v1 = vld [vmem:[#allocation34_spill] sm:$0xff] }
 0x218   : > { %7118 = vmatprep.subr.bf16.mxu0 %v8286_v43 }
 0x21b   : > { %7119 = vmatpush3.bf16.msra.mxu0 %v8286_v43  ;;  %v8307_v43 = vld [vmem:[#allocation7] sm:$0xff]  }
 0x21c   : > { %7120 = vmatprep.subr.bf16.mxu0 %v8287_v21 }
 0x21e   : > { %7089 = vmatmul.mubr.msk.bf16.gmra.mrb[8].mxu0 %vm8992_vm3, %v9048_v45  ;;  %v8291_v45 = vld [vmem:[#allocation5 + $0x200] sm:$0xff]  }
 0x21f   : > { %7092 = vmatprep.mubr.msk.bf16.mxu0 %vm8992_vm3, %v9063_v30  ;;  %7121 = vmatpush3.bf16.msra.mxu0 %v8287_v21  ;;  %v10905_v30 = vrot.slane %v9385_v55, 7  ;;  %v5972_v55 = vpack.c.bf16 %v10828_v9, %v891_v58  ;;  %v9704_v21 = vld [vmem:[%s10660_s2] ss:$0 sm:$0xff] }
 0x220   : > { %7122 = vmatprep.subr.bf16.mxu0 %v8288_v59 }
 0x221   : > { %v5896_v32 = vpack.c.bf16 %v10828_v9, %v10905_v30 }
 0x223   : > { %7123 = vmatpush3.bf16.msra.mxu0 %v8288_v59 }
 0x224   : > { %7124 = vmatprep.subr.bf16.mxu0 %v8289_v13 }
 0x226   : > { %7093 = vmatmul.mubr.msk.bf16.gmra.mrb[12].mxu0 %vm9570_vm7, %v5884_v38 }
 0x227   : > { %7096 = vmatprep.mubr.msk.bf16.mxu0 %vm8992_vm3, %v9081_v46  ;;  %7125 = vmatpush3.bf16.msra.mxu0 %v8289_v13 }
 0x228   : > { %7126 = vmatprep.subr.bf16.mxu0 %v8290_v25 }
 0x22b   : > { %7127 = vmatpush3.bf16.msra.mxu0 %v8290_v25 }
 0x22c   : > { %7160 = vmatprep.subr.bf16.mxu0 %v8291_v45 }
 0x22e   : > { %7097 = vmatmul.mubr.msk.bf16.gmra.mrb[16].mxu0 %vm8992_vm3, %v9087_v27  ;;  %v10906_v27 = vrot.slane %v9413_v15, 7 }
 0x22f   : > { %7100 = vmatprep.mubr.msk.bf16.mxu0 %vm8992_vm3, %v9102_v61  ;;  %v8299_v61 = vld [vmem:[#allocation7 + $0x40] sm:$0xff]  }
 0x230   : > { %v5908_v46 = vpack.c.bf16 %v10828_v9, %v10906_v27  ;;  %7208 = vmatprep.subr.bf16.mxu1 %v8299_v61 }
 0x231   : > { %7209 = vmatpush3.bf16.msra.mxu1 %v8299_v61 }
 0x232   : > { %7210 = vmatprep.subr.bf16.mxu1 %v8300_v47 }
 0x235   : > { %7211 = vmatpush3.bf16.msra.mxu1 %v8300_v47 }
 0x236   : > { %7101 = vmatmul.mubr.msk.bf16.gmra.mrb[20].mxu0 %vm9570_vm7, %v5896_v32 }
 0x237   : > { %7104 = vmatprep.mubr.msk.bf16.mxu0 %vm8992_vm3, %v9120_v31  ;;  %v8301_v31 = vld [vmem:[#allocation7 + $0x50] sm:$0xff]  }
 0x238   : > { %7212 = vmatprep.subr.bf16.mxu1 %v8301_v31 }
 0x239   : > { %7213 = vmatpush3.bf16.msra.mxu1 %v8301_v31 }
 0x23e   : > { %7105 = vmatmul.mubr.msk.bf16.gmra.mrb[24].mxu0 %vm8992_vm3, %v9126_v6  ;;  %v8292_v6 = vld [vmem:[#allocation5 + $0x208] sm:$0xff]  }
 0x23f   : > { %7108 = vmatprep.mubr.msk.bf16.mxu0 %vm8992_vm3, %v9145_v52  ;;  %v8302_v52 = vld [vmem:[#allocation7 + $0x58] sm:$0xff]  }
 0x240   : > { %7214 = vmatprep.subr.bf16.mxu1 %v8302_v52 }
 0x241   : > { %7215 = vmatpush3.bf16.msra.mxu1 %v8302_v52 }
 0x246   : > { %7109 = vmatmul.mubr.msk.bf16.gmra.mrb[28].mxu0 %vm9570_vm7, %v5908_v46 }
 0x247   : > { %7128 = vmatprep.mubr.bf16.mxu0 %v8830_v19  ;;  %v8303_v19 = vld [vmem:[#allocation7 + $0x60] sm:$0xff]  }
 0x248   : > { %7216 = vmatprep.subr.bf16.mxu1 %v8303_v19 }
 0x249   : > { %7217 = vmatpush3.bf16.msra.mxu1 %v8303_v19 }
 0x24e   : > { %7129 = vmatmul.mubr.bf16.vlgmr.msra.gmra.mrb[0].mxu0 %v8834_v20  ;;  %v8304_v20 = vld [vmem:[#allocation7 + $0x68] sm:$0xff]  }
 0x24f   : > { %7161 = vmatpush3.bf16.msra.mxu0 %v8291_v45  ;;  %7132 = vmatprep.mubr.bf16.mxu0 %v8857_v29  ;;  %v8295_v29 = vld [vmem:[#allocation5 + $0x220] sm:$0xff]  }
 0x250   : > { %7162 = vmatprep.subr.bf16.mxu0 %v8292_v6  ;;  %7218 = vmatprep.subr.bf16.mxu1 %v8304_v20 }
 0x251   : > { %7219 = vmatpush3.bf16.msra.mxu1 %v8304_v20 }
 0x252   : > { %7220 = vmatprep.subr.bf16.mxu1 %v8305_v18 }
 0x253   : > { %7163 = vmatpush3.bf16.msra.mxu0 %v8292_v6 }
 0x254   : > { %7164 = vmatprep.subr.bf16.mxu0 %v8293_v12 }
 0x255   : > { %7221 = vmatpush3.bf16.msra.mxu1 %v8305_v18 }
 0x256   : > { %7133 = vmatmul.mubr.bf16.gmra.mrb[4].mxu0 %v2281_v33  ;;  %7222 = vmatprep.subr.bf16.mxu1 %v8306_v14 }
 0x257   : > { %7136 = vmatprep.mubr.bf16.mxu0 %v10907_v35  ;;  %7165 = vmatpush3.bf16.msra.mxu0 %v8293_v12 }
 0x258   : > { %7166 = vmatprep.subr.bf16.mxu0 %v8294_v34 }
 0x259   : > { %7223 = vmatpush3.bf16.msra.mxu1 %v8306_v14  ;;  %v8310_v14 = vld [vmem:[#allocation7 + $0x18] sm:$0xff]  }
 0x25a   : > { %7256 = vmatprep.subr.bf16.mxu1 %v8307_v43 }
 0x25b   : > { %7167 = vmatpush3.bf16.msra.mxu0 %v8294_v34 }
 0x25c   : > { %7168 = vmatprep.subr.bf16.mxu0 %v8295_v29 }
 0x25e   : > { %7137 = vmatmul.mubr.bf16.gmra.mrb[8].mxu0 %v10908_v37 }
 0x25f   : > { %7140 = vmatprep.mubr.bf16.mxu0 %v10909_v17  ;;  %7169 = vmatpush3.bf16.msra.mxu0 %v8295_v29  ;;  %v8308_v29 = vld [vmem:[#allocation7 + $0x8] sm:$0xff]  }
 0x260   : > { %7170 = vmatprep.subr.bf16.mxu0 %v8296_v40 }
 0x263   : > { %7171 = vmatpush3.bf16.msra.mxu0 %v8296_v40 }
 0x264   : > { %7172 = vmatprep.subr.bf16.mxu0 %v8297_v60 }
 0x266   : > { %7141 = vmatmul.mubr.bf16.gmra.mrb[12].mxu0 %v2282_v41 }
 0x267   : > { %7144 = vmatprep.mubr.bf16.mxu0 %v10910_v8  ;;  %7173 = vmatpush3.bf16.msra.mxu0 %v8297_v60 }
 0x268   : > { %7174 = vmatprep.subr.bf16.mxu0 %v8298_v54 }
 0x26b   : > { %7175 = vmatpush3.bf16.msra.mxu0 %v8298_v54 }
 0x26e   : > { %7145 = vmatmul.mubr.bf16.gmra.mrb[16].mxu0 %v10911_v42 }
 0x26f   : > { %7148 = vmatprep.mubr.bf16.mxu0 %v10912_v48 }
 0x276   : > { %7149 = vmatmul.mubr.bf16.gmra.mrb[20].mxu0 %v2283_v4 }
 0x277   : > { %7152 = vmatprep.mubr.bf16.mxu0 %v10913_v16 }
 0x27e   : > { %7153 = vmatmul.mubr.bf16.gmra.mrb[24].mxu0 %v10914_v49 }
 0x27f   : > { %7156 = vmatprep.mubr.bf16.mxu0 %v10915_v50 }
 0x286   : > { %7157 = vmatmul.mubr.bf16.gmra.mrb[28].mxu0 %v2284_v51 }
 0x287   : > { %7176 = vmatprep.mubr.msk.bf16.mxu0 %vm9173_vm6, %v10916_v56 }
 0x28e   : > { %7177 = vmatmul.mubr.msk.bf16.vlgmr.msra.gmra.mrb[0].mxu0 %vm9173_vm6, %v10917_v22 }
 0x28f   : > { %7180 = vmatprep.mubr.msk.bf16.mxu0 %vm9173_vm6, %v10918_v44 }
 0x296   : > { %7181 = vmatmul.mubr.msk.bf16.gmra.mrb[4].mxu0 %vm9653_vm8, %v5936_v39  ;;  %v8309_v39 = vld [vmem:[#allocation7 + $0x10] sm:$0xff]  }
 0x297   : > { %7184 = vmatprep.mubr.msk.bf16.mxu0 %vm9173_vm6, %v10923_v24 }
 0x29e   : > { %7185 = vmatmul.mubr.msk.bf16.gmra.mrb[8].mxu0 %vm9173_vm6, %v10924_v5 }
 0x29f   : > { %7188 = vmatprep.mubr.msk.bf16.mxu0 %vm9173_vm6, %v10925_v23 }
 0x2a6   : > { %7189 = vmatmul.mubr.msk.bf16.gmra.mrb[12].mxu0 %vm9653_vm8, %v5948_v2 }
 0x2a7   : > { %7192 = vmatprep.mubr.msk.bf16.mxu0 %vm9173_vm6, %v10926_v62 }
 0x2ae   : > { %7193 = vmatmul.mubr.msk.bf16.gmra.mrb[16].mxu0 %vm9173_vm6, %v10927_v63 }
 0x2af   : > { %7196 = vmatprep.mubr.msk.bf16.mxu0 %vm9173_vm6, %v10928_v0 }
 0x2b6   : > { %7197 = vmatmul.mubr.msk.bf16.gmra.mrb[20].mxu0 %vm9653_vm8, %v5960_v7 }
 0x2b7   : > { %7200 = vmatprep.mubr.msk.bf16.mxu0 %vm9173_vm6, %v10929_v10 }
 0x2be   : > { %7201 = vmatmul.mubr.msk.bf16.gmra.mrb[24].mxu0 %vm9173_vm6, %v10930_v1 }
 0x2bf   : > { %7204 = vmatprep.mubr.msk.bf16.mxu0 %vm9173_vm6, %v10931_v11 }
 0x2c6   : > { %7205 = vmatmul.mubr.msk.bf16.gmra.mrb[28].mxu0 %vm9653_vm8, %v5972_v55 }
 0x361   : > { %v7178_v59 = vpop.f32.mrb[0].mxu0 }
 0x362   : > { %v2812_v15 = vadd.f32 %v7178_v59, %v9704_v21  ;;  %v2644_v58 = vpop.f32.mrb[1].mxu0 }
 0x363   : > { %v2810_v13 = vadd.f32 %v9704_v21, %v2644_v58  ;;  %v7179_v53 = vpop.f32.mrb[2].mxu0 }
 0x364   : > { %v9708_v38 = vmax.f32 %v2812_v15, 0.0  ;;  %v2813_v25 = vadd.f32 %v7179_v53, %v9704_v21  ;;  %v2647_v45 = vpop.f32.mrb[3].mxu0  ;;  %v8313_v53 = vld [vmem:[#allocation7 + $0x30] sm:$0xff]  }
 0x365   : > { %v9711_v30 = vmax.f32 %v2810_v13, 0.0  ;;  %v2811_v32 = vadd.f32 %v9704_v21, %v2647_v45 }
 0x366   : > { %10932 = vst [vmem:[#allocation13_spill] sm:$0xff] %v9708_v38  ;;  %v9714_v27 = vmax.f32 %v2813_v25, 0.0  ;;  %v2876_v46 = vrot.slane %v9708_v38, 7  ;;  %v3422_v31 = vrot.slane %v9708_v38, 1 }
 0x367   : > { %v9717_v61 = vmax.f32 %v2811_v32, 0.0  ;;  %v2970_v47 = vpack.c.bf16 %v9711_v30, %v10828_v9  ;;  %v10758_v33 = vrot.slane %v9711_v30, 7  ;;  %v10756_v40 = vrot.slane %v9711_v30, 1 }
 0x368   : > { %10933 = vst [vmem:[#allocation14_spill] sm:$0xff] %v9714_v27  ;;  %v2877_v6 = vrot.slane %v9714_v27, 7  ;;  %v3423_v52 = vrot.slane %v9714_v27, 1 }
 0x369   : > { %10934 = vst [vmem:[#allocation15_spill] sm:$0xff] %v9717_v61  ;;  %v2875_v19 = vrot.slane %v9717_v61, 7  ;;  %v3421_v34 = vrot.slane %v9717_v61, 1  ;;  %v7182_v20 = vpop.f32.mrb[4].mxu0  ;;  %7224 = vmatprep.mubr.bf16.mxu1 %v2970_v47  ;;  %v9731_v35 = vpack.c.bf16 %v9708_v38, %v9717_v61 }
 0x36a   : > { %v9734_v37 = vpack.c.bf16 %v2877_v6, %v2876_v46  ;;  %v9736_v17 = vpack.c.bf16 %v3423_v52, %v3422_v31  ;;  %v2816_v60 = vadd.f32 %v7182_v20, %v9704_v21  ;;  %v2660_v41 = vpop.f32.mrb[5].mxu0 }
 0x36b   : > { %10935 = vst [vmem:[#allocation16_spill] sm:$0xff] %v9731_v35  ;;  %v9739_v54 = vpack.c.bf16 %v2876_v46, %v2875_v19  ;;  %v9741_v8 = vpack.c.bf16 %v3422_v31, %v3421_v34  ;;  %v2814_v42 = vadd.f32 %v9704_v21, %v2660_v41  ;;  %v7183_v48 = vpop.f32.mrb[6].mxu0  ;;  %7225 = vmatmul.mubr.bf16.vlgmr.msra.gmra.mrb[0].mxu1 %v9731_v35 }
 0x36c   : > { %10936 = vst [vmem:[#allocation17_spill] sm:$0xff] %v9736_v17  ;;  %v9747_v4 = vpack.c.bf16 %v2875_v19, %v10758_v33  ;;  %v9749_v16 = vmax.f32 %v2816_v60, 0.0  ;;  %v2817_v49 = vadd.f32 %v7183_v48, %v9704_v21  ;;  %v2663_v50 = vpop.f32.mrb[7].mxu0  ;;  %7257 = vmatpush3.bf16.msra.mxu1 %v8307_v43  ;;  %v9756_v56 = vpack.c.bf16 %v3421_v34, %v10756_v40  ;;  %v8311_v60 = vld [vmem:[#allocation7 + $0x20] sm:$0xff]  }
 0x36d   : > { %v9758_v22 = vmax.f32 %v2814_v42, 0.0  ;;  %v2815_v44 = vadd.f32 %v9704_v21, %v2663_v50  ;;  %7258 = vmatprep.subr.bf16.mxu1 %v8308_v29 }
 0x36e   : > { %10937 = vst [vmem:[#allocation18_spill] sm:$0xff] %v9749_v16  ;;  %10938 = vst [vmem:[#allocation19_spill] sm:$0xff] %v9756_v56  ;;  %v2880_v28 = vrot.slane %v9749_v16, 7  ;;  %v9762_v24 = vmax.f32 %v2817_v49, 0.0  ;;  %v3426_v63 = vrot.slane %v9749_v16, 1 }
 0x36f   : > { %10939 = vst [vmem:[#allocation21_spill] sm:$0xff] %v9758_v22  ;;  %v2878_v5 = vrot.slane %v9758_v22, 7  ;;  %v3424_v23 = vrot.slane %v9758_v22, 1  ;;  %v9766_v2 = vmax.f32 %v2815_v44, 0.0  ;;  %v9770_v62 = vpack.c.bf16 %v9758_v22, %v9714_v27 }
 0x370   : > { %10940 = vst [vmem:[#allocation24_spill] sm:$0xff] %v9762_v24  ;;  %v10754_v0 = vrot.slane %v9762_v24, 7  ;;  %v10753_v7 = vrot.slane %v9762_v24, 1  ;;  %7259 = vmatpush3.bf16.msra.mxu1 %v8308_v29 }
 0x371   : > { %10941 = vst [vmem:[#allocation25_spill] sm:$0xff] %v9766_v2  ;;  %10942 = vst [vmem:[#allocation26_spill] sm:$0xff] %v9770_v62  ;;  %v2879_v1 = vrot.slane %v9766_v2, 7  ;;  %v3425_v11 = vrot.slane %v9766_v2, 1  ;;  %v7186_v55 = vpop.f32.mrb[8].mxu0  ;;  %7228 = vmatprep.mubr.bf16.mxu1 %v9770_v62  ;;  %v9782_v18 = vpack.c.bf16 %v9749_v16, %v9766_v2  ;;  %7260 = vmatprep.subr.bf16.mxu1 %v8309_v39 }
 0x372   : > { %v9784_v43 = vpack.c.bf16 %v2878_v5, %v2877_v6  ;;  %v2820_v59 = vadd.f32 %v7186_v55, %v9704_v21  ;;  %v2676_v15 = vpop.f32.mrb[9].mxu0  ;;  %v9787_v58 = vpack.c.bf16 %v3424_v23, %v3423_v52  ;;  %v9791_v13 = vpack.c.bf16 %v10754_v0, %v2880_v28  ;;  %v8312_v55 = vld [vmem:[#allocation7 + $0x28] sm:$0xff]  }
 0x373   : > { %10943 = vst [vmem:[#allocation22_spill] sm:$0xff] %v9782_v18  ;;  %v2818_v25 = vadd.f32 %v9704_v21, %v2676_v15  ;;  %v7187_v45 = vpop.f32.mrb[10].mxu0  ;;  %7229 = vmatmul.mubr.bf16.gmra.mrb[4].mxu1 %v9782_v18  ;;  %v9797_v32 = vpack.c.bf16 %v2880_v28, %v2879_v1  ;;  %v9799_v46 = vpack.c.bf16 %v3426_v63, %v3425_v11 }
 0x374   : > { %v9801_v47 = vpack.c.bf16 %v2879_v1, %v2878_v5  ;;  %v9803_v31 = vmax.f32 %v2820_v59, 0.0  ;;  %v2821_v6 = vadd.f32 %v7187_v45, %v9704_v21  ;;  %v2679_v52 = vpop.f32.mrb[11].mxu0  ;;  %7261 = vmatpush3.bf16.msra.mxu1 %v8309_v39  ;;  %v9806_v19 = vpack.c.bf16 %v3425_v11, %v3424_v23 }
 0x375   : > { %v9810_v34 = vpack.c.bf16 %v10753_v7, %v3426_v63  ;;  %v9812_v20 = vmax.f32 %v2818_v25, 0.0  ;;  %v2819_v29 = vadd.f32 %v9704_v21, %v2679_v52  ;;  %7262 = vmatprep.subr.bf16.mxu1 %v8310_v14 }
 0x376   : > { %10944 = vst [vmem:[#allocation27_spill] sm:$0xff] %v9803_v31  ;;  %10945 = vst [vmem:[#allocation28_spill] sm:$0xff] %v9806_v19  ;;  %v9815_v41 = vmax.f32 %v2821_v6, 0.0  ;;  %v2884_v42 = vrot.slane %v9803_v31, 7  ;;  %v3430_v50 = vrot.slane %v9803_v31, 1 }
 0x377   : > { %10946 = vst [vmem:[#allocation29_spill] sm:$0xff] %v9810_v34  ;;  %v9818_v48 = vmax.f32 %v2819_v29, 0.0  ;;  %v2974_v49 = vpack.c.bf16 %v9812_v20, %v10828_v9  ;;  %v10757_v5 = vrot.slane %v9812_v20, 7  ;;  %v10755_v59 = vrot.slane %v9812_v20, 1 }
 0x378   : > { %10947 = vst [vmem:[#allocation30_spill] sm:$0xff] %v9815_v41  ;;  %v2885_v44 = vrot.slane %v9815_v41, 7  ;;  %v3431_v39 = vrot.slane %v9815_v41, 1  ;;  %7263 = vmatpush3.bf16.msra.mxu1 %v8310_v14 }
 0x379   : > { %10948 = vst [vmem:[#allocation31_spill] sm:$0xff] %v9818_v48  ;;  %v2883_v23 = vrot.slane %v9818_v48, 7  ;;  %v3429_v63 = vrot.slane %v9818_v48, 1  ;;  %v7190_v1 = vpop.f32.mrb[12].mxu0  ;;  %7232 = vmatprep.mubr.bf16.mxu1 %v2974_v49  ;;  %v9832_v11 = vpack.c.bf16 %v9803_v31, %v9818_v48  ;;  %7264 = vmatprep.subr.bf16.mxu1 %v8311_v60 }
 0x37a   : > { %v2824_v14 = vadd.f32 %v7190_v1, %v9704_v21  ;;  %v2692_v15 = vpop.f32.mrb[13].mxu0  ;;  %v9836_v25 = vpack.c.bf16 %v2885_v44, %v2884_v42  ;;  %v9857_v45 = vpack.c.bf16 %v3431_v39, %v3430_v50 }
 0x37b   : > { %10949 = vst [vmem:[#allocation32_spill] sm:$0xff] %v9832_v11  ;;  %v2822_v6 = vadd.f32 %v9704_v21, %v2692_v15  ;;  %v7191_v52 = vpop.f32.mrb[14].mxu0  ;;  %7233 = vmatmul.mubr.bf16.gmra.mrb[8].mxu1 %v9832_v11  ;;  %v9842_v29 = vpack.c.bf16 %v2884_v42, %v2883_v23  ;;  %v9844_v49 = vpack.c.bf16 %v3430_v50, %v3429_v63 }
 0x37c   : > { %v9848_v7 = vpack.c.bf16 %v2883_v23, %v10757_v5  ;;  %v9850_v1 = vmax.f32 %v2824_v14, 0.0  ;;  %v2825_v0 = vadd.f32 %v7191_v52, %v9704_v21  ;;  %v2695_v28 = vpop.f32.mrb[15].mxu0  ;;  %7265 = vmatpush3.bf16.msra.mxu1 %v8311_v60  ;;  %v9855_v15 = vpack.c.bf16 %v3429_v63, %v10755_v59  ;;  %10952 = vst [vmem:[#allocation35_spill] sm:$0xff] %v9857_v45  ;;  %v8314_v5 = vld [vmem:[#allocation7 + $0x38] sm:$0xff]  }
 0x37d   : > { %v9859_v42 = vmax.f32 %v2822_v6, 0.0  ;;  %v2823_v10 = vadd.f32 %v9704_v21, %v2695_v28  ;;  %7266 = vmatprep.subr.bf16.mxu1 %v8312_v55 }
 0x37e   : > { %10950 = vst [vmem:[#allocation33_spill] sm:$0xff] %v9850_v1  ;;  %10951 = vst [vmem:[#allocation34_spill] sm:$0xff] %v9855_v15  ;;  %v2888_v23 = vrot.slane %v9850_v1, 7  ;;  %v9863_v14 = vmax.f32 %v2825_v0, 0.0  ;;  %v3434_v63 = vrot.slane %v9850_v1, 1 }
 0x37f   : > { %10953 = vst [vmem:[#allocation37_spill] sm:$0xff] %v9859_v42  ;;  %v2886_v52 = vrot.slane %v9859_v42, 7  ;;  %v3432_v60 = vrot.slane %v9859_v42, 1  ;;  %v9867_v12 = vmax.f32 %v2823_v10, 0.0  ;;  %v9871_v50 = vpack.c.bf16 %v9859_v42, %v9815_v41 }
 0x380   : > { %10954 = vst [vmem:[#allocation38_spill] sm:$0xff] %v9863_v14  ;;  %7267 = vmatpush3.bf16.msra.mxu1 %v8312_v55  ;;  %v10958_v0 = vrot.slane %v9863_v14, 7 }
 0x381   : > { %10955 = vst [vmem:[#allocation39_spill] sm:$0xff] %v9867_v12  ;;  %10956 = vst [vmem:[#allocation40_spill] sm:$0xff] %v9871_v50  ;;  %v2887_v51 = vrot.slane %v9867_v12, 7  ;;  %v3433_v59 = vrot.slane %v9867_v12, 1  ;;  %v7194_v10 = vpop.f32.mrb[16].mxu0  ;;  %7236 = vmatprep.mubr.bf16.mxu1 %v9871_v50  ;;  %v9883_v40 = vpack.c.bf16 %v9850_v1, %v9867_v12  ;;  %7268 = vmatprep.subr.bf16.mxu1 %v8313_v53  ;;  %v10961_v50 = vrot.slane %v9863_v14, 1 }
 0x382   : > { %v9885_v33 = vpack.c.bf16 %v2886_v52, %v2885_v44  ;;  %v2828_v55 = vadd.f32 %v7194_v10, %v9704_v21  ;;  %v2708_v6 = vpop.f32.mrb[17].mxu0  ;;  %v9888_v28 = vpack.c.bf16 %v3432_v60, %v3431_v39  ;;  %v9892_v57 = vpack.c.bf16 %v10958_v0, %v2888_v23 }
 0x383   : > { %10957 = vst [vmem:[#allocation41_spill] sm:$0xff] %v9883_v40  ;;  %v2826_v11 = vadd.f32 %v9704_v21, %v2708_v6  ;;  %v7195_v18 = vpop.f32.mrb[18].mxu0  ;;  %7237 = vmatmul.mubr.bf16.gmra.mrb[12].mxu1 %v9883_v40  ;;  %v9898_v62 = vpack.c.bf16 %v2888_v23, %v2887_v51  ;;  %v9900_v44 = vpack.c.bf16 %v3434_v63, %v3433_v59  ;;  %v9916_v40 = vld [vmem:[#allocation7 + $0x80] sm:$0xff]  }
 0x384   : > { %v9902_v10 = vpack.c.bf16 %v2887_v51, %v2886_v52  ;;  %v9904_v39 = vmax.f32 %v2828_v55, 0.0  ;;  %v2829_v35 = vadd.f32 %v7195_v18, %v9704_v21  ;;  %v2711_v0 = vpop.f32.mrb[19].mxu0  ;;  %7269 = vmatpush3.bf16.msra.mxu1 %v8313_v53  ;;  %v9907_v36 = vpack.c.bf16 %v3433_v59, %v3432_v60 }
 0x385   : > { %v9911_v6 = vpack.c.bf16 %v10961_v50, %v3434_v63  ;;  %v9913_v45 = vmax.f32 %v2826_v11, 0.0  ;;  %v2827_v23 = vadd.f32 %v9704_v21, %v2711_v0  ;;  %7270 = vmatprep.subr.bf16.mxu1 %v8314_v5 }
 0x386   : > { %10959 = vst [vmem:[#allocation42_spill] sm:$0xff] %v9904_v39  ;;  %10960 = vst [vmem:[#allocation43_spill] sm:$0xff] %v9907_v36  ;;  %v9918_v51 = vmax.f32 %v2829_v35, 0.0  ;;  %v2892_v52 = vrot.slane %v9904_v39, 7  ;;  %v3438_v59 = vrot.slane %v9904_v39, 1 }
 0x387   : > { %10962 = vst [vmem:[#allocation44_spill] sm:$0xff] %v9911_v6  ;;  %v9921_v18 = vmax.f32 %v2827_v23, 0.0  ;;  %v2978_v53 = vpack.c.bf16 %v9913_v45, %v10828_v9  ;;  %v10966_v17 = vrot.slane %v9913_v45, 7  ;;  %v10968_v35 = vrot.slane %v9913_v45, 1 }
 0x388   : > { %10963 = vst [vmem:[#allocation45_spill] sm:$0xff] %v9918_v51  ;;  %v2893_v60 = vrot.slane %v9918_v51, 7  ;;  %v3439_v11 = vrot.slane %v9918_v51, 1  ;;  %7271 = vmatpush3.bf16.msra.mxu1 %v8314_v5 }
 0x389   : > { %10964 = vst [vmem:[#allocation46_spill] sm:$0xff] %v9921_v18  ;;  %v2891_v63 = vrot.slane %v9921_v18, 7  ;;  %v3437_v55 = vrot.slane %v9921_v18, 1  ;;  %v7198_v0 = vpop.f32.mrb[20].mxu0  ;;  %7240 = vmatprep.mubr.bf16.mxu1 %v2978_v53  ;;  %v9935_v23 = vpack.c.bf16 %v9904_v39, %v9921_v18  ;;  %7304 = vmatprep.subr.bf16.mxu1 %v9916_v40 }
 0x38a   : > { %v2832_v5 = vadd.f32 %v7198_v0, %v9704_v21  ;;  %v2724_v36 = vpop.f32.mrb[21].mxu0  ;;  %v9940_v50 = vpack.c.bf16 %v2893_v60, %v2892_v52 }
 0x38b   : > { %10965 = vst [vmem:[#allocation47_spill] sm:$0xff] %v9935_v23  ;;  %v2830_v15 = vadd.f32 %v9704_v21, %v2724_v36  ;;  %v7199_v34 = vpop.f32.mrb[22].mxu0  ;;  %7241 = vmatmul.mubr.bf16.gmra.mrb[16].mxu1 %v9935_v23  ;;  %v9946_v53 = vpack.c.bf16 %v2892_v52, %v2891_v63  ;;  %v9948_v19 = vpack.c.bf16 %v3438_v59, %v3437_v55 }
 0x38c   : > { %v9952_v6 = vpack.c.bf16 %v2891_v63, %v10966_v17  ;;  %v9954_v0 = vmax.f32 %v2832_v5, 0.0  ;;  %v2833_v56 = vadd.f32 %v7199_v34, %v9704_v21  ;;  %v2727_v39 = vpop.f32.mrb[23].mxu0  ;;  %v9959_v18 = vpack.c.bf16 %v3437_v55, %v10968_v35 }
 0x38d   : > { %v9961_v36 = vpack.c.bf16 %v3439_v11, %v3438_v59  ;;  %v9963_v23 = vmax.f32 %v2830_v15, 0.0  ;;  %v2831_v52 = vadd.f32 %v9704_v21, %v2727_v39 }
 0x38e   : > { %10967 = vst [vmem:[#allocation48_spill] sm:$0xff] %v9954_v0  ;;  %10969 = vst [vmem:[#allocation49_spill] sm:$0xff] %v9959_v18  ;;  %v2896_v1 = vrot.slane %v9954_v0, 7  ;;  %v9967_v14 = vmax.f32 %v2833_v56, 0.0  ;;  %v3442_v59 = vrot.slane %v9954_v0, 1 }
 0x38f   : > { %10970 = vst [vmem:[#allocation50_spill] sm:$0xff] %v9961_v36  ;;  %10971 = vst [vmem:[#allocation51_spill] sm:$0xff] %v9963_v23  ;;  %v2894_v17 = vrot.slane %v9963_v23, 7  ;;  %v3440_v63 = vrot.slane %v9963_v23, 1  ;;  %v9971_v34 = vmax.f32 %v2831_v52, 0.0  ;;  %v9975_v35 = vpack.c.bf16 %v9963_v23, %v9918_v51 }
 0x390   : > { %10972 = vst [vmem:[#allocation52_spill] sm:$0xff] %v9967_v14  ;;  %v10976_v56 = vrot.slane %v9967_v14, 7  ;;  %v10979_v12 = vrot.slane %v9967_v14, 1 }
 0x391   : > { %10973 = vst [vmem:[#allocation53_spill] sm:$0xff] %v9971_v34  ;;  %10974 = vst [vmem:[#allocation54_spill] sm:$0xff] %v9975_v35  ;;  %v2895_v55 = vrot.slane %v9971_v34, 7  ;;  %v3441_v5 = vrot.slane %v9971_v34, 1  ;;  %v7202_v36 = vpop.f32.mrb[24].mxu0  ;;  %7244 = vmatprep.mubr.bf16.mxu1 %v9975_v35  ;;  %v9987_v52 = vpack.c.bf16 %v9954_v0, %v9971_v34  ;;  %v9989_v18 = vpack.c.bf16 %v2894_v17, %v2893_v60 }
 0x392   : > { %v2836_v15 = vadd.f32 %v7202_v36, %v9704_v21  ;;  %v2740_v51 = vpop.f32.mrb[25].mxu0  ;;  %v9992_v39 = vpack.c.bf16 %v3440_v63, %v3439_v11  ;;  %v9996_v42 = vpack.c.bf16 %v10976_v56, %v2896_v1  ;;  %v10015_v23 = vpack.c.bf16 %v10979_v12, %v3442_v59 }
 0x393   : > { %10975 = vst [vmem:[#allocation55_spill] sm:$0xff] %v9987_v52  ;;  %v2834_v35 = vadd.f32 %v9704_v21, %v2740_v51  ;;  %v7203_v31 = vpop.f32.mrb[26].mxu0  ;;  %7245 = vmatmul.mubr.bf16.gmra.mrb[20].mxu1 %v9987_v52  ;;  %v10002_v0 = vpack.c.bf16 %v2896_v1, %v2895_v55  ;;  %v10004_v60 = vpack.c.bf16 %v3442_v59, %v3441_v5 }
 0x394   : > { %v10006_v36 = vpack.c.bf16 %v2895_v55, %v2894_v17  ;;  %v10008_v11 = vmax.f32 %v2836_v15, 0.0  ;;  %v2837_v41 = vadd.f32 %v7203_v31, %v9704_v21  ;;  %v2743_v56 = vpop.f32.mrb[27].mxu0  ;;  %v10011_v48 = vpack.c.bf16 %v3441_v5, %v3440_v63  ;;  %10980 = vst [vmem:[#allocation58_spill] sm:$0xff] %v10015_v23 }
 0x395   : > { %v10017_v51 = vmax.f32 %v2834_v35, 0.0  ;;  %v2835_v1 = vadd.f32 %v9704_v21, %v2743_v56 }
 0x396   : > { %10977 = vst [vmem:[#allocation56_spill] sm:$0xff] %v10008_v11  ;;  %10978 = vst [vmem:[#allocation57_spill] sm:$0xff] %v10011_v48  ;;  %v10020_v52 = vmax.f32 %v2837_v41, 0.0  ;;  %v2900_v17 = vrot.slane %v10008_v11, 7  ;;  %v3446_v63 = vrot.slane %v10008_v11, 1 }
 0x397   : > { %v10023_v55 = vmax.f32 %v2835_v1, 0.0  ;;  %v2982_v31 = vpack.c.bf16 %v10017_v51, %v10828_v9  ;;  %v10987_v35 = vrot.slane %v10017_v51, 1 }
 0x398   : > { %10981 = vst [vmem:[#allocation59_spill] sm:$0xff] %v10020_v52  ;;  %v2901_v15 = vrot.slane %v10020_v52, 7  ;;  %v3447_v12 = vrot.slane %v10020_v52, 1 }
 0x399   : > { %10982 = vst [vmem:[#allocation60_spill] sm:$0xff] %v10023_v55  ;;  %v2899_v41 = vrot.slane %v10023_v55, 7  ;;  %v3445_v5 = vrot.slane %v10023_v55, 1  ;;  %v7206_v56 = vpop.f32.mrb[28].mxu0  ;;  %7248 = vmatprep.mubr.bf16.mxu1 %v2982_v31  ;;  %v10037_v1 = vpack.c.bf16 %v10008_v11, %v10023_v55  ;;  %v10985_v11 = vrot.slane %v10017_v51, 7 }
 0x39a   : > { %v2840_v48 = vadd.f32 %v7206_v56, %v9704_v21  ;;  %v2756_v14 = vpop.f32.mrb[29].mxu0  ;;  %v10041_v34 = vpack.c.bf16 %v2901_v15, %v2900_v17 }
 0x39b   : > { %10983 = vst [vmem:[#allocation61_spill] sm:$0xff] %v10037_v1  ;;  %v2838_v59 = vadd.f32 %v9704_v21, %v2756_v14  ;;  %v7207_v16 = vpop.f32.mrb[30].mxu0  ;;  %7249 = vmatmul.mubr.bf16.gmra.mrb[24].mxu1 %v10037_v1  ;;  %v10047_v31 = vpack.c.bf16 %v2900_v17, %v2899_v41  ;;  %v10049_v24 = vpack.c.bf16 %v3446_v63, %v3445_v5 }
 0x39c   : > { %10984 = vst [vmem:[#allocation62_spill] sm:$0xff] %v10041_v34  ;;  %v10053_v23 = vpack.c.bf16 %v2899_v41, %v10985_v11  ;;  %v10055_v56 = vmax.f32 %v2840_v48, 0.0  ;;  %v2841_v22 = vadd.f32 %v7207_v16, %v9704_v21  ;;  %v2759_v2 = vpop.f32.mrb[31].mxu0  ;;  %v10060_v55 = vpack.c.bf16 %v3445_v5, %v10987_v35  ;;  %v8324_v34 = vld [vmem:[#allocation7 + $0xc8] sm:$0xff]  }
 0x39d   : > { %v10062_v14 = vpack.c.bf16 %v3447_v12, %v3446_v63  ;;  %v10064_v1 = vmax.f32 %v2838_v59, 0.0  ;;  %v2839_v17 = vadd.f32 %v9704_v21, %v2759_v2  ;;  %v10990_v48 = vrot.slane %v9711_v30, 7 }
 0x39e   : > { %10986 = vst [vmem:[#allocation63_spill] sm:$0xff] %v10055_v56  ;;  %10988 = vst [vmem:[#allocation64_spill] sm:$0xff] %v10060_v55  ;;  %v2904_v38 = vrot.slane %v10055_v56, 7  ;;  %v10068_v27 = vmax.f32 %v2841_v22, 0.0  ;;  %v3450_v21 = vrot.slane %v10055_v56, 1 }
 0x39f   : > { %10989 = vst [vmem:[#allocation65_spill] sm:$0xff] %v10062_v14  ;;  %v5992_v11 = vpack.c.bf16 %v10990_v48, %v10828_v9  ;;  %v2902_v16 = vrot.slane %v10064_v1, 7  ;;  %v3448_v41 = vrot.slane %v10064_v1, 1  ;;  %v10075_v35 = vmax.f32 %v2839_v17, 0.0 }
 0x3a0   : > { %v10079_v63 = vpack.c.bf16 %v10064_v1, %v10020_v52  ;;  %v10802_v2 = vrot.slane %v10068_v27, 7  ;;  %v10992_v52 = vrot.slane %v10068_v27, 1 }
 0x3a1   : > { %v2903_v5 = vrot.slane %v10075_v35, 7  ;;  %v3449_v48 = vrot.slane %v10075_v35, 1  ;;  %v10091_v17 = vpack.c.bf16 %v10055_v56, %v10075_v35  ;;  %v10093_v14 = vpack.c.bf16 %v2902_v16, %v2901_v15 }
 0x3a2   : > { %10991 = vst [vmem:[#allocation66_spill] sm:$0xff] %v10079_v63  ;;  %7252 = vmatprep.mubr.bf16.mxu1 %v10079_v63  ;;  %v10095_v55 = vpack.c.bf16 %v3448_v41, %v3447_v12  ;;  %v10099_v22 = vpack.c.bf16 %v10802_v2, %v2904_v38  ;;  %v4044_v59 = vpack.c.bf16 %v10075_v35, %v10064_v1  ;;  %v8316_v2 = vld [vmem:[#allocation7 + $0x88] sm:$0xff]   ;;  %v8349_v1 = vld [vmem:[#allocation7 + $0x190] sm:$0xff]   ;;  %v8350_v35 = vld [vmem:[#allocation7 + $0x198] sm:$0xff]  }
 0x3a3   : > { %v10105_v61 = vpack.c.bf16 %v10992_v52, %v3450_v21  ;;  %7253 = vmatmul.mubr.bf16.gmra.mrb[28].mxu1 %v10091_v17  ;;  %v10108_v63 = vpack.c.bf16 %v2904_v38, %v2903_v5  ;;  %v10110_v56 = vpack.c.bf16 %v3450_v21, %v3449_v48  ;;  %v10112_v15 = vpack.c.bf16 %v2903_v5, %v2902_v16  ;;  %v8317_v38 = vld [vmem:[#allocation7 + $0x90] sm:$0xff]   ;;  %v8318_v52 = vld [vmem:[#allocation7 + $0x98] sm:$0xff]  }
 0x3a4   : > { %v10114_v12 = vpack.c.bf16 %v3449_v48, %v3448_v41  ;;  %7272 = vmatprep.mubr.msk.bf16.mxu1 %vm8972_vm2, %v5992_v11  ;;  %v10994_v16 = vrot.slane %v9812_v20, 7  ;;  %v8319_v41 = vld [vmem:[#allocation7 + $0xa0] sm:$0xff]   ;;  %v8321_v21 = vld [vmem:[#allocation7 + $0xb0] sm:$0xff]   ;;  %v10995_v5 = vrot.slane %v9913_v45, 7 }
 0x3a6   : > { %v6004_v11 = vpack.c.bf16 %v10994_v16, %v10828_v9  ;;  %v6016_v48 = vpack.c.bf16 %v10995_v5, %v10828_v9  ;;  %v10999_v5 = vrot.slane %v9812_v20, 1 }
 0x3ab   : > { %7273 = vmatmul.mubr.msk.bf16.vlgmr.msra.gmra.mrb[0].mxu1 %vm8992_vm3, %v9739_v54 }
 0x3ac   : > { %7276 = vmatprep.mubr.msk.bf16.mxu1 %vm8992_vm3, %v9784_v43  ;;  %7305 = vmatpush3.bf16.msra.mxu1 %v9916_v40  ;;  %v8320_v40 = vld [vmem:[#allocation7 + $0xa8] sm:$0xff]  }
 0x3ad   : > { %7306 = vmatprep.subr.bf16.mxu1 %v8316_v2 }
 0x3b0   : > { %7307 = vmatpush3.bf16.msra.mxu1 %v8316_v2  ;;  %v8322_v2 = vld [vmem:[#allocation7 + $0xb8] sm:$0xff]  }
 0x3b1   : > { %7308 = vmatprep.subr.bf16.mxu1 %v8317_v38 }
 0x3b3   : > { %7277 = vmatmul.mubr.msk.bf16.gmra.mrb[4].mxu1 %vm8992_vm3, %v9797_v32 }
 0x3b4   : > { %7280 = vmatprep.mubr.msk.bf16.mxu1 %vm8972_vm2, %v6004_v11  ;;  %7309 = vmatpush3.bf16.msra.mxu1 %v8317_v38  ;;  %v8323_v38 = vld [vmem:[#allocation7 + $0xc0] sm:$0xff]   ;;  %v10997_v11 = vrot.slane %v9711_v30, 1 }
 0x3b5   : > { %7310 = vmatprep.subr.bf16.mxu1 %v8318_v52 }
 0x3b8   : > { %7311 = vmatpush3.bf16.msra.mxu1 %v8318_v52  ;;  %v10996_v52 = vrot.slane %v10017_v51, 7 }
 0x3b9   : > { %7312 = vmatprep.subr.bf16.mxu1 %v8319_v41 }
 0x3ba   : > { %v6028_v16 = vpack.c.bf16 %v10996_v52, %v10828_v9  ;;  %v8327_v52 = vld [vmem:[#allocation7 + $0xe0] sm:$0xff]  }
 0x3bb   : > { %7281 = vmatmul.mubr.msk.bf16.gmra.mrb[8].mxu1 %vm8992_vm3, %v9842_v29 }
 0x3bc   : > { %7284 = vmatprep.mubr.msk.bf16.mxu1 %vm8992_vm3, %v9885_v33  ;;  %7313 = vmatpush3.bf16.msra.mxu1 %v8319_v41  ;;  %v6048_v41 = vpack.c.bf16 %v10997_v11, %v10828_v9  ;;  %v8330_v11 = vld [vmem:[#allocation7 + $0xf8] sm:$0xff]  }
 0x3bd   : > { %7314 = vmatprep.subr.bf16.mxu1 %v8320_v40 }
 0x3c0   : > { %7315 = vmatpush3.bf16.msra.mxu1 %v8320_v40  ;;  %v8333_v40 = vld [vmem:[#allocation7 + $0x110] sm:$0xff]  }
 0x3c1   : > { %7316 = vmatprep.subr.bf16.mxu1 %v8321_v21 }
 0x3c3   : > { %7285 = vmatmul.mubr.msk.bf16.gmra.mrb[12].mxu1 %vm8992_vm3, %v9898_v62 }
 0x3c4   : > { %7288 = vmatprep.mubr.msk.bf16.mxu1 %vm8972_vm2, %v6016_v48  ;;  %7317 = vmatpush3.bf16.msra.mxu1 %v8321_v21  ;;  %v8325_v21 = vld [vmem:[#allocation7 + $0xd0] sm:$0xff]   ;;  %v6060_v48 = vpack.c.bf16 %v10999_v5, %v10828_v9 }
 0x3c5   : > { %7318 = vmatprep.subr.bf16.mxu1 %v8322_v2 }
 0x3c8   : > { %7319 = vmatpush3.bf16.msra.mxu1 %v8322_v2  ;;  %v8326_v2 = vld [vmem:[#allocation7 + $0xd8] sm:$0xff]  }
 0x3c9   : > { %7352 = vmatprep.subr.bf16.mxu1 %v8323_v38 }
 0x3cb   : > { %7289 = vmatmul.mubr.msk.bf16.gmra.mrb[16].mxu1 %vm8992_vm3, %v9946_v53 }
 0x3cc   : > { %7292 = vmatprep.mubr.msk.bf16.mxu1 %vm8992_vm3, %v9989_v18 }
 0x3d3   : > { %7293 = vmatmul.mubr.msk.bf16.gmra.mrb[20].mxu1 %vm8992_vm3, %v10002_v0 }
 0x3d4   : > { %7296 = vmatprep.mubr.msk.bf16.mxu1 %vm8972_vm2, %v6028_v16  ;;  %v8329_v16 = vld [vmem:[#allocation7 + $0xf0] sm:$0xff]  }
 0x3db   : > { %7297 = vmatmul.mubr.msk.bf16.gmra.mrb[24].mxu1 %vm8992_vm3, %v10047_v31 }
 0x3dc   : > { %7300 = vmatprep.mubr.msk.bf16.mxu1 %vm8992_vm3, %v10093_v14 }
 0x3e3   : > { %7301 = vmatmul.mubr.msk.bf16.gmra.mrb[28].mxu1 %vm8992_vm3, %v10108_v63 }
 0x3e4   : > { %7320 = vmatprep.mubr.msk.bf16.mxu1 %vm9153_vm5, %v6048_v41  ;;  %v11000_v41 = vrot.slane %v9913_v45, 1 }
 0x3eb   : > { %7321 = vmatmul.mubr.msk.bf16.vlgmr.msra.gmra.mrb[0].mxu1 %vm9173_vm6, %v9741_v8 }
 0x3ec   : > { %7324 = vmatprep.mubr.msk.bf16.mxu1 %vm9173_vm6, %v9787_v58  ;;  %7353 = vmatpush3.bf16.msra.mxu1 %v8323_v38  ;;  %v8328_v38 = vld [vmem:[#allocation7 + $0xe8] sm:$0xff]  }
 0x3ed   : > { %7354 = vmatprep.subr.bf16.mxu1 %v8324_v34 }
 0x3f0   : > { %7355 = vmatpush3.bf16.msra.mxu1 %v8324_v34  ;;  %v6072_v34 = vpack.c.bf16 %v11000_v41, %v10828_v9  ;;  %v11012_v41 = vld [vmem:[#allocation18_spill] sm:$0xff] }
 0x3f1   : > { %7356 = vmatprep.subr.bf16.mxu1 %v8325_v21 }
 0x3f3   : > { %7325 = vmatmul.mubr.msk.bf16.gmra.mrb[4].mxu1 %vm9173_vm6, %v9799_v46 }
 0x3f4   : > { %7328 = vmatprep.mubr.msk.bf16.mxu1 %vm9153_vm5, %v6060_v48  ;;  %7357 = vmatpush3.bf16.msra.mxu1 %v8325_v21  ;;  %v8331_v21 = vld [vmem:[#allocation7 + $0x100] sm:$0xff]   ;;  %v8332_v48 = vld [vmem:[#allocation7 + $0x108] sm:$0xff]  }
 0x3f5   : > { %7358 = vmatprep.subr.bf16.mxu1 %v8326_v2 }
 0x3f8   : > { %7359 = vmatpush3.bf16.msra.mxu1 %v8326_v2  ;;  %v11001_v2 = vrot.slane %v10017_v51, 1 }
 0x3f9   : > { %7360 = vmatprep.subr.bf16.mxu1 %v8327_v52 }
 0x3fa   : > { %v6084_v5 = vpack.c.bf16 %v11001_v2, %v10828_v9  ;;  %v8343_v2 = vld [vmem:[#allocation7 + $0x160] sm:$0xff]  }
 0x3fb   : > { %7329 = vmatmul.mubr.msk.bf16.gmra.mrb[8].mxu1 %vm9173_vm6, %v9844_v49 }
 0x3fc   : > { %7332 = vmatprep.mubr.msk.bf16.mxu1 %vm9173_vm6, %v9888_v28  ;;  %7361 = vmatpush3.bf16.msra.mxu1 %v8327_v52  ;;  %v8334_v52 = vld [vmem:[#allocation7 + $0x118] sm:$0xff]  }
 0x3fd   : > { %7362 = vmatprep.subr.bf16.mxu1 %v8328_v38 }
 0x400   : > { %7363 = vmatpush3.bf16.msra.mxu1 %v8328_v38  ;;  %v11009_v38 = vld [vmem:[#allocation21_spill] sm:$0xff] }
 0x401   : > { %7364 = vmatprep.subr.bf16.mxu1 %v8329_v16 }
 0x403   : > { %7333 = vmatmul.mubr.msk.bf16.gmra.mrb[12].mxu1 %vm9173_vm6, %v9900_v44 }
 0x404   : > { %7336 = vmatprep.mubr.msk.bf16.mxu1 %vm9153_vm5, %v6072_v34  ;;  %7365 = vmatpush3.bf16.msra.mxu1 %v8329_v16 }
 0x405   : > { %7366 = vmatprep.subr.bf16.mxu1 %v8330_v11 }
 0x408   : > { %7367 = vmatpush3.bf16.msra.mxu1 %v8330_v11  ;;  %v8342_v11 = vld [vmem:[#allocation7 + $0x158] sm:$0xff]  }
 0x409   : > { %7400 = vmatprep.subr.bf16.mxu1 %v8331_v21 }
 0x40b   : > { %7337 = vmatmul.mubr.msk.bf16.gmra.mrb[16].mxu1 %vm9173_vm6, %v9948_v19 }
 0x40c   : > { %7340 = vmatprep.mubr.msk.bf16.mxu1 %vm9173_vm6, %v9992_v39 }
 0x413   : > { %7341 = vmatmul.mubr.msk.bf16.gmra.mrb[20].mxu1 %vm9173_vm6, %v10004_v60 }
 0x414   : > { %7344 = vmatprep.mubr.msk.bf16.mxu1 %vm9153_vm5, %v6084_v5  ;;  %v8344_v5 = vld [vmem:[#allocation7 + $0x168] sm:$0xff]  }
 0x41b   : > { %7345 = vmatmul.mubr.msk.bf16.gmra.mrb[24].mxu1 %vm9173_vm6, %v10049_v24 }
 0x41c   : > { %7348 = vmatprep.mubr.msk.bf16.mxu1 %vm9173_vm6, %v10095_v55 }
 0x423   : > { %7349 = vmatmul.mubr.msk.bf16.gmra.mrb[28].mxu1 %vm9173_vm6, %v10110_v56 }
 0x424   : > { %7368 = vmatprep.mubr.msk.bf16.mxu1 %vm8992_vm3, %v9747_v4  ;;  %v8336_v4 = vld [vmem:[#allocation7 + $0x128] sm:$0xff]  }
 0x42b   : > { %7369 = vmatmul.mubr.msk.bf16.vlgmr.msra.gmra.mrb[0].mxu1 %vm8992_vm3, %v9734_v37  ;;  %v8335_v37 = vld [vmem:[#allocation7 + $0x120] sm:$0xff]  }
 0x42c   : > { %7372 = vmatprep.mubr.msk.bf16.mxu1 %vm8992_vm3, %v9801_v47  ;;  %7401 = vmatpush3.bf16.msra.mxu1 %v8331_v21  ;;  %v8339_v47 = vld [vmem:[#allocation7 + $0x140] sm:$0xff]  }
 0x42d   : > { %7402 = vmatprep.subr.bf16.mxu1 %v8332_v48 }
 0x430   : > { %7403 = vmatpush3.bf16.msra.mxu1 %v8332_v48  ;;  %v11016_v48 = vld [vmem:[#allocation30_spill] sm:$0xff] }
 0x431   : > { %7404 = vmatprep.subr.bf16.mxu1 %v8333_v40 }
 0x433   : > { %7373 = vmatmul.mubr.msk.bf16.gmra.mrb[4].mxu1 %vm8992_vm3, %v9791_v13  ;;  %v8337_v13 = vld [vmem:[#allocation7 + $0x130] sm:$0xff]  }
 0x434   : > { %7376 = vmatprep.mubr.msk.bf16.mxu1 %vm8992_vm3, %v9848_v7  ;;  %7405 = vmatpush3.bf16.msra.mxu1 %v8333_v40  ;;  %v8338_v7 = vld [vmem:[#allocation7 + $0x138] sm:$0xff]  }
 0x435   : > { %7406 = vmatprep.subr.bf16.mxu1 %v8334_v52  ;;  %v11017_v40 = vld [vmem:[#allocation27_spill] sm:$0xff] }
 0x438   : > { %7407 = vmatpush3.bf16.msra.mxu1 %v8334_v52  ;;  %v11018_v52 = vpack.c.bf16 %v11016_v48, %v11017_v40  ;;  %v11041_v48 = vld [vmem:[#allocation63_spill] sm:$0xff] }
 0x439   : > { %7408 = vmatprep.subr.bf16.mxu1 %v8335_v37  ;;  %v11042_v40 = vpack.c.bf16 %v10068_v27, %v11041_v48 }
 0x43b   : > { %7377 = vmatmul.mubr.msk.bf16.gmra.mrb[8].mxu1 %vm8992_vm3, %v9836_v25  ;;  %v11003_v25 = vld [vmem:[#allocation15_spill] sm:$0xff] }
 0x43c   : > { %7380 = vmatprep.mubr.msk.bf16.mxu1 %vm8992_vm3, %v9902_v10  ;;  %7409 = vmatpush3.bf16.msra.mxu1 %v8335_v37  ;;  %v11004_v10 = vpack.c.bf16 %v11003_v25, %v9711_v30  ;;  %v11014_v30 = vld [vmem:[#allocation31_spill] sm:$0xff] }
 0x43d   : > { %7410 = vmatprep.subr.bf16.mxu1 %v8336_v4  ;;  %v11015_v21 = vpack.c.bf16 %v11014_v30, %v9812_v20  ;;  %v11019_v37 = vld [vmem:[#allocation39_spill] sm:$0xff]  ;;  %v11036_v30 = vld [vmem:[#allocation60_spill] sm:$0xff] }
 0x43e   : > { %v8346_v20 = vld [vmem:[#allocation7 + $0x178] sm:$0xff]  }
 0x440   : > { %7411 = vmatpush3.bf16.msra.mxu1 %v8336_v4  ;;  %v11020_v4 = vld [vmem:[#allocation37_spill] sm:$0xff] }
 0x441   : > { %7412 = vmatprep.subr.bf16.mxu1 %v8337_v13 }
 0x443   : > { %7381 = vmatmul.mubr.msk.bf16.gmra.mrb[12].mxu1 %vm8992_vm3, %v9892_v57  ;;  %v11002_v57 = vld [vmem:[#allocation62_spill] sm:$0xff] }
 0x444   : > { %7384 = vmatprep.mubr.msk.bf16.mxu1 %vm8992_vm3, %v9952_v6  ;;  %7413 = vmatpush3.bf16.msra.mxu1 %v8337_v13  ;;  %v11005_v6 = vld [vmem:[#allocation14_spill] sm:$0xff]  ;;  %v11021_v13 = vpack.c.bf16 %v11019_v37, %v11020_v4  ;;  %v8348_v37 = vld [vmem:[#allocation7 + $0x188] sm:$0xff]  }
 0x445   : > { %7414 = vmatprep.subr.bf16.mxu1 %v8338_v7  ;;  %v11044_v4 = vld [vmem:[#allocation17_spill] sm:$0xff] }
 0x448   : > { %7415 = vmatpush3.bf16.msra.mxu1 %v8338_v7  ;;  %v8345_v7 = vld [vmem:[#allocation7 + $0x170] sm:$0xff]  }
 0x449   : > { %7448 = vmatprep.subr.bf16.mxu1 %v8339_v47 }
 0x44b   : > { %7385 = vmatmul.mubr.msk.bf16.gmra.mrb[16].mxu1 %vm8992_vm3, %v9940_v50  ;;  %v11006_v50 = vld [vmem:[#allocation13_spill] sm:$0xff] }
 0x44c   : > { %7388 = vmatprep.mubr.msk.bf16.mxu1 %vm8992_vm3, %v10006_v36  ;;  %v11008_v36 = vld [vmem:[#allocation25_spill] sm:$0xff] }
 0x44d   : > { %v11010_v16 = vpack.c.bf16 %v11008_v36, %v11009_v38  ;;  %v11030_v38 = vld [vmem:[#allocation53_spill] sm:$0xff] }
 0x453   : > { %7389 = vmatmul.mubr.msk.bf16.gmra.mrb[20].mxu1 %vm8992_vm3, %v9996_v42  ;;  %v8340_v42 = vld [vmem:[#allocation7 + $0x148] sm:$0xff]  }
 0x454   : > { %7392 = vmatprep.mubr.msk.bf16.mxu1 %vm8992_vm3, %v10053_v23  ;;  %v11007_v23 = vpack.c.bf16 %v11005_v6, %v11006_v50  ;;  %v8347_v6 = vld [vmem:[#allocation7 + $0x180] sm:$0xff]   ;;  %v11027_v50 = vld [vmem:[#allocation45_spill] sm:$0xff] }
 0x45b   : > { %7393 = vmatmul.mubr.msk.bf16.gmra.mrb[24].mxu1 %vm8992_vm3, %v11002_v57  ;;  %v11023_v57 = vld [vmem:[#allocation33_spill] sm:$0xff] }
 0x45c   : > { %7396 = vmatprep.mubr.msk.bf16.mxu1 %vm8992_vm3, %v10112_v15  ;;  %v8341_v15 = vld [vmem:[#allocation7 + $0x150] sm:$0xff]  }
 0x463   : > { %7397 = vmatmul.mubr.msk.bf16.gmra.mrb[28].mxu1 %vm8992_vm3, %v10099_v22  ;;  %v11011_v22 = vld [vmem:[#allocation24_spill] sm:$0xff] }
 0x464   : > { %7416 = vmatprep.mubr.bf16.mxu1 %v11004_v10  ;;  %v11013_v34 = vpack.c.bf16 %v11011_v22, %v11012_v41  ;;  %v11025_v10 = vld [vmem:[#allocation46_spill] sm:$0xff]  ;;  %v11034_v41 = vld [vmem:[#allocation48_spill] sm:$0xff]  ;;  %v4837_v26 = vpack.c.bf16 %v10828_v9, %v11011_v22 }
 0x46b   : > { %7417 = vmatmul.mubr.bf16.vlgmr.msra.gmra.mrb[0].mxu1 %v11007_v23  ;;  %v11028_v23 = vld [vmem:[#allocation42_spill] sm:$0xff] }
 0x46c   : > { %7420 = vmatprep.mubr.bf16.mxu1 %v11010_v16  ;;  %7449 = vmatpush3.bf16.msra.mxu1 %v8339_v47  ;;  %v11022_v47 = vld [vmem:[#allocation38_spill] sm:$0xff]  ;;  %v11029_v36 = vpack.c.bf16 %v11027_v50, %v11028_v23  ;;  %v11031_v16 = vld [vmem:[#allocation51_spill] sm:$0xff]  ;;  %v11051_v50 = vld [vmem:[#allocation49_spill] sm:$0xff] }
 0x46d   : > { %7450 = vmatprep.subr.bf16.mxu1 %v8340_v42  ;;  %v11024_v25 = vpack.c.bf16 %v11022_v47, %v11023_v57  ;;  %v11048_v57 = vld [vmem:[#allocation35_spill] sm:$0xff]  ;;  %v8355_v23 = vld [vmem:[#allocation7 + $0x1c0] sm:$0xff]  }
 0x470   : > { %7451 = vmatpush3.bf16.msra.mxu1 %v8340_v42  ;;  %v11026_v42 = vpack.c.bf16 %v11025_v10, %v9913_v45  ;;  %v11037_v45 = vpack.c.bf16 %v11036_v30, %v10017_v51  ;;  %v11045_v51 = vld [vmem:[#allocation28_spill] sm:$0xff]  ;;  %v8353_v10 = vld [vmem:[#allocation7 + $0x1b0] sm:$0xff]   ;;  %v11057_v30 = vrot.slane %v11011_v22, 7 }
 0x471   : > { %7452 = vmatprep.subr.bf16.mxu1 %v8341_v15 }
 0x473   : > { %7421 = vmatmul.mubr.bf16.gmra.mrb[4].mxu1 %v11013_v34 }
 0x474   : > { %7424 = vmatprep.mubr.bf16.mxu1 %v11015_v21  ;;  %7453 = vmatpush3.bf16.msra.mxu1 %v8341_v15  ;;  %v11032_v15 = vpack.c.bf16 %v11030_v38, %v11031_v16  ;;  %v11038_v21 = vld [vmem:[#allocation59_spill] sm:$0xff]  ;;  %v11053_v38 = vld [vmem:[#allocation57_spill] sm:$0xff]  ;;  %v11054_v16 = vld [vmem:[#allocation58_spill] sm:$0xff] }
 0x475   : > { %7454 = vmatprep.subr.bf16.mxu1 %v8342_v11 }
 0x478   : > { %7455 = vmatpush3.bf16.msra.mxu1 %v8342_v11  ;;  %v11033_v11 = vld [vmem:[#allocation52_spill] sm:$0xff] }
 0x479   : > { %7456 = vmatprep.subr.bf16.mxu1 %v8343_v2  ;;  %v11035_v34 = vpack.c.bf16 %v11033_v11, %v11034_v41  ;;  %v11056_v41 = vld [vmem:[#allocation65_spill] sm:$0xff] }
 0x47b   : > { %7425 = vmatmul.mubr.bf16.gmra.mrb[8].mxu1 %v11018_v52  ;;  %v11043_v52 = vld [vmem:[#allocation19_spill] sm:$0xff] }
 0x47c   : > { %7428 = vmatprep.mubr.bf16.mxu1 %v11021_v13  ;;  %7457 = vmatpush3.bf16.msra.mxu1 %v8343_v2  ;;  %v11039_v2 = vld [vmem:[#allocation56_spill] sm:$0xff]  ;;  %v11047_v13 = vld [vmem:[#allocation34_spill] sm:$0xff] }
 0x47d   : > { %7458 = vmatprep.subr.bf16.mxu1 %v8344_v5 }
 0x480   : > { %7459 = vmatpush3.bf16.msra.mxu1 %v8344_v5  ;;  %v11040_v5 = vpack.c.bf16 %v11038_v21, %v11039_v2  ;;  %v8361_v21 = vld [vmem:[#allocation7 + $0x1f0] sm:$0xff]  }
 0x481   : > { %7460 = vmatprep.subr.bf16.mxu1 %v8345_v7 }
 0x483   : > { %7429 = vmatmul.mubr.bf16.gmra.mrb[12].mxu1 %v11024_v25  ;;  %v11049_v25 = vld [vmem:[#allocation43_spill] sm:$0xff] }
 0x484   : > { %7432 = vmatprep.mubr.bf16.mxu1 %v11026_v42  ;;  %7461 = vmatpush3.bf16.msra.mxu1 %v8345_v7  ;;  %v8351_v7 = vld [vmem:[#allocation7 + $0x1a0] sm:$0xff]   ;;  %v8354_v42 = vld [vmem:[#allocation7 + $0x1b8] sm:$0xff]  }
 0x485   : > { %7462 = vmatprep.subr.bf16.mxu1 %v8346_v20 }
 0x488   : > { %7463 = vmatpush3.bf16.msra.mxu1 %v8346_v20  ;;  %v8352_v20 = vld [vmem:[#allocation7 + $0x1a8] sm:$0xff]  }
 0x489   : > { %7496 = vmatprep.subr.bf16.mxu1 %v8347_v6 }
 0x48b   : > { %7433 = vmatmul.mubr.bf16.gmra.mrb[16].mxu1 %v11029_v36  ;;  %v11052_v36 = vld [vmem:[#allocation50_spill] sm:$0xff] }
 0x48c   : > { %7436 = vmatprep.mubr.bf16.mxu1 %v11032_v15  ;;  %v11055_v15 = vld [vmem:[#allocation64_spill] sm:$0xff] }
 0x493   : > { %7437 = vmatmul.mubr.bf16.gmra.mrb[20].mxu1 %v11035_v34  ;;  %v8356_v34 = vld [vmem:[#allocation7 + $0x1c8] sm:$0xff]  }
 0x494   : > { %7440 = vmatprep.mubr.bf16.mxu1 %v11037_v45  ;;  %v8358_v45 = vld [vmem:[#allocation7 + $0x1d8] sm:$0xff]  }
 0x49b   : > { %7441 = vmatmul.mubr.bf16.gmra.mrb[24].mxu1 %v11040_v5  ;;  %v8362_v5 = vld [vmem:[#allocation7 + $0x1f8] sm:$0xff]  }
 0x49c   : > { %7444 = vmatprep.mubr.bf16.mxu1 %v4044_v59  ;;  %v11046_v59 = vld [vmem:[#allocation29_spill] sm:$0xff] }
 0x4a3   : > { %7445 = vmatmul.mubr.bf16.gmra.mrb[28].mxu1 %v11042_v40  ;;  %v8364_v40 = vld [vmem:[#allocation7 + $0x208] sm:$0xff]  }
 0x4a4   : > { %7464 = vmatprep.mubr.msk.bf16.mxu1 %vm9173_vm6, %v11043_v52  ;;  %v11063_v52 = vld [vmem:[#allocation26_spill] sm:$0xff] }
 0x4ab   : > { %7465 = vmatmul.mubr.msk.bf16.vlgmr.msra.gmra.mrb[0].mxu1 %vm9173_vm6, %v11044_v4  ;;  %v8367_v4 = vld [vmem:[#allocation7 + $0x220] sm:$0xff]  }
 0x4ac   : > { %7468 = vmatprep.mubr.msk.bf16.mxu1 %vm9173_vm6, %v11045_v51  ;;  %7497 = vmatpush3.bf16.msra.mxu1 %v8347_v6  ;;  %v11050_v6 = vld [vmem:[#allocation44_spill] sm:$0xff]  ;;  %v8368_v51 = vld [vmem:[#allocation7 + $0x228] sm:$0xff]  }
 0x4ad   : > { %7498 = vmatprep.subr.bf16.mxu1 %v8348_v37 }
 0x4b0   : > { %7499 = vmatpush3.bf16.msra.mxu1 %v8348_v37  ;;  %v11065_v37 = vld [vmem:[#allocation32_spill] sm:$0xff] }
 0x4b1   : > { %7500 = vmatprep.subr.bf16.mxu1 %v8349_v1 }
 0x4b3   : > { %7469 = vmatmul.mubr.msk.bf16.gmra.mrb[4].mxu1 %vm9173_vm6, %v11046_v59  ;;  %v8369_v59 = vld [vmem:[#allocation7 + $0x230] sm:$0xff]  }
 0x4b4   : > { %7472 = vmatprep.mubr.msk.bf16.mxu1 %vm9173_vm6, %v11047_v13  ;;  %7501 = vmatpush3.bf16.msra.mxu1 %v8349_v1  ;;  %v11066_v1 = vld [vmem:[#allocation40_spill] sm:$0xff]  ;;  %v4838_v13 = vpack.c.bf16 %v10828_v9, %v11022_v47 }
 0x4b5   : > { %7502 = vmatprep.subr.bf16.mxu1 %v8350_v35 }
 0x4b8   : > { %7503 = vmatpush3.bf16.msra.mxu1 %v8350_v35  ;;  %v11067_v35 = vld [vmem:[#allocation41_spill] sm:$0xff] }
 0x4b9   : > { %7504 = vmatprep.subr.bf16.mxu1 %v8351_v7 }
 0x4bb   : > { %7473 = vmatmul.mubr.msk.bf16.gmra.mrb[8].mxu1 %vm9173_vm6, %v11048_v57  ;;  %v11069_v57 = vld [vmem:[#allocation54_spill] sm:$0xff] }
 0x4bc   : > { %7476 = vmatprep.mubr.msk.bf16.mxu1 %vm9173_vm6, %v11049_v25  ;;  %7505 = vmatpush3.bf16.msra.mxu1 %v8351_v7  ;;  %v8370_v7 = vld [vmem:[#allocation7 + $0x238] sm:$0xff]  }
 0x4bd   : > { %7506 = vmatprep.subr.bf16.mxu1 %v8352_v20  ;;  %v11070_v25 = vld [vmem:[#allocation55_spill] sm:$0xff] }
 0x4c0   : > { %7507 = vmatpush3.bf16.msra.mxu1 %v8352_v20  ;;  %v11068_v20 = vld [vmem:[#allocation47_spill] sm:$0xff] }
 0x4c1   : > { %7508 = vmatprep.subr.bf16.mxu1 %v8353_v10 }
 0x4c3   : > { %7477 = vmatmul.mubr.msk.bf16.gmra.mrb[12].mxu1 %vm9173_vm6, %v11050_v6  ;;  %v11072_v6 = vld [vmem:[#allocation66_spill] sm:$0xff] }
 0x4c4   : > { %7480 = vmatprep.mubr.msk.bf16.mxu1 %vm9173_vm6, %v11051_v50  ;;  %7509 = vmatpush3.bf16.msra.mxu1 %v8353_v10  ;;  %v4839_v10 = vpack.c.bf16 %v10828_v9, %v11033_v11  ;;  %v4840_v50 = vpack.c.bf16 %v10828_v9, %v10068_v27 }
 0x4c5   : > { %7510 = vmatprep.subr.bf16.mxu1 %v8354_v42 }
 0x4c8   : > { %7511 = vmatpush3.bf16.msra.mxu1 %v8354_v42  ;;  %v11071_v42 = vld [vmem:[#allocation61_spill] sm:$0xff] }
 0x4c9   : > { %7544 = vmatprep.subr.bf16.mxu1 %v8355_v23 }
 0x4cb   : > { %7481 = vmatmul.mubr.msk.bf16.gmra.mrb[16].mxu1 %vm9173_vm6, %v11052_v36  ;;  %v8394_v36 = vld [vmem:[%s8793_s6 + $0x48] sm:$0xff] }
 0x4cc   : > { %7484 = vmatprep.mubr.msk.bf16.mxu1 %vm9173_vm6, %v11053_v38 }
 0x4d3   : > { %7485 = vmatmul.mubr.msk.bf16.gmra.mrb[20].mxu1 %vm9173_vm6, %v11054_v16 }
 0x4d4   : > { %7488 = vmatprep.mubr.msk.bf16.mxu1 %vm9173_vm6, %v11055_v15  ;;  %v8385_v15 = vld [vmem:[%s8793_s6 + $0x18] sm:$0xff] }
 0x4db   : > { %7489 = vmatmul.mubr.msk.bf16.gmra.mrb[24].mxu1 %vm9173_vm6, %v11056_v41 }
 0x4dc   : > { %7492 = vmatprep.mubr.msk.bf16.mxu1 %vm9173_vm6, %v10114_v12  ;;  %v8357_v12 = vld [vmem:[#allocation7 + $0x1d0] sm:$0xff]  }
 0x4e3   : > { %7493 = vmatmul.mubr.msk.bf16.gmra.mrb[28].mxu1 %vm9173_vm6, %v10105_v61  ;;  %v6233_v61 = vpack.c.bf16 %v10828_v9, %v11057_v30 }
 0x4e4   : > { %7512 = vmatprep.mubr.msk.bf16.mxu1 %vm8992_vm3, %v9739_v54 }
 0x4eb   : > { %7513 = vmatmul.mubr.msk.bf16.vlgmr.msra.gmra.mrb[0].mxu1 %vm8992_vm3, %v9784_v43  ;;  %v8359_v43 = vld [vmem:[#allocation7 + $0x1e0] sm:$0xff]  }
 0x4ec   : > { %7516 = vmatprep.mubr.msk.bf16.mxu1 %vm8992_vm3, %v9797_v32  ;;  %7545 = vmatpush3.bf16.msra.mxu1 %v8355_v23  ;;  %v8360_v32 = vld [vmem:[#allocation7 + $0x1e8] sm:$0xff]   ;;  %v11073_v23 = vrot.slane %v11011_v22, 1 }
 0x4ed   : > { %7546 = vmatprep.subr.bf16.mxu1 %v8356_v34 }
 0x4f0   : > { %7547 = vmatpush3.bf16.msra.mxu1 %v8356_v34 }
 0x4f1   : > { %7548 = vmatprep.subr.bf16.mxu1 %v8357_v12 }
 0x4f3   : > { %7517 = vmatmul.mubr.msk.bf16.gmra.mrb[4].mxu1 %vm9570_vm7, %v6233_v61 }
 0x4f4   : > { %7520 = vmatprep.mubr.msk.bf16.mxu1 %vm8992_vm3, %v9842_v29  ;;  %7549 = vmatpush3.bf16.msra.mxu1 %v8357_v12  ;;  %v11059_v29 = vrot.slane %v11022_v47, 7  ;;  %v8386_v12 = vld [vmem:[%s8793_s6 + $0x8] sm:$0xff] }
 0x4f5   : > { %7550 = vmatprep.subr.bf16.mxu1 %v8358_v45 }
 0x4f6   : > { %v6245_v2 = vpack.c.bf16 %v10828_v9, %v11059_v29 }
 0x4f8   : > { %7551 = vmatpush3.bf16.msra.mxu1 %v8358_v45 }
 0x4f9   : > { %7552 = vmatprep.subr.bf16.mxu1 %v8359_v43 }
 0x4fb   : > { %7521 = vmatmul.mubr.msk.bf16.gmra.mrb[8].mxu1 %vm8992_vm3, %v9885_v33  ;;  %v8363_v33 = vld [vmem:[#allocation7 + $0x200] sm:$0xff]  }
 0x4fc   : > { %7524 = vmatprep.mubr.msk.bf16.mxu1 %vm8992_vm3, %v9898_v62  ;;  %7553 = vmatpush3.bf16.msra.mxu1 %v8359_v43  ;;  %v11060_v62 = vrot.slane %v11033_v11, 7 }
 0x4fd   : > { %7554 = vmatprep.subr.bf16.mxu1 %v8360_v32 }
 0x4fe   : > { %v6257_v48 = vpack.c.bf16 %v10828_v9, %v11060_v62 }
 0x500   : > { %7555 = vmatpush3.bf16.msra.mxu1 %v8360_v32 }
 0x501   : > { %7556 = vmatprep.subr.bf16.mxu1 %v8361_v21 }
 0x503   : > { %7525 = vmatmul.mubr.msk.bf16.gmra.mrb[12].mxu1 %vm9570_vm7, %v6245_v2  ;;  %v8387_v2 = vld [vmem:[%s8793_s6 + $0x30] sm:$0xff] }
 0x504   : > { %7528 = vmatprep.mubr.msk.bf16.mxu1 %vm8992_vm3, %v9946_v53  ;;  %7557 = vmatpush3.bf16.msra.mxu1 %v8361_v21 }
 0x505   : > { %7558 = vmatprep.subr.bf16.mxu1 %v8362_v5 }
 0x508   : > { %7559 = vmatpush3.bf16.msra.mxu1 %v8362_v5 }
 0x509   : > { %7592 = vmatprep.subr.bf16.mxu1 %v8363_v33 }
 0x50b   : > { %7529 = vmatmul.mubr.msk.bf16.gmra.mrb[16].mxu1 %vm8992_vm3, %v9989_v18  ;;  %v11061_v18 = vrot.slane %v10068_v27, 7 }
 0x50c   : > { %7532 = vmatprep.mubr.msk.bf16.mxu1 %vm8992_vm3, %v10002_v0  ;;  %v11062_v0 = vld [vmem:[#allocation16_spill] sm:$0xff] }
 0x50d   : > { %v6269_v53 = vpack.c.bf16 %v10828_v9, %v11061_v18 }
 0x513   : > { %7533 = vmatmul.mubr.msk.bf16.gmra.mrb[20].mxu1 %vm9570_vm7, %v6257_v48  ;;  %v8388_v48 = vld [vmem:[%s8793_s6 + $0x20] sm:$0xff] }
 0x514   : > { %7536 = vmatprep.mubr.msk.bf16.mxu1 %vm8992_vm3, %v10047_v31  ;;  %v11064_v31 = vld [vmem:[#allocation22_spill] sm:$0xff] }
 0x51b   : > { %7537 = vmatmul.mubr.msk.bf16.gmra.mrb[24].mxu1 %vm8992_vm3, %v10093_v14  ;;  %v8365_v14 = vld [vmem:[#allocation7 + $0x210] sm:$0xff]  }
 0x51c   : > { %7540 = vmatprep.mubr.msk.bf16.mxu1 %vm8992_vm3, %v10108_v63  ;;  %v8366_v63 = vld [vmem:[#allocation7 + $0x218] sm:$0xff]  }
 0x523   : > { %7541 = vmatmul.mubr.msk.bf16.gmra.mrb[28].mxu1 %vm9570_vm7, %v6269_v53 }
 0x524   : > { %7560 = vmatprep.mubr.bf16.mxu1 %v11062_v0 }
 0x52b   : > { %7561 = vmatmul.mubr.bf16.vlgmr.msra.gmra.mrb[0].mxu1 %v11063_v52 }
 0x52c   : > { %7564 = vmatprep.mubr.bf16.mxu1 %v11064_v31  ;;  %7593 = vmatpush3.bf16.msra.mxu1 %v8363_v33 }
 0x52d   : > { %7594 = vmatprep.subr.bf16.mxu1 %v8364_v40 }
 0x530   : > { %7595 = vmatpush3.bf16.msra.mxu1 %v8364_v40  ;;  %v8389_v40 = vld [vmem:[%s8793_s6 + $0x38] sm:$0xff] }
 0x531   : > { %7596 = vmatprep.subr.bf16.mxu1 %v8365_v14 }
 0x533   : > { %7565 = vmatmul.mubr.bf16.gmra.mrb[4].mxu1 %v4837_v26 }
 0x534   : > { %7568 = vmatprep.mubr.bf16.mxu1 %v11065_v37  ;;  %7597 = vmatpush3.bf16.msra.mxu1 %v8365_v14  ;;  %v8390_v14 = vld [vmem:[%s8793_s6 + $0x28] sm:$0xff] }
 0x535   : > { %7598 = vmatprep.subr.bf16.mxu1 %v8366_v63 }
 0x538   : > { %7599 = vmatpush3.bf16.msra.mxu1 %v8366_v63 }
 0x539   : > { %7600 = vmatprep.subr.bf16.mxu1 %v8367_v4 }
 0x53b   : > { %7569 = vmatmul.mubr.bf16.gmra.mrb[8].mxu1 %v11066_v1 }
 0x53c   : > { %7572 = vmatprep.mubr.bf16.mxu1 %v11067_v35  ;;  %7601 = vmatpush3.bf16.msra.mxu1 %v8367_v4 }
 0x53d   : > { %7602 = vmatprep.subr.bf16.mxu1 %v8368_v51 }
 0x540   : > { %7603 = vmatpush3.bf16.msra.mxu1 %v8368_v51 }
 0x541   : > { %7604 = vmatprep.subr.bf16.mxu1 %v8369_v59 }
 0x543   : > { %7573 = vmatmul.mubr.bf16.gmra.mrb[12].mxu1 %v4838_v13  ;;  %v8391_v13 = vld [vmem:[%s8793_s6 + $0x50] sm:$0xff] }
 0x544   : > { %7576 = vmatprep.mubr.bf16.mxu1 %v11068_v20  ;;  %7605 = vmatpush3.bf16.msra.mxu1 %v8369_v59 }
 0x545   : > { %7606 = vmatprep.subr.bf16.mxu1 %v8370_v7 }
 0x548   : > { %7607 = vmatpush3.bf16.msra.mxu1 %v8370_v7 }
 0x54b   : > { %7577 = vmatmul.mubr.bf16.gmra.mrb[16].mxu1 %v11069_v57 }
 0x54c   : > { %7580 = vmatprep.mubr.bf16.mxu1 %v11070_v25  ;;  %v8392_v25 = vld [vmem:[%s8793_s6 + $0x40] sm:$0xff] }
 0x553   : > { %7581 = vmatmul.mubr.bf16.gmra.mrb[20].mxu1 %v4839_v10 }
 0x554   : > { %7584 = vmatprep.mubr.bf16.mxu1 %v11071_v42 }
 0x55b   : > { %7585 = vmatmul.mubr.bf16.gmra.mrb[24].mxu1 %v11072_v6 }
 0x55c   : > { %7588 = vmatprep.mubr.bf16.mxu1 %v10091_v17  ;;  %v6297_v17 = vpack.c.bf16 %v10828_v9, %v11073_v23 }
 0x563   : > { %7589 = vmatmul.mubr.bf16.gmra.mrb[28].mxu1 %v4840_v50  ;;  %v8393_v50 = vld [vmem:[%s8793_s6 + $0x58] sm:$0xff] }
 0x564   : > { %7608 = vmatprep.mubr.msk.bf16.mxu1 %vm9173_vm6, %v9741_v8  ;;  %v11075_v8 = vrot.slane %v11022_v47, 1  ;;  %v8384_v47 = vld [vmem:[%s8793_s6] sm:$0xff] }
 0x56b   : > { %7609 = vmatmul.mubr.msk.bf16.vlgmr.msra.gmra.mrb[0].mxu1 %vm9173_vm6, %v9787_v58  ;;  %v6309_v58 = vpack.c.bf16 %v10828_v9, %v11075_v8 }
 0x56c   : > { %7612 = vmatprep.mubr.msk.bf16.mxu1 %vm9173_vm6, %v9799_v46  ;;  %v11076_v46 = vrot.slane %v11033_v11, 1 }
 0x573   : > { %7613 = vmatmul.mubr.msk.bf16.gmra.mrb[4].mxu1 %vm9653_vm8, %v6297_v17 }
 0x574   : > { %7616 = vmatprep.mubr.msk.bf16.mxu1 %vm9173_vm6, %v9844_v49  ;;  %v6321_v49 = vpack.c.bf16 %v10828_v9, %v11076_v46 }
 0x57b   : > { %7617 = vmatmul.mubr.msk.bf16.gmra.mrb[8].mxu1 %vm9173_vm6, %v9888_v28 }
 0x57c   : > { %7620 = vmatprep.mubr.msk.bf16.mxu1 %vm9173_vm6, %v9900_v44 }
 0x583   : > { %7621 = vmatmul.mubr.msk.bf16.gmra.mrb[12].mxu1 %vm9653_vm8, %v6309_v58 }
 0x584   : > { %7624 = vmatprep.mubr.msk.bf16.mxu1 %vm9173_vm6, %v9948_v19  ;;  %v11077_v19 = vrot.slane %v10068_v27, 1 }
 0x586   : > { %v6333_v28 = vpack.c.bf16 %v10828_v9, %v11077_v19 }
 0x58b   : > { %7625 = vmatmul.mubr.msk.bf16.gmra.mrb[16].mxu1 %vm9173_vm6, %v9992_v39 }
 0x58c   : > { %7628 = vmatprep.mubr.msk.bf16.mxu1 %vm9173_vm6, %v10004_v60 }
 0x593   : > { %7629 = vmatmul.mubr.msk.bf16.gmra.mrb[20].mxu1 %vm9653_vm8, %v6321_v49 }
 0x594   : > { %7632 = vmatprep.mubr.msk.bf16.mxu1 %vm9173_vm6, %v10049_v24  ;;  %v10505_v24 = vld [vmem:[%s10662_s4] ss:$0 sm:$0xff] }
 0x59b   : > { %7633 = vmatmul.mubr.msk.bf16.gmra.mrb[24].mxu1 %vm9173_vm6, %v10095_v55  ;;  %v8383_v55 = vld [vmem:[%s8793_s6 + $0x10] sm:$0xff] }
 0x59c   : > { %7636 = vmatprep.mubr.msk.bf16.mxu1 %vm9173_vm6, %v10110_v56 }
 0x5a3   : > { %7637 = vmatmul.mubr.msk.bf16.gmra.mrb[28].mxu1 %vm9653_vm8, %v6333_v28 }
 0x63e   : > { %v7610_v44 = vpop.f32.mrb[0].mxu1 }
 0x63f   : > { %v5368_v39 = vadd.f32 %v7610_v44, %v10505_v24  ;;  %v5200_v60 = vpop.f32.mrb[1].mxu1 }
 0x640   : > { %v5366_v3 = vadd.f32 %v10505_v24, %v5200_v60  ;;  %v7611_v27 = vpop.f32.mrb[2].mxu1  ;;  %v8395_v60 = vld [vmem:[%s8793_s6 + $0x70] sm:$0xff] }
 0x641   : > { %v5400_v9 = vadd.f32 %v8383_v55, %v5368_v39  ;;  %v5369_v56 = vadd.f32 %v7611_v27, %v10505_v24  ;;  %v5203_v22 = vpop.f32.mrb[3].mxu1 }
 0x642   : > { %v5398_v11 = vadd.f32 %v8384_v47, %v5366_v3  ;;  %v5367_v38 = vadd.f32 %v10505_v24, %v5203_v22 }
 0x643   : > { %v5432_v16 = vmax.f32 %v5400_v9, 0.0  ;;  %v5401_v41 = vadd.f32 %v8385_v15, %v5369_v56  ;;  %v8396_v9 = vld [vmem:[%s8793_s6 + $0x60] sm:$0xff]  ;;  %v8398_v15 = vld [vmem:[%s8793_s6 + $0x68] sm:$0xff] }
 0x644   : > { %v5430_v34 = vmax.f32 %v5398_v11, 0.0  ;;  %v5399_v30 = vadd.f32 %v8386_v12, %v5367_v38  ;;  %v8397_v11 = vld [vmem:[%s8793_s6 + $0x78] sm:$0xff] }
 0x645   : > { %5464 = vst [vmem:[%s10517_s11 + $0x10] sm:$0xff] %v5432_v16  ;;  %v5433_v61 = vmax.f32 %v5401_v41, 0.0 }
 0x646   : > { %5462 = vst [vmem:[%s10517_s11] sm:$0xff] %v5430_v34  ;;  %v5431_v45 = vmax.f32 %v5399_v30, 0.0  ;;  %v7614_v54 = vpop.f32.mrb[4].mxu1 }
 0x647   : > { %5465 = vst [vmem:[%s10517_s11 + $0x18] sm:$0xff] %v5433_v61  ;;  %v5372_v43 = vadd.f32 %v7614_v54, %v10505_v24  ;;  %v5216_v32 = vpop.f32.mrb[5].mxu1 }
 0x648   : > { %5463 = vst [vmem:[%s10517_s11 + $0x8] sm:$0xff] %v5431_v45  ;;  %v5370_v21 = vadd.f32 %v10505_v24, %v5216_v32  ;;  %v7615_v29 = vpop.f32.mrb[6].mxu1  ;;  %v8399_v32 = vld [vmem:[%s8793_s6 + $0x90] sm:$0xff] }
 0x649   : > { %v5404_v5 = vadd.f32 %v8387_v2, %v5372_v43  ;;  %v5373_v33 = vadd.f32 %v7615_v29, %v10505_v24  ;;  %v5219_v62 = vpop.f32.mrb[7].mxu1 }
 0x64a   : > { %v5402_v18 = vadd.f32 %v8388_v48, %v5370_v21  ;;  %v5371_v53 = vadd.f32 %v10505_v24, %v5219_v62 }
 0x64b   : > { %v5436_v0 = vmax.f32 %v5404_v5, 0.0  ;;  %v5405_v52 = vadd.f32 %v8389_v40, %v5373_v33  ;;  %v8400_v5 = vld [vmem:[%s8793_s6 + $0x80] sm:$0xff]  ;;  %v8402_v40 = vld [vmem:[%s8793_s6 + $0x88] sm:$0xff] }
 0x64c   : > { %v5434_v31 = vmax.f32 %v5402_v18, 0.0  ;;  %v5403_v26 = vadd.f32 %v8390_v14, %v5371_v53  ;;  %v8401_v18 = vld [vmem:[%s8793_s6 + $0x98] sm:$0xff] }
 0x64d   : > { %5468 = vst [vmem:[%s10517_s11 + $0x30] sm:$0xff] %v5436_v0  ;;  %v5437_v63 = vmax.f32 %v5405_v52, 0.0 }
 0x64e   : > { %5466 = vst [vmem:[%s10517_s11 + $0x20] sm:$0xff] %v5434_v31  ;;  %v5435_v37 = vmax.f32 %v5403_v26, 0.0  ;;  %v7618_v4 = vpop.f32.mrb[8].mxu1 }
 0x64f   : > { %5469 = vst [vmem:[%s10517_s11 + $0x38] sm:$0xff] %v5437_v63  ;;  %v5376_v51 = vadd.f32 %v7618_v4, %v10505_v24  ;;  %v5232_v1 = vpop.f32.mrb[9].mxu1 }
 0x650   : > { %5467 = vst [vmem:[%s10517_s11 + $0x28] sm:$0xff] %v5435_v37  ;;  %v5374_v35 = vadd.f32 %v10505_v24, %v5232_v1  ;;  %v7619_v59 = vpop.f32.mrb[10].mxu1  ;;  %v8403_v1 = vld [vmem:[%s8793_s6 + $0xb0] sm:$0xff] }
 0x651   : > { %v5408_v7 = vadd.f32 %v8391_v13, %v5376_v51  ;;  %v5377_v20 = vadd.f32 %v7619_v59, %v10505_v24  ;;  %v5235_v57 = vpop.f32.mrb[11].mxu1 }
 0x652   : > { %v5406_v10 = vadd.f32 %v8392_v25, %v5374_v35  ;;  %v5375_v42 = vadd.f32 %v10505_v24, %v5235_v57 }
 0x653   : > { %v5440_v6 = vmax.f32 %v5408_v7, 0.0  ;;  %v5409_v23 = vadd.f32 %v8393_v50, %v5377_v20  ;;  %v8404_v7 = vld [vmem:[%s8793_s6 + $0xa0] sm:$0xff]  ;;  %v8406_v50 = vld [vmem:[%s8793_s6 + $0xa8] sm:$0xff] }
 0x654   : > { %v5438_v17 = vmax.f32 %v5406_v10, 0.0  ;;  %v5407_v8 = vadd.f32 %v8394_v36, %v5375_v42  ;;  %v8405_v10 = vld [vmem:[%s8793_s6 + $0xb8] sm:$0xff] }
 0x655   : > { %5472 = vst [vmem:[%s10517_s11 + $0x50] sm:$0xff] %v5440_v6  ;;  %v5441_v58 = vmax.f32 %v5409_v23, 0.0 }
 0x656   : > { %5470 = vst [vmem:[%s10517_s11 + $0x40] sm:$0xff] %v5438_v17  ;;  %v5439_v46 = vmax.f32 %v5407_v8, 0.0  ;;  %v7622_v49 = vpop.f32.mrb[12].mxu1 }
 0x657   : > { %5473 = vst [vmem:[%s10517_s11 + $0x58] sm:$0xff] %v5441_v58  ;;  %v5380_v19 = vadd.f32 %v7622_v49, %v10505_v24  ;;  %v5248_v28 = vpop.f32.mrb[13].mxu1 }
 0x658   : > { %5471 = vst [vmem:[%s10517_s11 + $0x48] sm:$0xff] %v5439_v46  ;;  %v5378_v44 = vadd.f32 %v10505_v24, %v5248_v28  ;;  %v7623_v39 = vpop.f32.mrb[14].mxu1  ;;  %v8407_v28 = vld [vmem:[%s8793_s6 + $0xd0] sm:$0xff] }
 0x659   : > { %v5412_v3 = vadd.f32 %v8395_v60, %v5380_v19  ;;  %v5381_v27 = vadd.f32 %v7623_v39, %v10505_v24  ;;  %v5251_v55 = vpop.f32.mrb[15].mxu1 }
 0x65a   : > { %v5410_v56 = vadd.f32 %v8396_v9, %v5378_v44  ;;  %v5379_v22 = vadd.f32 %v10505_v24, %v5251_v55 }
 0x65b   : > { %v5444_v47 = vmax.f32 %v5412_v3, 0.0  ;;  %v5413_v38 = vadd.f32 %v8397_v11, %v5381_v27  ;;  %v8408_v3 = vld [vmem:[%s8793_s6 + $0xc0] sm:$0xff]  ;;  %v8410_v11 = vld [vmem:[%s8793_s6 + $0xc8] sm:$0xff] }
 0x65c   : > { %v5442_v16 = vmax.f32 %v5410_v56, 0.0  ;;  %v5411_v41 = vadd.f32 %v8398_v15, %v5379_v22  ;;  %v8409_v56 = vld [vmem:[%s8793_s6 + $0xd8] sm:$0xff] }
 0x65d   : > { %5476 = vst [vmem:[%s10517_s11 + $0x70] sm:$0xff] %v5444_v47  ;;  %v5445_v34 = vmax.f32 %v5413_v38, 0.0 }
 0x65e   : > { %5474 = vst [vmem:[%s10517_s11 + $0x60] sm:$0xff] %v5442_v16  ;;  %v5443_v12 = vmax.f32 %v5411_v41, 0.0  ;;  %v7626_v30 = vpop.f32.mrb[16].mxu1 }
 0x65f   : > { %5477 = vst [vmem:[%s10517_s11 + $0x78] sm:$0xff] %v5445_v34  ;;  %v5384_v61 = vadd.f32 %v7626_v30, %v10505_v24  ;;  %v5264_v45 = vpop.f32.mrb[17].mxu1 }
 0x660   : > { %5475 = vst [vmem:[%s10517_s11 + $0x68] sm:$0xff] %v5443_v12  ;;  %v5382_v54 = vadd.f32 %v10505_v24, %v5264_v45  ;;  %v7627_v43 = vpop.f32.mrb[18].mxu1  ;;  %v8411_v45 = vld [vmem:[%s8793_s6 + $0xf0] sm:$0xff] }
 0x661   : > { %v5416_v21 = vadd.f32 %v8399_v32, %v5384_v61  ;;  %v5385_v29 = vadd.f32 %v7627_v43, %v10505_v24  ;;  %v5267_v2 = vpop.f32.mrb[19].mxu1 }
 0x662   : > { %v5414_v33 = vadd.f32 %v8400_v5, %v5382_v54  ;;  %v5383_v62 = vadd.f32 %v10505_v24, %v5267_v2 }
 0x663   : > { %v5448_v48 = vmax.f32 %v5416_v21, 0.0  ;;  %v5417_v53 = vadd.f32 %v8401_v18, %v5385_v29  ;;  %v8412_v21 = vld [vmem:[%s8793_s6 + $0xe0] sm:$0xff]  ;;  %v8414_v18 = vld [vmem:[%s8793_s6 + $0xe8] sm:$0xff] }
 0x664   : > { %v5446_v0 = vmax.f32 %v5414_v33, 0.0  ;;  %v5415_v52 = vadd.f32 %v8402_v40, %v5383_v62  ;;  %v8413_v33 = vld [vmem:[%s8793_s6 + $0xf8] sm:$0xff] }
 0x665   : > { %5480 = vst [vmem:[%s10517_s11 + $0x90] sm:$0xff] %v5448_v48  ;;  %v5449_v31 = vmax.f32 %v5417_v53, 0.0 }
 0x666   : > { %5478 = vst [vmem:[%s10517_s11 + $0x80] sm:$0xff] %v5446_v0  ;;  %v5447_v14 = vmax.f32 %v5415_v52, 0.0  ;;  %v7630_v26 = vpop.f32.mrb[20].mxu1 }
 0x667   : > { %5481 = vst [vmem:[%s10517_s11 + $0x98] sm:$0xff] %v5449_v31  ;;  %v5388_v63 = vadd.f32 %v7630_v26, %v10505_v24  ;;  %v5280_v37 = vpop.f32.mrb[21].mxu1 }
 0x668   : > { %5479 = vst [vmem:[%s10517_s11 + $0x88] sm:$0xff] %v5447_v14  ;;  %v5386_v4 = vadd.f32 %v10505_v24, %v5280_v37  ;;  %v7631_v51 = vpop.f32.mrb[22].mxu1 }
 0x669   : > { %v5420_v35 = vadd.f32 %v8403_v1, %v5388_v63  ;;  %v5389_v59 = vadd.f32 %v7631_v51, %v10505_v24  ;;  %v5283_v13 = vpop.f32.mrb[23].mxu1 }
 0x66a   : > { %v5418_v20 = vadd.f32 %v8404_v7, %v5386_v4  ;;  %v5387_v57 = vadd.f32 %v10505_v24, %v5283_v13 }
 0x66b   : > { %v5452_v25 = vmax.f32 %v5420_v35, 0.0  ;;  %v5421_v42 = vadd.f32 %v8405_v10, %v5389_v59 }
 0x66c   : > { %v5450_v6 = vmax.f32 %v5418_v20, 0.0  ;;  %v5419_v23 = vadd.f32 %v8406_v50, %v5387_v57 }
 0x66d   : > { %5484 = vst [vmem:[%s10517_s11 + $0xb0] sm:$0xff] %v5452_v25  ;;  %v5453_v17 = vmax.f32 %v5421_v42, 0.0 }
 0x66e   : > { %5482 = vst [vmem:[%s10517_s11 + $0xa0] sm:$0xff] %v5450_v6  ;;  %v5451_v36 = vmax.f32 %v5419_v23, 0.0  ;;  %v7634_v8 = vpop.f32.mrb[24].mxu1 }
 0x66f   : > { %5485 = vst [vmem:[%s10517_s11 + $0xb8] sm:$0xff] %v5453_v17  ;;  %v5392_v58 = vadd.f32 %v7634_v8, %v10505_v24  ;;  %v5296_v46 = vpop.f32.mrb[25].mxu1 }
 0x670   : > { %5483 = vst [vmem:[%s10517_s11 + $0xa8] sm:$0xff] %v5451_v36  ;;  %v5390_v49 = vadd.f32 %v10505_v24, %v5296_v46  ;;  %v7635_v19 = vpop.f32.mrb[26].mxu1 }
 0x671   : > { %v5424_v44 = vadd.f32 %v8407_v28, %v5392_v58  ;;  %v5393_v39 = vadd.f32 %v7635_v19, %v10505_v24  ;;  %v5299_v60 = vpop.f32.mrb[27].mxu1 }
 0x672   : > { %v5422_v27 = vadd.f32 %v8408_v3, %v5390_v49  ;;  %v5391_v55 = vadd.f32 %v10505_v24, %v5299_v60 }
 0x673   : > { %v5456_v9 = vmax.f32 %v5424_v44, 0.0  ;;  %v5425_v22 = vadd.f32 %v8409_v56, %v5393_v39 }
 0x674   : > { %v5454_v47 = vmax.f32 %v5422_v27, 0.0  ;;  %v5423_v38 = vadd.f32 %v8410_v11, %v5391_v55 }
 0x675   : > { %5488 = vst [vmem:[%s10517_s11 + $0xd0] sm:$0xff] %v5456_v9  ;;  %v5457_v16 = vmax.f32 %v5425_v22, 0.0 }
 0x676   : > { %5486 = vst [vmem:[%s10517_s11 + $0xc0] sm:$0xff] %v5454_v47  ;;  %v5455_v15 = vmax.f32 %v5423_v38, 0.0  ;;  %v7638_v41 = vpop.f32.mrb[28].mxu1 }
 0x677   : > { %5489 = vst [vmem:[%s10517_s11 + $0xd8] sm:$0xff] %v5457_v16  ;;  %v5396_v34 = vadd.f32 %v7638_v41, %v10505_v24  ;;  %v5312_v12 = vpop.f32.mrb[29].mxu1 }
 0x678   : > { %5487 = vst [vmem:[%s10517_s11 + $0xc8] sm:$0xff] %v5455_v15  ;;  %v5394_v30 = vadd.f32 %v10505_v24, %v5312_v12  ;;  %v7639_v61 = vpop.f32.mrb[30].mxu1 }
 0x679   : > { %v5428_v54 = vadd.f32 %v8411_v45, %v5396_v34  ;;  %v5397_v43 = vadd.f32 %v7639_v61, %v10505_v24  ;;  %v5315_v32 = vpop.f32.mrb[31].mxu1 }
 0x67a   : > { %v5426_v29 = vadd.f32 %v8412_v21, %v5394_v30  ;;  %v5395_v2 = vadd.f32 %v10505_v24, %v5315_v32 }
 0x67b   : > { %v5460_v5 = vmax.f32 %v5428_v54, 0.0  ;;  %v5429_v62 = vadd.f32 %v8413_v33, %v5397_v43 }
 0x67c   : > { %v5458_v48 = vmax.f32 %v5426_v29, 0.0  ;;  %v5427_v53 = vadd.f32 %v8414_v18, %v5395_v2 }
 0x67d   : > { %5492 = vst [vmem:[%s10517_s11 + $0xf0] sm:$0xff] %v5460_v5  ;;  %v5461_v0 = vmax.f32 %v5429_v62, 0.0 }
 0x67e   : > { %5490 = vst [vmem:[%s10517_s11 + $0xe0] sm:$0xff] %v5458_v48  ;;  %v5459_v24 = vmax.f32 %v5427_v53, 0.0 }
 0x67f   : > { %5493 = vst [vmem:[%s10517_s11 + $0xf8] sm:$0xff] %v5461_v0 }
 0x680   : > { %5491 = vst [vmem:[%s10517_s11 + $0xe8] sm:$0xff] %v5459_v24 }
 0x681   : > { %8514 = shalt.err (!%p8511_p2)
}
 0x682   : > { %s8515_s6 = scalar_lea.hbm %s10609_s9, 4096  ;;  %s8519_s8 = scalar_lea.hbm %s10663_s5, 8192 }
 0x683   : > { %p8516_p13 = scmp.ne.s32.totalorder %s10609_s9, %s8515_s6  ;;  %p8520_p4 = scmp.lt.u32.totalorder %s10609_s9, %s10663_s5 }
 0x684   : > { %p8521_p5 = scmp.lt.u32.totalorder %s8519_s8, %s8515_s6  ;;  %p8523_p11 = scmp.lt.u32.totalorder %s8515_s6, %s10609_s9 }
 0x685   : > { %p8517_p6 = pnand %p8516_p13, %p11078_p0 }
 0x686   : > { %p8522_p8 = por %p8521_p5, %p8520_p4 }
 0x687   : > { %p8518_p10 = pneg %p8517_p6 }
 0x688   : > { %p8524_p1 = por %p8523_p11, %p8522_p8 }
 0x68a   : > { %p8525_p3 = pnand %p8524_p1, %p8518_p10 }
 0x68c   : > { %8528 = shalt.err (!%p8525_p3)
}
 0x68d   : > { %s8583_s28 = smov 128   ;;  %s8584_s15 = smov 8  }
 0x68e   : > { %8162 = dma.vmem_to_hbm [thread:$0]  (%p11078_p0), %s10611_s30, 4096, %s10609_s9, %s5495_s22, %s8583_s28, %s8583_s28, %s8584_s15  }
 0x68f PF: > { %s5523_s16 = sand.u32 1, %s8559_s18   ;;  %p11079_p7 = scmp.ne.s32.totalorder %s10804_s25, 0 }
 0x690   : > { %p11080_p9 = scmp.ge.s32.totalorder %s8571_s21, 2  ;;  %s5524_s12 = scalar_lea.sflag [#allocation4], %s5523_s16 }
 0x692   : > { %p8176_p12 = pnand %p11080_p9, %p11079_p7 }
 0x694   : > { %8554 = dma.done.wait (!%p8176_p12), %s5524_s12, 4096  }
 0x695   : > { %8556 = vsyncadd (!%p8176_p12), %s5524_s12, 4294963200  ;;  %p19_p2 = scmp.ge.s32.totalorder %s8725_s14, 4   ;;  %s11081_s18 = smov %s8563_s19 }
 0x696   : > { %s11082_s19 = smov %s8567_s20  ;;  %s11083_s20 = smov %s8741_s27 }
 0x697   : > { %s11084_s21 = smov %s8725_s14  ;;  %21 = sbr.rel (!%p19_p2) target bundleno = 6 (0x6), region = 93 }
 0x69e   :  { %5529 = vsyncpa [#allocation3], 1 }
 0x69f   :  { %5531 = vsyncpa [#allocation3 + $0x1], 1 }
 0x6a0   :  { %5532 = vsyncpa [#allocation6], 1 }
 0x6a1   :  { %5533 = vsyncpa [#allocation4], 1 }
 0x6a2   :  { %5535 = vsyncpa [#allocation4 + $0x1], 1 }

</bundles_post_ra>
